<compile_context>
chip_gen: v6e
topology: v6e:2x2x1
jax: 0.10.0
libtpu: 0.0.40
codegen_flags: <defaults>
</compile_context>

<pallas_src>
import jax
import jax.numpy as jnp
from jax import lax
from jax.experimental import pallas as pl
from jax.experimental.pallas import tpu as pltpu


# -----------------------------------------------------------------------------
# Pallas kernel: wavefronted 2-layer LSTM recurrence + final FC.
# Everything lives in VMEM (problem is tiny); hidden/cell states stay in vregs.
# -----------------------------------------------------------------------------
def lstm_kernel(x_ref,      # (T*B, F)  f32, time-major flattened over (t, b)
                wih0_ref,   # (4, F, H) f32  per-gate, transposed
                whh0_ref,   # (4, H, H) bf16 per-gate, transposed
                b0_ref,     # (4, 1, H) f32  = b_ih_l0 + b_hh_l0, per gate
                wih1_ref,   # (4, H, H) f32  per-gate, transposed
                whh1_ref,   # (4, H, H) bf16 per-gate, transposed
                b1_ref,     # (4, 1, H) f32  = b_ih_l1 + b_hh_l1, per gate
                wfc_ref,    # (1, H)    f32
                bfc_ref,    # (1, 1)    f32
                out_ref,    # (B, 1)    f32
                *scratch):
    xg0 = scratch[0:4]         # 4 x (T*B, H) f32 : layer-0 per-gate input proj
    xg1 = scratch[4:8]         # 4 x (T*B, H) f32 : layer-1 per-gate input proj
    h0_hist_ref = scratch[8]   # (T*B, H) f32     : layer-0 hidden states, all t

    B = out_ref.shape[0]
    H = wfc_ref.shape[1]
    T = x_ref.shape[0] // B
    f32, bf16 = jnp.float32, jnp.bfloat16

    # ---- Phase 1 (off the recurrent chain): layer-0 input projection for ALL
    #      timesteps, one matmul per gate so each gate lands at lane base 0;
    #      bias folded in here.
    x = x_ref[...]
    for k in range(4):
        xg0[k][...] = jnp.dot(x, wih0_ref[k],
                              preferred_element_type=f32) + b0_ref[k]

    def recurrence(xg, whh_ref, hist_ref):
        # Hoist per-gate recurrent weights out of the loop (loop-invariant).
        whh = [whh_ref[k] for k in range(4)]      # 4 x (H, H) bf16
        h = jnp.zeros((B, H), f32)
        c = jnp.zeros((B, H), f32)
        for t in range(T):                         # fully unrolled (T static)
            h_bf = h.astype(bf16)                  # feed the MXU in bf16
            gi = xg[0][pl.ds(t * B, B), :] + jnp.dot(
                h_bf, whh[0], preferred_element_type=f32)
            gf = xg[1][pl.ds(t * B, B), :] + jnp.dot(
                h_bf, whh[1], preferred_element_type=f32)
            gz = xg[2][pl.ds(t * B, B), :] + jnp.dot(
                h_bf, whh[2], preferred_element_type=f32)
            go = xg[3][pl.ds(t * B, B), :] + jnp.dot(
                h_bf, whh[3], preferred_element_type=f32)
            # PyTorch gate order [i, f, g, o]; all lane-base-0 (B, H) values.
            c = jax.nn.sigmoid(gf) * c + jax.nn.sigmoid(gi) * jnp.tanh(gz)
            h = jax.nn.sigmoid(go) * jnp.tanh(c)
            if hist_ref is not None:
                hist_ref[pl.ds(t * B, B), :] = h   # off-chain store
        return h

    # ---- Phase 2: layer-0 recurrence (only h0 @ Whh0 stays on the chain).
    recurrence(xg0, whh0_ref, h0_hist_ref)

    # ---- Phase 3 (off-chain): layer-1 input projection over the full h0 history.
    h0_hist = h0_hist_ref[...]
    for k in range(4):
        xg1[k][...] = jnp.dot(h0_hist, wih1_ref[k],
                              preferred_element_type=f32) + b1_ref[k]

    # ---- Phase 4: layer-1 recurrence (only h1 @ Whh1 stays on the chain).
    h1 = recurrence(xg1, whh1_ref, None)

    # ---- fc_out(H -> 1): VPU multiply + lane reduction (no N=1 MXU push).
    out_ref[...] = (jnp.sum(h1 * wfc_ref[...], axis=-1, keepdims=True)
                    + bfc_ref[...])


# -----------------------------------------------------------------------------
# One-time parameter layout prep (outside the jitted forward).
# -----------------------------------------------------------------------------
def prepare_params(params):
    """Per-gate weight blocks (PyTorch gate order [i,f,g,o] on the leading axis),
    transposed for (rows,K)@(K,H) matmuls; on-chain recurrent weights in bf16."""
    H = params["w_hh_l0"].shape[1]

    def per_gate(w):                            # (4H, K) -> (4, K, H)
        K = w.shape[1]
        return jnp.transpose(
            jnp.asarray(w, jnp.float32).reshape(4, H, K), (0, 2, 1))

    def per_gate_bias(b_ih, b_hh):              # -> (4, 1, H)
        return (jnp.asarray(b_ih, jnp.float32)
                + jnp.asarray(b_hh, jnp.float32)).reshape(4, 1, H)

    return {
        "wih0": per_gate(params["w_ih_l0"]),                         # (4, F, H) f32
        "whh0": per_gate(params["w_hh_l0"]).astype(jnp.bfloat16),    # (4, H, H) bf16
        "b0":   per_gate_bias(params["b_ih_l0"], params["b_hh_l0"]), # (4, 1, H)
        "wih1": per_gate(params["w_ih_l1"]),                         # (4, H, H) f32
        "whh1": per_gate(params["w_hh_l1"]).astype(jnp.bfloat16),    # (4, H, H) bf16
        "b1":   per_gate_bias(params["b_ih_l1"], params["b_hh_l1"]), # (4, 1, H)
        "wfc":  jnp.asarray(params["fc_w"], jnp.float32),            # (1, H)
        "bfc":  jnp.asarray(params["fc_b"], jnp.float32)[None, :],   # (1, 1)
    }


@jax.jit
def lstm_model_forward(x, prep):
    """x: (B, T, F) float32 -> (B,) float32  (matches LSTMModel.forward)."""
    B, T, F = x.shape
    H = prep["wfc"].shape[1]
    H4 = 4 * H

    x_flat = jnp.transpose(x, (1, 0, 2)).reshape(T * B, F)     # time-major, flat

    vmem = pl.BlockSpec(memory_space=pltpu.MemorySpace.VMEM)

    flops = 2 * T * B * H4 * (F + 3 * H) + 2 * B * H
    transcendentals = 10 * T * B * H     # 3 sigmoid + 2 tanh per layer per step
    bytes_accessed = (
        4 * (x_flat.size + prep["wih0"].size + prep["wih1"].size
             + prep["b0"].size + prep["b1"].size + prep["wfc"].size + 1 + B)
        + 2 * (prep["whh0"].size + prep["whh1"].size))

    out = pl.pallas_call(
        lstm_kernel,
        out_shape=jax.ShapeDtypeStruct((B, 1), jnp.float32),
        in_specs=[vmem] * 9,
        out_specs=vmem,
        scratch_shapes=[pltpu.VMEM((T * B, H), jnp.float32) for _ in range(9)],
        cost_estimate=pl.CostEstimate(flops=flops,
                                      transcendentals=transcendentals,
                                      bytes_accessed=bytes_accessed),
    )(x_flat, prep["wih0"], prep["whh0"], prep["b0"],
      prep["wih1"], prep["whh1"], prep["b1"], prep["wfc"], prep["bfc"])

    return out[:, 0]                                            # .squeeze()


# -----------------------------------------------------------------------------
# Deterministic parameter init (PyTorch nn.LSTM / nn.Linear shapes).
# -----------------------------------------------------------------------------
def init_params(key, d_feat=6, hidden_size=64):
    H = hidden_size
    bound = 1.0 / jnp.sqrt(jnp.float32(H))
    names_shapes = [
        ("w_ih_l0", (4 * H, d_feat)),
        ("w_hh_l0", (4 * H, H)),
        ("b_ih_l0", (4 * H,)),
        ("b_hh_l0", (4 * H,)),
        ("w_ih_l1", (4 * H, H)),
        ("w_hh_l1", (4 * H, H)),
        ("b_ih_l1", (4 * H,)),
        ("b_hh_l1", (4 * H,)),
        ("fc_w", (1, H)),
        ("fc_b", (1,)),
    ]
    params = {}
    keys = jax.random.split(key, len(names_shapes))
    for k, (name, shape) in zip(keys, names_shapes):
        params[name] = jax.random.uniform(
            k, shape, jnp.float32, minval=-bound, maxval=bound)
    return params


# -----------------------------------------------------------------------------
# Pure-JAX reference (sanity check against the Pallas kernel).
# -----------------------------------------------------------------------------
def reference_forward(x, params):
    B, T, F = x.shape
    H = params["w_hh_l0"].shape[1]

    def cell(x_t, h, c, wih, whh, b_ih, b_hh):
        g = x_t @ wih.T + h @ whh.T + b_ih + b_hh
        i, f, gg, o = jnp.split(g, 4, axis=-1)
        c_new = jax.nn.sigmoid(f) * c + jax.nn.sigmoid(i) * jnp.tanh(gg)
        h_new = jax.nn.sigmoid(o) * jnp.tanh(c_new)
        return h_new, c_new

    def step(carry, x_t):
        h0, c0, h1, c1 = carry
        h0, c0 = cell(x_t, h0, c0, params["w_ih_l0"], params["w_hh_l0"],
                      params["b_ih_l0"], params["b_hh_l0"])
        h1, c1 = cell(h0, h1, c1, params["w_ih_l1"], params["w_hh_l1"],
                      params["b_ih_l1"], params["b_hh_l1"])
        return (h0, c0, h1, c1), None

    z = jnp.zeros((B, H), jnp.float32)
    (h0, c0, h1, c1), _ = lax.scan(step, (z, z, z, z),
                                   jnp.transpose(x, (1, 0, 2)))
    return (h1 @ params["fc_w"].T + params["fc_b"])[:, 0]


if __name__ == "__main__":
    B, T, F, H = 8, 8, 6, 64   # d_feat=6, hidden_size=64, num_layers=2 (module defaults)

    key = jax.random.PRNGKey(0)
    kx, kp = jax.random.split(key)
    x = jax.random.normal(kx, (B, T, F), jnp.float32)
    params = init_params(kp, d_feat=F, hidden_size=H)
    prep = prepare_params(params)   # weight layout prep done once, outside the jit

    out = jax.block_until_ready(lstm_model_forward(x, prep))
    ref = reference_forward(x, params)

    assert out.shape == (B,)
    # Recurrent weights are bf16 in the kernel (MXU-native); gate math stays f32.
    assert jnp.allclose(out, ref, atol=5e-3, rtol=5e-2), (out, ref)

    print("KERNEL_OK")
</pallas_src>

<mosaic_0001>
module attributes {stable_mosaic.version = 11 : i64} {
  func.func @lstm_kernel(%arg0: memref<64x6xf32, #tpu.memory_space<vmem>>, %arg1: memref<4x6x64xf32, #tpu.memory_space<vmem>>, %arg2: memref<4x64x64xbf16, #tpu.memory_space<vmem>>, %arg3: memref<4x1x64xf32, #tpu.memory_space<vmem>>, %arg4: memref<4x64x64xf32, #tpu.memory_space<vmem>>, %arg5: memref<4x64x64xbf16, #tpu.memory_space<vmem>>, %arg6: memref<4x1x64xf32, #tpu.memory_space<vmem>>, %arg7: memref<1x64xf32, #tpu.memory_space<vmem>>, %arg8: memref<1x1xf32, #tpu.memory_space<vmem>>, %arg9: memref<8x1xf32, #tpu.memory_space<vmem>>, %arg10: memref<64x64xf32, #tpu.memory_space<vmem>>, %arg11: memref<64x64xf32, #tpu.memory_space<vmem>>, %arg12: memref<64x64xf32, #tpu.memory_space<vmem>>, %arg13: memref<64x64xf32, #tpu.memory_space<vmem>>, %arg14: memref<64x64xf32, #tpu.memory_space<vmem>>, %arg15: memref<64x64xf32, #tpu.memory_space<vmem>>, %arg16: memref<64x64xf32, #tpu.memory_space<vmem>>, %arg17: memref<64x64xf32, #tpu.memory_space<vmem>>, %arg18: memref<64x64xf32, #tpu.memory_space<vmem>>) attributes {dimension_semantics = [], scalar_prefetch = 0 : i64, scratch_operands = 9 : i64, tpu.core_type = #tpu.core_type<tc>} {
    %c0 = arith.constant 0 : index
    %c0_0 = arith.constant 0 : index
    %0 = vector.load %arg0[%c0, %c0_0] : memref<64x6xf32, #tpu.memory_space<vmem>>, vector<64x6xf32>
    %c0_1 = arith.constant 0 : index
    %c0_2 = arith.constant 0 : index
    %c0_3 = arith.constant 0 : index
    %1 = vector.load %arg1[%c0_1, %c0_2, %c0_3] : memref<4x6x64xf32, #tpu.memory_space<vmem>>, vector<1x6x64xf32>
    %2 = vector.shape_cast %1 : vector<1x6x64xf32> to vector<6x64xf32>
    %cst = arith.constant dense<0.000000e+00> : vector<64x64xf32>
    %3 = tpu.matmul %0, %2, %cst {dimension_numbers = #tpu.dot_dimension_numbers<[1], [0], [0], [1], [0, 0, 1, 1], [], []>} : vector<64x6xf32>, vector<6x64xf32>, vector<64x64xf32> -> vector<64x64xf32>
    %c0_4 = arith.constant 0 : index
    %c0_5 = arith.constant 0 : index
    %c0_6 = arith.constant 0 : index
    %4 = vector.load %arg3[%c0_4, %c0_5, %c0_6] : memref<4x1x64xf32, #tpu.memory_space<vmem>>, vector<1x1x64xf32>
    %5 = vector.shape_cast %4 : vector<1x1x64xf32> to vector<1x64xf32>
    %6 = vector.broadcast %5 : vector<1x64xf32> to vector<64x64xf32>
    %7 = arith.addf %3, %6 : vector<64x64xf32>
    %c0_7 = arith.constant 0 : index
    %c0_8 = arith.constant 0 : index
    %8 = vector.load %arg10[%c0_7, %c0_8] : memref<64x64xf32, #tpu.memory_space<vmem>>, vector<64x64xf32>
    tpu.vector_store %arg10[%c0_7, %c0_8], %7 {strides = array<i32>} : memref<64x64xf32, #tpu.memory_space<vmem>>, vector<64x64xf32>,
    %c1 = arith.constant 1 : index
    %c0_9 = arith.constant 0 : index
    %c0_10 = arith.constant 0 : index
    %9 = vector.load %arg1[%c1, %c0_9, %c0_10] : memref<4x6x64xf32, #tpu.memory_space<vmem>>, vector<1x6x64xf32>
    %10 = vector.shape_cast %9 : vector<1x6x64xf32> to vector<6x64xf32>
    %cst_11 = arith.constant dense<0.000000e+00> : vector<64x64xf32>
    %11 = tpu.matmul %0, %10, %cst_11 {dimension_numbers = #tpu.dot_dimension_numbers<[1], [0], [0], [1], [0, 0, 1, 1], [], []>} : vector<64x6xf32>, vector<6x64xf32>, vector<64x64xf32> -> vector<64x64xf32>
    %c1_12 = arith.constant 1 : index
    %c0_13 = arith.constant 0 : index
    %c0_14 = arith.constant 0 : index
    %12 = vector.load %arg3[%c1_12, %c0_13, %c0_14] : memref<4x1x64xf32, #tpu.memory_space<vmem>>, vector<1x1x64xf32>
    %13 = vector.shape_cast %12 : vector<1x1x64xf32> to vector<1x64xf32>
    %14 = vector.broadcast %13 : vector<1x64xf32> to vector<64x64xf32>
    %15 = arith.addf %11, %14 : vector<64x64xf32>
    %c0_15 = arith.constant 0 : index
    %c0_16 = arith.constant 0 : index
    %16 = vector.load %arg11[%c0_15, %c0_16] : memref<64x64xf32, #tpu.memory_space<vmem>>, vector<64x64xf32>
    tpu.vector_store %arg11[%c0_15, %c0_16], %15 {strides = array<i32>} : memref<64x64xf32, #tpu.memory_space<vmem>>, vector<64x64xf32>,
    %c2 = arith.constant 2 : index
    %c0_17 = arith.constant 0 : index
    %c0_18 = arith.constant 0 : index
    %17 = vector.load %arg1[%c2, %c0_17, %c0_18] : memref<4x6x64xf32, #tpu.memory_space<vmem>>, vector<1x6x64xf32>
    %18 = vector.shape_cast %17 : vector<1x6x64xf32> to vector<6x64xf32>
    %cst_19 = arith.constant dense<0.000000e+00> : vector<64x64xf32>
    %19 = tpu.matmul %0, %18, %cst_19 {dimension_numbers = #tpu.dot_dimension_numbers<[1], [0], [0], [1], [0, 0, 1, 1], [], []>} : vector<64x6xf32>, vector<6x64xf32>, vector<64x64xf32> -> vector<64x64xf32>
    %c2_20 = arith.constant 2 : index
    %c0_21 = arith.constant 0 : index
    %c0_22 = arith.constant 0 : index
    %20 = vector.load %arg3[%c2_20, %c0_21, %c0_22] : memref<4x1x64xf32, #tpu.memory_space<vmem>>, vector<1x1x64xf32>
    %21 = vector.shape_cast %20 : vector<1x1x64xf32> to vector<1x64xf32>
    %22 = vector.broadcast %21 : vector<1x64xf32> to vector<64x64xf32>
    %23 = arith.addf %19, %22 : vector<64x64xf32>
    %c0_23 = arith.constant 0 : index
    %c0_24 = arith.constant 0 : index
    %24 = vector.load %arg12[%c0_23, %c0_24] : memref<64x64xf32, #tpu.memory_space<vmem>>, vector<64x64xf32>
    tpu.vector_store %arg12[%c0_23, %c0_24], %23 {strides = array<i32>} : memref<64x64xf32, #tpu.memory_space<vmem>>, vector<64x64xf32>,
    %c3 = arith.constant 3 : index
    %c0_25 = arith.constant 0 : index
    %c0_26 = arith.constant 0 : index
    %25 = vector.load %arg1[%c3, %c0_25, %c0_26] : memref<4x6x64xf32, #tpu.memory_space<vmem>>, vector<1x6x64xf32>
    %26 = vector.shape_cast %25 : vector<1x6x64xf32> to vector<6x64xf32>
    %cst_27 = arith.constant dense<0.000000e+00> : vector<64x64xf32>
    %27 = tpu.matmul %0, %26, %cst_27 {dimension_numbers = #tpu.dot_dimension_numbers<[1], [0], [0], [1], [0, 0, 1, 1], [], []>} : vector<64x6xf32>, vector<6x64xf32>, vector<64x64xf32> -> vector<64x64xf32>
    %c3_28 = arith.constant 3 : index
    %c0_29 = arith.constant 0 : index
    %c0_30 = arith.constant 0 : index
    %28 = vector.load %arg3[%c3_28, %c0_29, %c0_30] : memref<4x1x64xf32, #tpu.memory_space<vmem>>, vector<1x1x64xf32>
    %29 = vector.shape_cast %28 : vector<1x1x64xf32> to vector<1x64xf32>
    %30 = vector.broadcast %29 : vector<1x64xf32> to vector<64x64xf32>
    %31 = arith.addf %27, %30 : vector<64x64xf32>
    %c0_31 = arith.constant 0 : index
    %c0_32 = arith.constant 0 : index
    %32 = vector.load %arg13[%c0_31, %c0_32] : memref<64x64xf32, #tpu.memory_space<vmem>>, vector<64x64xf32>
    tpu.vector_store %arg13[%c0_31, %c0_32], %31 {strides = array<i32>} : memref<64x64xf32, #tpu.memory_space<vmem>>, vector<64x64xf32>,
    %c0_33 = arith.constant 0 : index
    %c0_34 = arith.constant 0 : index
    %c0_35 = arith.constant 0 : index
    %33 = vector.load %arg2[%c0_33, %c0_34, %c0_35] : memref<4x64x64xbf16, #tpu.memory_space<vmem>>, vector<1x64x64xbf16>
    %34 = vector.shape_cast %33 : vector<1x64x64xbf16> to vector<64x64xbf16>
    %c1_36 = arith.constant 1 : index
    %c0_37 = arith.constant 0 : index
    %c0_38 = arith.constant 0 : index
    %35 = vector.load %arg2[%c1_36, %c0_37, %c0_38] : memref<4x64x64xbf16, #tpu.memory_space<vmem>>, vector<1x64x64xbf16>
    %36 = vector.shape_cast %35 : vector<1x64x64xbf16> to vector<64x64xbf16>
    %c2_39 = arith.constant 2 : index
    %c0_40 = arith.constant 0 : index
    %c0_41 = arith.constant 0 : index
    %37 = vector.load %arg2[%c2_39, %c0_40, %c0_41] : memref<4x64x64xbf16, #tpu.memory_space<vmem>>, vector<1x64x64xbf16>
    %38 = vector.shape_cast %37 : vector<1x64x64xbf16> to vector<64x64xbf16>
    %c3_42 = arith.constant 3 : index
    %c0_43 = arith.constant 0 : index
    %c0_44 = arith.constant 0 : index
    %39 = vector.load %arg2[%c3_42, %c0_43, %c0_44] : memref<4x64x64xbf16, #tpu.memory_space<vmem>>, vector<1x64x64xbf16>
    %40 = vector.shape_cast %39 : vector<1x64x64xbf16> to vector<64x64xbf16>
    %cst_45 = arith.constant 0.000000e+00 : f32
    %41 = vector.broadcast %cst_45 : f32 to vector<8x64xf32>
    %cst_46 = arith.constant 0.000000e+00 : f32
    %42 = vector.broadcast %cst_46 : f32 to vector<8x64xf32>
    %43 = arith.truncf %41 : vector<8x64xf32> to vector<8x64xbf16>
    %c0_47 = arith.constant 0 : index
    %c0_48 = arith.constant 0 : index
    %44 = vector.load %arg10[%c0_47, %c0_48] : memref<64x64xf32, #tpu.memory_space<vmem>>, vector<8x64xf32>
    %cst_49 = arith.constant dense<0.000000e+00> : vector<8x64xf32>
    %45 = tpu.matmul %43, %34, %cst_49 {dimension_numbers = #tpu.dot_dimension_numbers<[1], [0], [0], [1], [0, 0, 1, 1], [], []>} : vector<8x64xbf16>, vector<64x64xbf16>, vector<8x64xf32> -> vector<8x64xf32>
    %46 = arith.addf %44, %45 : vector<8x64xf32>
    %c0_50 = arith.constant 0 : index
    %c0_51 = arith.constant 0 : index
    %47 = vector.load %arg11[%c0_50, %c0_51] : memref<64x64xf32, #tpu.memory_space<vmem>>, vector<8x64xf32>
    %cst_52 = arith.constant dense<0.000000e+00> : vector<8x64xf32>
    %48 = tpu.matmul %43, %36, %cst_52 {dimension_numbers = #tpu.dot_dimension_numbers<[1], [0], [0], [1], [0, 0, 1, 1], [], []>} : vector<8x64xbf16>, vector<64x64xbf16>, vector<8x64xf32> -> vector<8x64xf32>
    %49 = arith.addf %47, %48 : vector<8x64xf32>
    %c0_53 = arith.constant 0 : index
    %c0_54 = arith.constant 0 : index
    %50 = vector.load %arg12[%c0_53, %c0_54] : memref<64x64xf32, #tpu.memory_space<vmem>>, vector<8x64xf32>
    %cst_55 = arith.constant dense<0.000000e+00> : vector<8x64xf32>
    %51 = tpu.matmul %43, %38, %cst_55 {dimension_numbers = #tpu.dot_dimension_numbers<[1], [0], [0], [1], [0, 0, 1, 1], [], []>} : vector<8x64xbf16>, vector<64x64xbf16>, vector<8x64xf32> -> vector<8x64xf32>
    %52 = arith.addf %50, %51 : vector<8x64xf32>
    %c0_56 = arith.constant 0 : index
    %c0_57 = arith.constant 0 : index
    %53 = vector.load %arg13[%c0_56, %c0_57] : memref<64x64xf32, #tpu.memory_space<vmem>>, vector<8x64xf32>
    %cst_58 = arith.constant dense<0.000000e+00> : vector<8x64xf32>
    %54 = tpu.matmul %43, %40, %cst_58 {dimension_numbers = #tpu.dot_dimension_numbers<[1], [0], [0], [1], [0, 0, 1, 1], [], []>} : vector<8x64xbf16>, vector<64x64xbf16>, vector<8x64xf32> -> vector<8x64xf32>
    %55 = arith.addf %53, %54 : vector<8x64xf32>
    %56 = arith.negf %49 : vector<8x64xf32>
    %57 = math.exp %56 : vector<8x64xf32>
    %cst_59 = arith.constant 1.000000e+00 : f32
    %58 = vector.broadcast %cst_59 : f32 to vector<8x64xf32>
    %59 = arith.addf %58, %57 : vector<8x64xf32>
    %60 = arith.divf %58, %59 : vector<8x64xf32>
    %61 = arith.mulf %60, %42 : vector<8x64xf32>
    %62 = arith.negf %46 : vector<8x64xf32>
    %63 = math.exp %62 : vector<8x64xf32>
    %cst_60 = arith.constant 1.000000e+00 : f32
    %64 = vector.broadcast %cst_60 : f32 to vector<8x64xf32>
    %65 = arith.addf %64, %63 : vector<8x64xf32>
    %66 = arith.divf %64, %65 : vector<8x64xf32>
    %67 = math.tanh %52 : vector<8x64xf32>
    %68 = arith.mulf %66, %67 : vector<8x64xf32>
    %69 = arith.addf %61, %68 : vector<8x64xf32>
    %70 = arith.negf %55 : vector<8x64xf32>
    %71 = math.exp %70 : vector<8x64xf32>
    %cst_61 = arith.constant 1.000000e+00 : f32
    %72 = vector.broadcast %cst_61 : f32 to vector<8x64xf32>
    %73 = arith.addf %72, %71 : vector<8x64xf32>
    %74 = arith.divf %72, %73 : vector<8x64xf32>
    %75 = math.tanh %69 : vector<8x64xf32>
    %76 = arith.mulf %74, %75 : vector<8x64xf32>
    %c0_62 = arith.constant 0 : index
    %c0_63 = arith.constant 0 : index
    %77 = vector.load %arg18[%c0_62, %c0_63] : memref<64x64xf32, #tpu.memory_space<vmem>>, vector<8x64xf32>
    tpu.vector_store %arg18[%c0_62, %c0_63], %76 {strides = array<i32>} : memref<64x64xf32, #tpu.memory_space<vmem>>, vector<8x64xf32>,
    %78 = arith.truncf %76 : vector<8x64xf32> to vector<8x64xbf16>
    %c8 = arith.constant 8 : index
    %c0_64 = arith.constant 0 : index
    %79 = vector.load %arg10[%c8, %c0_64] : memref<64x64xf32, #tpu.memory_space<vmem>>, vector<8x64xf32>
    %cst_65 = arith.constant dense<0.000000e+00> : vector<8x64xf32>
    %80 = tpu.matmul %78, %34, %cst_65 {dimension_numbers = #tpu.dot_dimension_numbers<[1], [0], [0], [1], [0, 0, 1, 1], [], []>} : vector<8x64xbf16>, vector<64x64xbf16>, vector<8x64xf32> -> vector<8x64xf32>
    %81 = arith.addf %79, %80 : vector<8x64xf32>
    %c8_66 = arith.constant 8 : index
    %c0_67 = arith.constant 0 : index
    %82 = vector.load %arg11[%c8_66, %c0_67] : memref<64x64xf32, #tpu.memory_space<vmem>>, vector<8x64xf32>
    %cst_68 = arith.constant dense<0.000000e+00> : vector<8x64xf32>
    %83 = tpu.matmul %78, %36, %cst_68 {dimension_numbers = #tpu.dot_dimension_numbers<[1], [0], [0], [1], [0, 0, 1, 1], [], []>} : vector<8x64xbf16>, vector<64x64xbf16>, vector<8x64xf32> -> vector<8x64xf32>
    %84 = arith.addf %82, %83 : vector<8x64xf32>
    %c8_69 = arith.constant 8 : index
    %c0_70 = arith.constant 0 : index
    %85 = vector.load %arg12[%c8_69, %c0_70] : memref<64x64xf32, #tpu.memory_space<vmem>>, vector<8x64xf32>
    %cst_71 = arith.constant dense<0.000000e+00> : vector<8x64xf32>
    %86 = tpu.matmul %78, %38, %cst_71 {dimension_numbers = #tpu.dot_dimension_numbers<[1], [0], [0], [1], [0, 0, 1, 1], [], []>} : vector<8x64xbf16>, vector<64x64xbf16>, vector<8x64xf32> -> vector<8x64xf32>
    %87 = arith.addf %85, %86 : vector<8x64xf32>
    %c8_72 = arith.constant 8 : index
    %c0_73 = arith.constant 0 : index
    %88 = vector.load %arg13[%c8_72, %c0_73] : memref<64x64xf32, #tpu.memory_space<vmem>>, vector<8x64xf32>
    %cst_74 = arith.constant dense<0.000000e+00> : vector<8x64xf32>
    %89 = tpu.matmul %78, %40, %cst_74 {dimension_numbers = #tpu.dot_dimension_numbers<[1], [0], [0], [1], [0, 0, 1, 1], [], []>} : vector<8x64xbf16>, vector<64x64xbf16>, vector<8x64xf32> -> vector<8x64xf32>
    %90 = arith.addf %88, %89 : vector<8x64xf32>
    %91 = arith.negf %84 : vector<8x64xf32>
    %92 = math.exp %91 : vector<8x64xf32>
    %cst_75 = arith.constant 1.000000e+00 : f32
    %93 = vector.broadcast %cst_75 : f32 to vector<8x64xf32>
    %94 = arith.addf %93, %92 : vector<8x64xf32>
    %95 = arith.divf %93, %94 : vector<8x64xf32>
    %96 = arith.mulf %95, %69 : vector<8x64xf32>
    %97 = arith.negf %81 : vector<8x64xf32>
    %98 = math.exp %97 : vector<8x64xf32>
    %cst_76 = arith.constant 1.000000e+00 : f32
    %99 = vector.broadcast %cst_76 : f32 to vector<8x64xf32>
    %100 = arith.addf %99, %98 : vector<8x64xf32>
    %101 = arith.divf %99, %100 : vector<8x64xf32>
    %102 = math.tanh %87 : vector<8x64xf32>
    %103 = arith.mulf %101, %102 : vector<8x64xf32>
    %104 = arith.addf %96, %103 : vector<8x64xf32>
    %105 = arith.negf %90 : vector<8x64xf32>
    %106 = math.exp %105 : vector<8x64xf32>
    %cst_77 = arith.constant 1.000000e+00 : f32
    %107 = vector.broadcast %cst_77 : f32 to vector<8x64xf32>
    %108 = arith.addf %107, %106 : vector<8x64xf32>
    %109 = arith.divf %107, %108 : vector<8x64xf32>
    %110 = math.tanh %104 : vector<8x64xf32>
    %111 = arith.mulf %109, %110 : vector<8x64xf32>
    %c8_78 = arith.constant 8 : index
    %c0_79 = arith.constant 0 : index
    %112 = vector.load %arg18[%c8_78, %c0_79] : memref<64x64xf32, #tpu.memory_space<vmem>>, vector<8x64xf32>
    tpu.vector_store %arg18[%c8_78, %c0_79], %111 {strides = array<i32>} : memref<64x64xf32, #tpu.memory_space<vmem>>, vector<8x64xf32>,
    %113 = arith.truncf %111 : vector<8x64xf32> to vector<8x64xbf16>
    %c16 = arith.constant 16 : index
    %c0_80 = arith.constant 0 : index
    %114 = vector.load %arg10[%c16, %c0_80] : memref<64x64xf32, #tpu.memory_space<vmem>>, vector<8x64xf32>
    %cst_81 = arith.constant dense<0.000000e+00> : vector<8x64xf32>
    %115 = tpu.matmul %113, %34, %cst_81 {dimension_numbers = #tpu.dot_dimension_numbers<[1], [0], [0], [1], [0, 0, 1, 1], [], []>} : vector<8x64xbf16>, vector<64x64xbf16>, vector<8x64xf32> -> vector<8x64xf32>
    %116 = arith.addf %114, %115 : vector<8x64xf32>
    %c16_82 = arith.constant 16 : index
    %c0_83 = arith.constant 0 : index
    %117 = vector.load %arg11[%c16_82, %c0_83] : memref<64x64xf32, #tpu.memory_space<vmem>>, vector<8x64xf32>
    %cst_84 = arith.constant dense<0.000000e+00> : vector<8x64xf32>
    %118 = tpu.matmul %113, %36, %cst_84 {dimension_numbers = #tpu.dot_dimension_numbers<[1], [0], [0], [1], [0, 0, 1, 1], [], []>} : vector<8x64xbf16>, vector<64x64xbf16>, vector<8x64xf32> -> vector<8x64xf32>
    %119 = arith.addf %117, %118 : vector<8x64xf32>
    %c16_85 = arith.constant 16 : index
    %c0_86 = arith.constant 0 : index
    %120 = vector.load %arg12[%c16_85, %c0_86] : memref<64x64xf32, #tpu.memory_space<vmem>>, vector<8x64xf32>
    %cst_87 = arith.constant dense<0.000000e+00> : vector<8x64xf32>
    %121 = tpu.matmul %113, %38, %cst_87 {dimension_numbers = #tpu.dot_dimension_numbers<[1], [0], [0], [1], [0, 0, 1, 1], [], []>} : vector<8x64xbf16>, vector<64x64xbf16>, vector<8x64xf32> -> vector<8x64xf32>
    %122 = arith.addf %120, %121 : vector<8x64xf32>
    %c16_88 = arith.constant 16 : index
    %c0_89 = arith.constant 0 : index
    %123 = vector.load %arg13[%c16_88, %c0_89] : memref<64x64xf32, #tpu.memory_space<vmem>>, vector<8x64xf32>
    %cst_90 = arith.constant dense<0.000000e+00> : vector<8x64xf32>
    %124 = tpu.matmul %113, %40, %cst_90 {dimension_numbers = #tpu.dot_dimension_numbers<[1], [0], [0], [1], [0, 0, 1, 1], [], []>} : vector<8x64xbf16>, vector<64x64xbf16>, vector<8x64xf32> -> vector<8x64xf32>
    %125 = arith.addf %123, %124 : vector<8x64xf32>
    %126 = arith.negf %119 : vector<8x64xf32>
    %127 = math.exp %126 : vector<8x64xf32>
    %cst_91 = arith.constant 1.000000e+00 : f32
    %128 = vector.broadcast %cst_91 : f32 to vector<8x64xf32>
    %129 = arith.addf %128, %127 : vector<8x64xf32>
    %130 = arith.divf %128, %129 : vector<8x64xf32>
    %131 = arith.mulf %130, %104 : vector<8x64xf32>
    %132 = arith.negf %116 : vector<8x64xf32>
    %133 = math.exp %132 : vector<8x64xf32>
    %cst_92 = arith.constant 1.000000e+00 : f32
    %134 = vector.broadcast %cst_92 : f32 to vector<8x64xf32>
    %135 = arith.addf %134, %133 : vector<8x64xf32>
    %136 = arith.divf %134, %135 : vector<8x64xf32>
    %137 = math.tanh %122 : vector<8x64xf32>
    %138 = arith.mulf %136, %137 : vector<8x64xf32>
    %139 = arith.addf %131, %138 : vector<8x64xf32>
    %140 = arith.negf %125 : vector<8x64xf32>
    %141 = math.exp %140 : vector<8x64xf32>
    %cst_93 = arith.constant 1.000000e+00 : f32
    %142 = vector.broadcast %cst_93 : f32 to vector<8x64xf32>
    %143 = arith.addf %142, %141 : vector<8x64xf32>
    %144 = arith.divf %142, %143 : vector<8x64xf32>
    %145 = math.tanh %139 : vector<8x64xf32>
    %146 = arith.mulf %144, %145 : vector<8x64xf32>
    %c16_94 = arith.constant 16 : index
    %c0_95 = arith.constant 0 : index
    %147 = vector.load %arg18[%c16_94, %c0_95] : memref<64x64xf32, #tpu.memory_space<vmem>>, vector<8x64xf32>
    tpu.vector_store %arg18[%c16_94, %c0_95], %146 {strides = array<i32>} : memref<64x64xf32, #tpu.memory_space<vmem>>, vector<8x64xf32>,
    %148 = arith.truncf %146 : vector<8x64xf32> to vector<8x64xbf16>
    %c24 = arith.constant 24 : index
    %c0_96 = arith.constant 0 : index
    %149 = vector.load %arg10[%c24, %c0_96] : memref<64x64xf32, #tpu.memory_space<vmem>>, vector<8x64xf32>
    %cst_97 = arith.constant dense<0.000000e+00> : vector<8x64xf32>
    %150 = tpu.matmul %148, %34, %cst_97 {dimension_numbers = #tpu.dot_dimension_numbers<[1], [0], [0], [1], [0, 0, 1, 1], [], []>} : vector<8x64xbf16>, vector<64x64xbf16>, vector<8x64xf32> -> vector<8x64xf32>
    %151 = arith.addf %149, %150 : vector<8x64xf32>
    %c24_98 = arith.constant 24 : index
    %c0_99 = arith.constant 0 : index
    %152 = vector.load %arg11[%c24_98, %c0_99] : memref<64x64xf32, #tpu.memory_space<vmem>>, vector<8x64xf32>
    %cst_100 = arith.constant dense<0.000000e+00> : vector<8x64xf32>
    %153 = tpu.matmul %148, %36, %cst_100 {dimension_numbers = #tpu.dot_dimension_numbers<[1], [0], [0], [1], [0, 0, 1, 1], [], []>} : vector<8x64xbf16>, vector<64x64xbf16>, vector<8x64xf32> -> vector<8x64xf32>
    %154 = arith.addf %152, %153 : vector<8x64xf32>
    %c24_101 = arith.constant 24 : index
    %c0_102 = arith.constant 0 : index
    %155 = vector.load %arg12[%c24_101, %c0_102] : memref<64x64xf32, #tpu.memory_space<vmem>>, vector<8x64xf32>
    %cst_103 = arith.constant dense<0.000000e+00> : vector<8x64xf32>
    %156 = tpu.matmul %148, %38, %cst_103 {dimension_numbers = #tpu.dot_dimension_numbers<[1], [0], [0], [1], [0, 0, 1, 1], [], []>} : vector<8x64xbf16>, vector<64x64xbf16>, vector<8x64xf32> -> vector<8x64xf32>
    %157 = arith.addf %155, %156 : vector<8x64xf32>
    %c24_104 = arith.constant 24 : index
    %c0_105 = arith.constant 0 : index
    %158 = vector.load %arg13[%c24_104, %c0_105] : memref<64x64xf32, #tpu.memory_space<vmem>>, vector<8x64xf32>
    %cst_106 = arith.constant dense<0.000000e+00> : vector<8x64xf32>
    %159 = tpu.matmul %148, %40, %cst_106 {dimension_numbers = #tpu.dot_dimension_numbers<[1], [0], [0], [1], [0, 0, 1, 1], [], []>} : vector<8x64xbf16>, vector<64x64xbf16>, vector<8x64xf32> -> vector<8x64xf32>
    %160 = arith.addf %158, %159 : vector<8x64xf32>
    %161 = arith.negf %154 : vector<8x64xf32>
    %162 = math.exp %161 : vector<8x64xf32>
    %cst_107 = arith.constant 1.000000e+00 : f32
    %163 = vector.broadcast %cst_107 : f32 to vector<8x64xf32>
    %164 = arith.addf %163, %162 : vector<8x64xf32>
    %165 = arith.divf %163, %164 : vector<8x64xf32>
    %166 = arith.mulf %165, %139 : vector<8x64xf32>
    %167 = arith.negf %151 : vector<8x64xf32>
    %168 = math.exp %167 : vector<8x64xf32>
    %cst_108 = arith.constant 1.000000e+00 : f32
    %169 = vector.broadcast %cst_108 : f32 to vector<8x64xf32>
    %170 = arith.addf %169, %168 : vector<8x64xf32>
    %171 = arith.divf %169, %170 : vector<8x64xf32>
    %172 = math.tanh %157 : vector<8x64xf32>
    %173 = arith.mulf %171, %172 : vector<8x64xf32>
    %174 = arith.addf %166, %173 : vector<8x64xf32>
    %175 = arith.negf %160 : vector<8x64xf32>
    %176 = math.exp %175 : vector<8x64xf32>
    %cst_109 = arith.constant 1.000000e+00 : f32
    %177 = vector.broadcast %cst_109 : f32 to vector<8x64xf32>
    %178 = arith.addf %177, %176 : vector<8x64xf32>
    %179 = arith.divf %177, %178 : vector<8x64xf32>
    %180 = math.tanh %174 : vector<8x64xf32>
    %181 = arith.mulf %179, %180 : vector<8x64xf32>
    %c24_110 = arith.constant 24 : index
    %c0_111 = arith.constant 0 : index
    %182 = vector.load %arg18[%c24_110, %c0_111] : memref<64x64xf32, #tpu.memory_space<vmem>>, vector<8x64xf32>
    tpu.vector_store %arg18[%c24_110, %c0_111], %181 {strides = array<i32>} : memref<64x64xf32, #tpu.memory_space<vmem>>, vector<8x64xf32>,
    %183 = arith.truncf %181 : vector<8x64xf32> to vector<8x64xbf16>
    %c32 = arith.constant 32 : index
    %c0_112 = arith.constant 0 : index
    %184 = vector.load %arg10[%c32, %c0_112] : memref<64x64xf32, #tpu.memory_space<vmem>>, vector<8x64xf32>
    %cst_113 = arith.constant dense<0.000000e+00> : vector<8x64xf32>
    %185 = tpu.matmul %183, %34, %cst_113 {dimension_numbers = #tpu.dot_dimension_numbers<[1], [0], [0], [1], [0, 0, 1, 1], [], []>} : vector<8x64xbf16>, vector<64x64xbf16>, vector<8x64xf32> -> vector<8x64xf32>
    %186 = arith.addf %184, %185 : vector<8x64xf32>
    %c32_114 = arith.constant 32 : index
    %c0_115 = arith.constant 0 : index
    %187 = vector.load %arg11[%c32_114, %c0_115] : memref<64x64xf32, #tpu.memory_space<vmem>>, vector<8x64xf32>
    %cst_116 = arith.constant dense<0.000000e+00> : vector<8x64xf32>
    %188 = tpu.matmul %183, %36, %cst_116 {dimension_numbers = #tpu.dot_dimension_numbers<[1], [0], [0], [1], [0, 0, 1, 1], [], []>} : vector<8x64xbf16>, vector<64x64xbf16>, vector<8x64xf32> -> vector<8x64xf32>
    %189 = arith.addf %187, %188 : vector<8x64xf32>
    %c32_117 = arith.constant 32 : index
    %c0_118 = arith.constant 0 : index
    %190 = vector.load %arg12[%c32_117, %c0_118] : memref<64x64xf32, #tpu.memory_space<vmem>>, vector<8x64xf32>
    %cst_119 = arith.constant dense<0.000000e+00> : vector<8x64xf32>
    %191 = tpu.matmul %183, %38, %cst_119 {dimension_numbers = #tpu.dot_dimension_numbers<[1], [0], [0], [1], [0, 0, 1, 1], [], []>} : vector<8x64xbf16>, vector<64x64xbf16>, vector<8x64xf32> -> vector<8x64xf32>
    %192 = arith.addf %190, %191 : vector<8x64xf32>
    %c32_120 = arith.constant 32 : index
    %c0_121 = arith.constant 0 : index
    %193 = vector.load %arg13[%c32_120, %c0_121] : memref<64x64xf32, #tpu.memory_space<vmem>>, vector<8x64xf32>
    %cst_122 = arith.constant dense<0.000000e+00> : vector<8x64xf32>
    %194 = tpu.matmul %183, %40, %cst_122 {dimension_numbers = #tpu.dot_dimension_numbers<[1], [0], [0], [1], [0, 0, 1, 1], [], []>} : vector<8x64xbf16>, vector<64x64xbf16>, vector<8x64xf32> -> vector<8x64xf32>
    %195 = arith.addf %193, %194 : vector<8x64xf32>
    %196 = arith.negf %189 : vector<8x64xf32>
    %197 = math.exp %196 : vector<8x64xf32>
    %cst_123 = arith.constant 1.000000e+00 : f32
    %198 = vector.broadcast %cst_123 : f32 to vector<8x64xf32>
    %199 = arith.addf %198, %197 : vector<8x64xf32>
    %200 = arith.divf %198, %199 : vector<8x64xf32>
    %201 = arith.mulf %200, %174 : vector<8x64xf32>
    %202 = arith.negf %186 : vector<8x64xf32>
    %203 = math.exp %202 : vector<8x64xf32>
    %cst_124 = arith.constant 1.000000e+00 : f32
    %204 = vector.broadcast %cst_124 : f32 to vector<8x64xf32>
    %205 = arith.addf %204, %203 : vector<8x64xf32>
    %206 = arith.divf %204, %205 : vector<8x64xf32>
    %207 = math.tanh %192 : vector<8x64xf32>
    %208 = arith.mulf %206, %207 : vector<8x64xf32>
    %209 = arith.addf %201, %208 : vector<8x64xf32>
    %210 = arith.negf %195 : vector<8x64xf32>
    %211 = math.exp %210 : vector<8x64xf32>
    %cst_125 = arith.constant 1.000000e+00 : f32
    %212 = vector.broadcast %cst_125 : f32 to vector<8x64xf32>
    %213 = arith.addf %212, %211 : vector<8x64xf32>
    %214 = arith.divf %212, %213 : vector<8x64xf32>
    %215 = math.tanh %209 : vector<8x64xf32>
    %216 = arith.mulf %214, %215 : vector<8x64xf32>
    %c32_126 = arith.constant 32 : index
    %c0_127 = arith.constant 0 : index
    %217 = vector.load %arg18[%c32_126, %c0_127] : memref<64x64xf32, #tpu.memory_space<vmem>>, vector<8x64xf32>
    tpu.vector_store %arg18[%c32_126, %c0_127], %216 {strides = array<i32>} : memref<64x64xf32, #tpu.memory_space<vmem>>, vector<8x64xf32>,
    %218 = arith.truncf %216 : vector<8x64xf32> to vector<8x64xbf16>
    %c40 = arith.constant 40 : index
    %c0_128 = arith.constant 0 : index
    %219 = vector.load %arg10[%c40, %c0_128] : memref<64x64xf32, #tpu.memory_space<vmem>>, vector<8x64xf32>
    %cst_129 = arith.constant dense<0.000000e+00> : vector<8x64xf32>
    %220 = tpu.matmul %218, %34, %cst_129 {dimension_numbers = #tpu.dot_dimension_numbers<[1], [0], [0], [1], [0, 0, 1, 1], [], []>} : vector<8x64xbf16>, vector<64x64xbf16>, vector<8x64xf32> -> vector<8x64xf32>
    %221 = arith.addf %219, %220 : vector<8x64xf32>
    %c40_130 = arith.constant 40 : index
    %c0_131 = arith.constant 0 : index
    %222 = vector.load %arg11[%c40_130, %c0_131] : memref<64x64xf32, #tpu.memory_space<vmem>>, vector<8x64xf32>
    %cst_132 = arith.constant dense<0.000000e+00> : vector<8x64xf32>
    %223 = tpu.matmul %218, %36, %cst_132 {dimension_numbers = #tpu.dot_dimension_numbers<[1], [0], [0], [1], [0, 0, 1, 1], [], []>} : vector<8x64xbf16>, vector<64x64xbf16>, vector<8x64xf32> -> vector<8x64xf32>
    %224 = arith.addf %222, %223 : vector<8x64xf32>
    %c40_133 = arith.constant 40 : index
    %c0_134 = arith.constant 0 : index
    %225 = vector.load %arg12[%c40_133, %c0_134] : memref<64x64xf32, #tpu.memory_space<vmem>>, vector<8x64xf32>
    %cst_135 = arith.constant dense<0.000000e+00> : vector<8x64xf32>
    %226 = tpu.matmul %218, %38, %cst_135 {dimension_numbers = #tpu.dot_dimension_numbers<[1], [0], [0], [1], [0, 0, 1, 1], [], []>} : vector<8x64xbf16>, vector<64x64xbf16>, vector<8x64xf32> -> vector<8x64xf32>
    %227 = arith.addf %225, %226 : vector<8x64xf32>
    %c40_136 = arith.constant 40 : index
    %c0_137 = arith.constant 0 : index
    %228 = vector.load %arg13[%c40_136, %c0_137] : memref<64x64xf32, #tpu.memory_space<vmem>>, vector<8x64xf32>
    %cst_138 = arith.constant dense<0.000000e+00> : vector<8x64xf32>
    %229 = tpu.matmul %218, %40, %cst_138 {dimension_numbers = #tpu.dot_dimension_numbers<[1], [0], [0], [1], [0, 0, 1, 1], [], []>} : vector<8x64xbf16>, vector<64x64xbf16>, vector<8x64xf32> -> vector<8x64xf32>
    %230 = arith.addf %228, %229 : vector<8x64xf32>
    %231 = arith.negf %224 : vector<8x64xf32>
    %232 = math.exp %231 : vector<8x64xf32>
    %cst_139 = arith.constant 1.000000e+00 : f32
    %233 = vector.broadcast %cst_139 : f32 to vector<8x64xf32>
    %234 = arith.addf %233, %232 : vector<8x64xf32>
    %235 = arith.divf %233, %234 : vector<8x64xf32>
    %236 = arith.mulf %235, %209 : vector<8x64xf32>
    %237 = arith.negf %221 : vector<8x64xf32>
    %238 = math.exp %237 : vector<8x64xf32>
    %cst_140 = arith.constant 1.000000e+00 : f32
    %239 = vector.broadcast %cst_140 : f32 to vector<8x64xf32>
    %240 = arith.addf %239, %238 : vector<8x64xf32>
    %241 = arith.divf %239, %240 : vector<8x64xf32>
    %242 = math.tanh %227 : vector<8x64xf32>
    %243 = arith.mulf %241, %242 : vector<8x64xf32>
    %244 = arith.addf %236, %243 : vector<8x64xf32>
    %245 = arith.negf %230 : vector<8x64xf32>
    %246 = math.exp %245 : vector<8x64xf32>
    %cst_141 = arith.constant 1.000000e+00 : f32
    %247 = vector.broadcast %cst_141 : f32 to vector<8x64xf32>
    %248 = arith.addf %247, %246 : vector<8x64xf32>
    %249 = arith.divf %247, %248 : vector<8x64xf32>
    %250 = math.tanh %244 : vector<8x64xf32>
    %251 = arith.mulf %249, %250 : vector<8x64xf32>
    %c40_142 = arith.constant 40 : index
    %c0_143 = arith.constant 0 : index
    %252 = vector.load %arg18[%c40_142, %c0_143] : memref<64x64xf32, #tpu.memory_space<vmem>>, vector<8x64xf32>
    tpu.vector_store %arg18[%c40_142, %c0_143], %251 {strides = array<i32>} : memref<64x64xf32, #tpu.memory_space<vmem>>, vector<8x64xf32>,
    %253 = arith.truncf %251 : vector<8x64xf32> to vector<8x64xbf16>
    %c48 = arith.constant 48 : index
    %c0_144 = arith.constant 0 : index
    %254 = vector.load %arg10[%c48, %c0_144] : memref<64x64xf32, #tpu.memory_space<vmem>>, vector<8x64xf32>
    %cst_145 = arith.constant dense<0.000000e+00> : vector<8x64xf32>
    %255 = tpu.matmul %253, %34, %cst_145 {dimension_numbers = #tpu.dot_dimension_numbers<[1], [0], [0], [1], [0, 0, 1, 1], [], []>} : vector<8x64xbf16>, vector<64x64xbf16>, vector<8x64xf32> -> vector<8x64xf32>
    %256 = arith.addf %254, %255 : vector<8x64xf32>
    %c48_146 = arith.constant 48 : index
    %c0_147 = arith.constant 0 : index
    %257 = vector.load %arg11[%c48_146, %c0_147] : memref<64x64xf32, #tpu.memory_space<vmem>>, vector<8x64xf32>
    %cst_148 = arith.constant dense<0.000000e+00> : vector<8x64xf32>
    %258 = tpu.matmul %253, %36, %cst_148 {dimension_numbers = #tpu.dot_dimension_numbers<[1], [0], [0], [1], [0, 0, 1, 1], [], []>} : vector<8x64xbf16>, vector<64x64xbf16>, vector<8x64xf32> -> vector<8x64xf32>
    %259 = arith.addf %257, %258 : vector<8x64xf32>
    %c48_149 = arith.constant 48 : index
    %c0_150 = arith.constant 0 : index
    %260 = vector.load %arg12[%c48_149, %c0_150] : memref<64x64xf32, #tpu.memory_space<vmem>>, vector<8x64xf32>
    %cst_151 = arith.constant dense<0.000000e+00> : vector<8x64xf32>
    %261 = tpu.matmul %253, %38, %cst_151 {dimension_numbers = #tpu.dot_dimension_numbers<[1], [0], [0], [1], [0, 0, 1, 1], [], []>} : vector<8x64xbf16>, vector<64x64xbf16>, vector<8x64xf32> -> vector<8x64xf32>
    %262 = arith.addf %260, %261 : vector<8x64xf32>
    %c48_152 = arith.constant 48 : index
    %c0_153 = arith.constant 0 : index
    %263 = vector.load %arg13[%c48_152, %c0_153] : memref<64x64xf32, #tpu.memory_space<vmem>>, vector<8x64xf32>
    %cst_154 = arith.constant dense<0.000000e+00> : vector<8x64xf32>
    %264 = tpu.matmul %253, %40, %cst_154 {dimension_numbers = #tpu.dot_dimension_numbers<[1], [0], [0], [1], [0, 0, 1, 1], [], []>} : vector<8x64xbf16>, vector<64x64xbf16>, vector<8x64xf32> -> vector<8x64xf32>
    %265 = arith.addf %263, %264 : vector<8x64xf32>
    %266 = arith.negf %259 : vector<8x64xf32>
    %267 = math.exp %266 : vector<8x64xf32>
    %cst_155 = arith.constant 1.000000e+00 : f32
    %268 = vector.broadcast %cst_155 : f32 to vector<8x64xf32>
    %269 = arith.addf %268, %267 : vector<8x64xf32>
    %270 = arith.divf %268, %269 : vector<8x64xf32>
    %271 = arith.mulf %270, %244 : vector<8x64xf32>
    %272 = arith.negf %256 : vector<8x64xf32>
    %273 = math.exp %272 : vector<8x64xf32>
    %cst_156 = arith.constant 1.000000e+00 : f32
    %274 = vector.broadcast %cst_156 : f32 to vector<8x64xf32>
    %275 = arith.addf %274, %273 : vector<8x64xf32>
    %276 = arith.divf %274, %275 : vector<8x64xf32>
    %277 = math.tanh %262 : vector<8x64xf32>
    %278 = arith.mulf %276, %277 : vector<8x64xf32>
    %279 = arith.addf %271, %278 : vector<8x64xf32>
    %280 = arith.negf %265 : vector<8x64xf32>
    %281 = math.exp %280 : vector<8x64xf32>
    %cst_157 = arith.constant 1.000000e+00 : f32
    %282 = vector.broadcast %cst_157 : f32 to vector<8x64xf32>
    %283 = arith.addf %282, %281 : vector<8x64xf32>
    %284 = arith.divf %282, %283 : vector<8x64xf32>
    %285 = math.tanh %279 : vector<8x64xf32>
    %286 = arith.mulf %284, %285 : vector<8x64xf32>
    %c48_158 = arith.constant 48 : index
    %c0_159 = arith.constant 0 : index
    %287 = vector.load %arg18[%c48_158, %c0_159] : memref<64x64xf32, #tpu.memory_space<vmem>>, vector<8x64xf32>
    tpu.vector_store %arg18[%c48_158, %c0_159], %286 {strides = array<i32>} : memref<64x64xf32, #tpu.memory_space<vmem>>, vector<8x64xf32>,
    %288 = arith.truncf %286 : vector<8x64xf32> to vector<8x64xbf16>
    %c56 = arith.constant 56 : index
    %c0_160 = arith.constant 0 : index
    %289 = vector.load %arg10[%c56, %c0_160] : memref<64x64xf32, #tpu.memory_space<vmem>>, vector<8x64xf32>
    %cst_161 = arith.constant dense<0.000000e+00> : vector<8x64xf32>
    %290 = tpu.matmul %288, %34, %cst_161 {dimension_numbers = #tpu.dot_dimension_numbers<[1], [0], [0], [1], [0, 0, 1, 1], [], []>} : vector<8x64xbf16>, vector<64x64xbf16>, vector<8x64xf32> -> vector<8x64xf32>
    %291 = arith.addf %289, %290 : vector<8x64xf32>
    %c56_162 = arith.constant 56 : index
    %c0_163 = arith.constant 0 : index
    %292 = vector.load %arg11[%c56_162, %c0_163] : memref<64x64xf32, #tpu.memory_space<vmem>>, vector<8x64xf32>
    %cst_164 = arith.constant dense<0.000000e+00> : vector<8x64xf32>
    %293 = tpu.matmul %288, %36, %cst_164 {dimension_numbers = #tpu.dot_dimension_numbers<[1], [0], [0], [1], [0, 0, 1, 1], [], []>} : vector<8x64xbf16>, vector<64x64xbf16>, vector<8x64xf32> -> vector<8x64xf32>
    %294 = arith.addf %292, %293 : vector<8x64xf32>
    %c56_165 = arith.constant 56 : index
    %c0_166 = arith.constant 0 : index
    %295 = vector.load %arg12[%c56_165, %c0_166] : memref<64x64xf32, #tpu.memory_space<vmem>>, vector<8x64xf32>
    %cst_167 = arith.constant dense<0.000000e+00> : vector<8x64xf32>
    %296 = tpu.matmul %288, %38, %cst_167 {dimension_numbers = #tpu.dot_dimension_numbers<[1], [0], [0], [1], [0, 0, 1, 1], [], []>} : vector<8x64xbf16>, vector<64x64xbf16>, vector<8x64xf32> -> vector<8x64xf32>
    %297 = arith.addf %295, %296 : vector<8x64xf32>
    %c56_168 = arith.constant 56 : index
    %c0_169 = arith.constant 0 : index
    %298 = vector.load %arg13[%c56_168, %c0_169] : memref<64x64xf32, #tpu.memory_space<vmem>>, vector<8x64xf32>
    %cst_170 = arith.constant dense<0.000000e+00> : vector<8x64xf32>
    %299 = tpu.matmul %288, %40, %cst_170 {dimension_numbers = #tpu.dot_dimension_numbers<[1], [0], [0], [1], [0, 0, 1, 1], [], []>} : vector<8x64xbf16>, vector<64x64xbf16>, vector<8x64xf32> -> vector<8x64xf32>
    %300 = arith.addf %298, %299 : vector<8x64xf32>
    %301 = arith.negf %294 : vector<8x64xf32>
    %302 = math.exp %301 : vector<8x64xf32>
    %cst_171 = arith.constant 1.000000e+00 : f32
    %303 = vector.broadcast %cst_171 : f32 to vector<8x64xf32>
    %304 = arith.addf %303, %302 : vector<8x64xf32>
    %305 = arith.divf %303, %304 : vector<8x64xf32>
    %306 = arith.mulf %305, %279 : vector<8x64xf32>
    %307 = arith.negf %291 : vector<8x64xf32>
    %308 = math.exp %307 : vector<8x64xf32>
    %cst_172 = arith.constant 1.000000e+00 : f32
    %309 = vector.broadcast %cst_172 : f32 to vector<8x64xf32>
    %310 = arith.addf %309, %308 : vector<8x64xf32>
    %311 = arith.divf %309, %310 : vector<8x64xf32>
    %312 = math.tanh %297 : vector<8x64xf32>
    %313 = arith.mulf %311, %312 : vector<8x64xf32>
    %314 = arith.addf %306, %313 : vector<8x64xf32>
    %315 = arith.negf %300 : vector<8x64xf32>
    %316 = math.exp %315 : vector<8x64xf32>
    %cst_173 = arith.constant 1.000000e+00 : f32
    %317 = vector.broadcast %cst_173 : f32 to vector<8x64xf32>
    %318 = arith.addf %317, %316 : vector<8x64xf32>
    %319 = arith.divf %317, %318 : vector<8x64xf32>
    %320 = math.tanh %314 : vector<8x64xf32>
    %321 = arith.mulf %319, %320 : vector<8x64xf32>
    %c56_174 = arith.constant 56 : index
    %c0_175 = arith.constant 0 : index
    %322 = vector.load %arg18[%c56_174, %c0_175] : memref<64x64xf32, #tpu.memory_space<vmem>>, vector<8x64xf32>
    tpu.vector_store %arg18[%c56_174, %c0_175], %321 {strides = array<i32>} : memref<64x64xf32, #tpu.memory_space<vmem>>, vector<8x64xf32>,
    %c0_176 = arith.constant 0 : index
    %c0_177 = arith.constant 0 : index
    %323 = vector.load %arg18[%c0_176, %c0_177] : memref<64x64xf32, #tpu.memory_space<vmem>>, vector<64x64xf32>
    %c0_178 = arith.constant 0 : index
    %c0_179 = arith.constant 0 : index
    %c0_180 = arith.constant 0 : index
    %324 = vector.load %arg4[%c0_178, %c0_179, %c0_180] : memref<4x64x64xf32, #tpu.memory_space<vmem>>, vector<1x64x64xf32>
    %325 = vector.shape_cast %324 : vector<1x64x64xf32> to vector<64x64xf32>
    %cst_181 = arith.constant dense<0.000000e+00> : vector<64x64xf32>
    %326 = tpu.matmul %323, %325, %cst_181 {dimension_numbers = #tpu.dot_dimension_numbers<[1], [0], [0], [1], [0, 0, 1, 1], [], []>} : vector<64x64xf32>, vector<64x64xf32>, vector<64x64xf32> -> vector<64x64xf32>
    %c0_182 = arith.constant 0 : index
    %c0_183 = arith.constant 0 : index
    %c0_184 = arith.constant 0 : index
    %327 = vector.load %arg6[%c0_182, %c0_183, %c0_184] : memref<4x1x64xf32, #tpu.memory_space<vmem>>, vector<1x1x64xf32>
    %328 = vector.shape_cast %327 : vector<1x1x64xf32> to vector<1x64xf32>
    %329 = vector.broadcast %328 : vector<1x64xf32> to vector<64x64xf32>
    %330 = arith.addf %326, %329 : vector<64x64xf32>
    %c0_185 = arith.constant 0 : index
    %c0_186 = arith.constant 0 : index
    %331 = vector.load %arg14[%c0_185, %c0_186] : memref<64x64xf32, #tpu.memory_space<vmem>>, vector<64x64xf32>
    tpu.vector_store %arg14[%c0_185, %c0_186], %330 {strides = array<i32>} : memref<64x64xf32, #tpu.memory_space<vmem>>, vector<64x64xf32>,
    %c1_187 = arith.constant 1 : index
    %c0_188 = arith.constant 0 : index
    %c0_189 = arith.constant 0 : index
    %332 = vector.load %arg4[%c1_187, %c0_188, %c0_189] : memref<4x64x64xf32, #tpu.memory_space<vmem>>, vector<1x64x64xf32>
    %333 = vector.shape_cast %332 : vector<1x64x64xf32> to vector<64x64xf32>
    %cst_190 = arith.constant dense<0.000000e+00> : vector<64x64xf32>
    %334 = tpu.matmul %323, %333, %cst_190 {dimension_numbers = #tpu.dot_dimension_numbers<[1], [0], [0], [1], [0, 0, 1, 1], [], []>} : vector<64x64xf32>, vector<64x64xf32>, vector<64x64xf32> -> vector<64x64xf32>
    %c1_191 = arith.constant 1 : index
    %c0_192 = arith.constant 0 : index
    %c0_193 = arith.constant 0 : index
    %335 = vector.load %arg6[%c1_191, %c0_192, %c0_193] : memref<4x1x64xf32, #tpu.memory_space<vmem>>, vector<1x1x64xf32>
    %336 = vector.shape_cast %335 : vector<1x1x64xf32> to vector<1x64xf32>
    %337 = vector.broadcast %336 : vector<1x64xf32> to vector<64x64xf32>
    %338 = arith.addf %334, %337 : vector<64x64xf32>
    %c0_194 = arith.constant 0 : index
    %c0_195 = arith.constant 0 : index
    %339 = vector.load %arg15[%c0_194, %c0_195] : memref<64x64xf32, #tpu.memory_space<vmem>>, vector<64x64xf32>
    tpu.vector_store %arg15[%c0_194, %c0_195], %338 {strides = array<i32>} : memref<64x64xf32, #tpu.memory_space<vmem>>, vector<64x64xf32>,
    %c2_196 = arith.constant 2 : index
    %c0_197 = arith.constant 0 : index
    %c0_198 = arith.constant 0 : index
    %340 = vector.load %arg4[%c2_196, %c0_197, %c0_198] : memref<4x64x64xf32, #tpu.memory_space<vmem>>, vector<1x64x64xf32>
    %341 = vector.shape_cast %340 : vector<1x64x64xf32> to vector<64x64xf32>
    %cst_199 = arith.constant dense<0.000000e+00> : vector<64x64xf32>
    %342 = tpu.matmul %323, %341, %cst_199 {dimension_numbers = #tpu.dot_dimension_numbers<[1], [0], [0], [1], [0, 0, 1, 1], [], []>} : vector<64x64xf32>, vector<64x64xf32>, vector<64x64xf32> -> vector<64x64xf32>
    %c2_200 = arith.constant 2 : index
    %c0_201 = arith.constant 0 : index
    %c0_202 = arith.constant 0 : index
    %343 = vector.load %arg6[%c2_200, %c0_201, %c0_202] : memref<4x1x64xf32, #tpu.memory_space<vmem>>, vector<1x1x64xf32>
    %344 = vector.shape_cast %343 : vector<1x1x64xf32> to vector<1x64xf32>
    %345 = vector.broadcast %344 : vector<1x64xf32> to vector<64x64xf32>
    %346 = arith.addf %342, %345 : vector<64x64xf32>
    %c0_203 = arith.constant 0 : index
    %c0_204 = arith.constant 0 : index
    %347 = vector.load %arg16[%c0_203, %c0_204] : memref<64x64xf32, #tpu.memory_space<vmem>>, vector<64x64xf32>
    tpu.vector_store %arg16[%c0_203, %c0_204], %346 {strides = array<i32>} : memref<64x64xf32, #tpu.memory_space<vmem>>, vector<64x64xf32>,
    %c3_205 = arith.constant 3 : index
    %c0_206 = arith.constant 0 : index
    %c0_207 = arith.constant 0 : index
    %348 = vector.load %arg4[%c3_205, %c0_206, %c0_207] : memref<4x64x64xf32, #tpu.memory_space<vmem>>, vector<1x64x64xf32>
    %349 = vector.shape_cast %348 : vector<1x64x64xf32> to vector<64x64xf32>
    %cst_208 = arith.constant dense<0.000000e+00> : vector<64x64xf32>
    %350 = tpu.matmul %323, %349, %cst_208 {dimension_numbers = #tpu.dot_dimension_numbers<[1], [0], [0], [1], [0, 0, 1, 1], [], []>} : vector<64x64xf32>, vector<64x64xf32>, vector<64x64xf32> -> vector<64x64xf32>
    %c3_209 = arith.constant 3 : index
    %c0_210 = arith.constant 0 : index
    %c0_211 = arith.constant 0 : index
    %351 = vector.load %arg6[%c3_209, %c0_210, %c0_211] : memref<4x1x64xf32, #tpu.memory_space<vmem>>, vector<1x1x64xf32>
    %352 = vector.shape_cast %351 : vector<1x1x64xf32> to vector<1x64xf32>
    %353 = vector.broadcast %352 : vector<1x64xf32> to vector<64x64xf32>
    %354 = arith.addf %350, %353 : vector<64x64xf32>
    %c0_212 = arith.constant 0 : index
    %c0_213 = arith.constant 0 : index
    %355 = vector.load %arg17[%c0_212, %c0_213] : memref<64x64xf32, #tpu.memory_space<vmem>>, vector<64x64xf32>
    tpu.vector_store %arg17[%c0_212, %c0_213], %354 {strides = array<i32>} : memref<64x64xf32, #tpu.memory_space<vmem>>, vector<64x64xf32>,
    %c0_214 = arith.constant 0 : index
    %c0_215 = arith.constant 0 : index
    %c0_216 = arith.constant 0 : index
    %356 = vector.load %arg5[%c0_214, %c0_215, %c0_216] : memref<4x64x64xbf16, #tpu.memory_space<vmem>>, vector<1x64x64xbf16>
    %357 = vector.shape_cast %356 : vector<1x64x64xbf16> to vector<64x64xbf16>
    %c1_217 = arith.constant 1 : index
    %c0_218 = arith.constant 0 : index
    %c0_219 = arith.constant 0 : index
    %358 = vector.load %arg5[%c1_217, %c0_218, %c0_219] : memref<4x64x64xbf16, #tpu.memory_space<vmem>>, vector<1x64x64xbf16>
    %359 = vector.shape_cast %358 : vector<1x64x64xbf16> to vector<64x64xbf16>
    %c2_220 = arith.constant 2 : index
    %c0_221 = arith.constant 0 : index
    %c0_222 = arith.constant 0 : index
    %360 = vector.load %arg5[%c2_220, %c0_221, %c0_222] : memref<4x64x64xbf16, #tpu.memory_space<vmem>>, vector<1x64x64xbf16>
    %361 = vector.shape_cast %360 : vector<1x64x64xbf16> to vector<64x64xbf16>
    %c3_223 = arith.constant 3 : index
    %c0_224 = arith.constant 0 : index
    %c0_225 = arith.constant 0 : index
    %362 = vector.load %arg5[%c3_223, %c0_224, %c0_225] : memref<4x64x64xbf16, #tpu.memory_space<vmem>>, vector<1x64x64xbf16>
    %363 = vector.shape_cast %362 : vector<1x64x64xbf16> to vector<64x64xbf16>
    %cst_226 = arith.constant 0.000000e+00 : f32
    %364 = vector.broadcast %cst_226 : f32 to vector<8x64xf32>
    %cst_227 = arith.constant 0.000000e+00 : f32
    %365 = vector.broadcast %cst_227 : f32 to vector<8x64xf32>
    %366 = arith.truncf %364 : vector<8x64xf32> to vector<8x64xbf16>
    %c0_228 = arith.constant 0 : index
    %c0_229 = arith.constant 0 : index
    %367 = vector.load %arg14[%c0_228, %c0_229] : memref<64x64xf32, #tpu.memory_space<vmem>>, vector<8x64xf32>
    %cst_230 = arith.constant dense<0.000000e+00> : vector<8x64xf32>
    %368 = tpu.matmul %366, %357, %cst_230 {dimension_numbers = #tpu.dot_dimension_numbers<[1], [0], [0], [1], [0, 0, 1, 1], [], []>} : vector<8x64xbf16>, vector<64x64xbf16>, vector<8x64xf32> -> vector<8x64xf32>
    %369 = arith.addf %367, %368 : vector<8x64xf32>
    %c0_231 = arith.constant 0 : index
    %c0_232 = arith.constant 0 : index
    %370 = vector.load %arg15[%c0_231, %c0_232] : memref<64x64xf32, #tpu.memory_space<vmem>>, vector<8x64xf32>
    %cst_233 = arith.constant dense<0.000000e+00> : vector<8x64xf32>
    %371 = tpu.matmul %366, %359, %cst_233 {dimension_numbers = #tpu.dot_dimension_numbers<[1], [0], [0], [1], [0, 0, 1, 1], [], []>} : vector<8x64xbf16>, vector<64x64xbf16>, vector<8x64xf32> -> vector<8x64xf32>
    %372 = arith.addf %370, %371 : vector<8x64xf32>
    %c0_234 = arith.constant 0 : index
    %c0_235 = arith.constant 0 : index
    %373 = vector.load %arg16[%c0_234, %c0_235] : memref<64x64xf32, #tpu.memory_space<vmem>>, vector<8x64xf32>
    %cst_236 = arith.constant dense<0.000000e+00> : vector<8x64xf32>
    %374 = tpu.matmul %366, %361, %cst_236 {dimension_numbers = #tpu.dot_dimension_numbers<[1], [0], [0], [1], [0, 0, 1, 1], [], []>} : vector<8x64xbf16>, vector<64x64xbf16>, vector<8x64xf32> -> vector<8x64xf32>
    %375 = arith.addf %373, %374 : vector<8x64xf32>
    %c0_237 = arith.constant 0 : index
    %c0_238 = arith.constant 0 : index
    %376 = vector.load %arg17[%c0_237, %c0_238] : memref<64x64xf32, #tpu.memory_space<vmem>>, vector<8x64xf32>
    %cst_239 = arith.constant dense<0.000000e+00> : vector<8x64xf32>
    %377 = tpu.matmul %366, %363, %cst_239 {dimension_numbers = #tpu.dot_dimension_numbers<[1], [0], [0], [1], [0, 0, 1, 1], [], []>} : vector<8x64xbf16>, vector<64x64xbf16>, vector<8x64xf32> -> vector<8x64xf32>
    %378 = arith.addf %376, %377 : vector<8x64xf32>
    %379 = arith.negf %372 : vector<8x64xf32>
    %380 = math.exp %379 : vector<8x64xf32>
    %cst_240 = arith.constant 1.000000e+00 : f32
    %381 = vector.broadcast %cst_240 : f32 to vector<8x64xf32>
    %382 = arith.addf %381, %380 : vector<8x64xf32>
    %383 = arith.divf %381, %382 : vector<8x64xf32>
    %384 = arith.mulf %383, %365 : vector<8x64xf32>
    %385 = arith.negf %369 : vector<8x64xf32>
    %386 = math.exp %385 : vector<8x64xf32>
    %cst_241 = arith.constant 1.000000e+00 : f32
    %387 = vector.broadcast %cst_241 : f32 to vector<8x64xf32>
    %388 = arith.addf %387, %386 : vector<8x64xf32>
    %389 = arith.divf %387, %388 : vector<8x64xf32>
    %390 = math.tanh %375 : vector<8x64xf32>
    %391 = arith.mulf %389, %390 : vector<8x64xf32>
    %392 = arith.addf %384, %391 : vector<8x64xf32>
    %393 = arith.negf %378 : vector<8x64xf32>
    %394 = math.exp %393 : vector<8x64xf32>
    %cst_242 = arith.constant 1.000000e+00 : f32
    %395 = vector.broadcast %cst_242 : f32 to vector<8x64xf32>
    %396 = arith.addf %395, %394 : vector<8x64xf32>
    %397 = arith.divf %395, %396 : vector<8x64xf32>
    %398 = math.tanh %392 : vector<8x64xf32>
    %399 = arith.mulf %397, %398 : vector<8x64xf32>
    %400 = arith.truncf %399 : vector<8x64xf32> to vector<8x64xbf16>
    %c8_243 = arith.constant 8 : index
    %c0_244 = arith.constant 0 : index
    %401 = vector.load %arg14[%c8_243, %c0_244] : memref<64x64xf32, #tpu.memory_space<vmem>>, vector<8x64xf32>
    %cst_245 = arith.constant dense<0.000000e+00> : vector<8x64xf32>
    %402 = tpu.matmul %400, %357, %cst_245 {dimension_numbers = #tpu.dot_dimension_numbers<[1], [0], [0], [1], [0, 0, 1, 1], [], []>} : vector<8x64xbf16>, vector<64x64xbf16>, vector<8x64xf32> -> vector<8x64xf32>
    %403 = arith.addf %401, %402 : vector<8x64xf32>
    %c8_246 = arith.constant 8 : index
    %c0_247 = arith.constant 0 : index
    %404 = vector.load %arg15[%c8_246, %c0_247] : memref<64x64xf32, #tpu.memory_space<vmem>>, vector<8x64xf32>
    %cst_248 = arith.constant dense<0.000000e+00> : vector<8x64xf32>
    %405 = tpu.matmul %400, %359, %cst_248 {dimension_numbers = #tpu.dot_dimension_numbers<[1], [0], [0], [1], [0, 0, 1, 1], [], []>} : vector<8x64xbf16>, vector<64x64xbf16>, vector<8x64xf32> -> vector<8x64xf32>
    %406 = arith.addf %404, %405 : vector<8x64xf32>
    %c8_249 = arith.constant 8 : index
    %c0_250 = arith.constant 0 : index
    %407 = vector.load %arg16[%c8_249, %c0_250] : memref<64x64xf32, #tpu.memory_space<vmem>>, vector<8x64xf32>
    %cst_251 = arith.constant dense<0.000000e+00> : vector<8x64xf32>
    %408 = tpu.matmul %400, %361, %cst_251 {dimension_numbers = #tpu.dot_dimension_numbers<[1], [0], [0], [1], [0, 0, 1, 1], [], []>} : vector<8x64xbf16>, vector<64x64xbf16>, vector<8x64xf32> -> vector<8x64xf32>
    %409 = arith.addf %407, %408 : vector<8x64xf32>
    %c8_252 = arith.constant 8 : index
    %c0_253 = arith.constant 0 : index
    %410 = vector.load %arg17[%c8_252, %c0_253] : memref<64x64xf32, #tpu.memory_space<vmem>>, vector<8x64xf32>
    %cst_254 = arith.constant dense<0.000000e+00> : vector<8x64xf32>
    %411 = tpu.matmul %400, %363, %cst_254 {dimension_numbers = #tpu.dot_dimension_numbers<[1], [0], [0], [1], [0, 0, 1, 1], [], []>} : vector<8x64xbf16>, vector<64x64xbf16>, vector<8x64xf32> -> vector<8x64xf32>
    %412 = arith.addf %410, %411 : vector<8x64xf32>
    %413 = arith.negf %406 : vector<8x64xf32>
    %414 = math.exp %413 : vector<8x64xf32>
    %cst_255 = arith.constant 1.000000e+00 : f32
    %415 = vector.broadcast %cst_255 : f32 to vector<8x64xf32>
    %416 = arith.addf %415, %414 : vector<8x64xf32>
    %417 = arith.divf %415, %416 : vector<8x64xf32>
    %418 = arith.mulf %417, %392 : vector<8x64xf32>
    %419 = arith.negf %403 : vector<8x64xf32>
    %420 = math.exp %419 : vector<8x64xf32>
    %cst_256 = arith.constant 1.000000e+00 : f32
    %421 = vector.broadcast %cst_256 : f32 to vector<8x64xf32>
    %422 = arith.addf %421, %420 : vector<8x64xf32>
    %423 = arith.divf %421, %422 : vector<8x64xf32>
    %424 = math.tanh %409 : vector<8x64xf32>
    %425 = arith.mulf %423, %424 : vector<8x64xf32>
    %426 = arith.addf %418, %425 : vector<8x64xf32>
    %427 = arith.negf %412 : vector<8x64xf32>
    %428 = math.exp %427 : vector<8x64xf32>
    %cst_257 = arith.constant 1.000000e+00 : f32
    %429 = vector.broadcast %cst_257 : f32 to vector<8x64xf32>
    %430 = arith.addf %429, %428 : vector<8x64xf32>
    %431 = arith.divf %429, %430 : vector<8x64xf32>
    %432 = math.tanh %426 : vector<8x64xf32>
    %433 = arith.mulf %431, %432 : vector<8x64xf32>
    %434 = arith.truncf %433 : vector<8x64xf32> to vector<8x64xbf16>
    %c16_258 = arith.constant 16 : index
    %c0_259 = arith.constant 0 : index
    %435 = vector.load %arg14[%c16_258, %c0_259] : memref<64x64xf32, #tpu.memory_space<vmem>>, vector<8x64xf32>
    %cst_260 = arith.constant dense<0.000000e+00> : vector<8x64xf32>
    %436 = tpu.matmul %434, %357, %cst_260 {dimension_numbers = #tpu.dot_dimension_numbers<[1], [0], [0], [1], [0, 0, 1, 1], [], []>} : vector<8x64xbf16>, vector<64x64xbf16>, vector<8x64xf32> -> vector<8x64xf32>
    %437 = arith.addf %435, %436 : vector<8x64xf32>
    %c16_261 = arith.constant 16 : index
    %c0_262 = arith.constant 0 : index
    %438 = vector.load %arg15[%c16_261, %c0_262] : memref<64x64xf32, #tpu.memory_space<vmem>>, vector<8x64xf32>
    %cst_263 = arith.constant dense<0.000000e+00> : vector<8x64xf32>
    %439 = tpu.matmul %434, %359, %cst_263 {dimension_numbers = #tpu.dot_dimension_numbers<[1], [0], [0], [1], [0, 0, 1, 1], [], []>} : vector<8x64xbf16>, vector<64x64xbf16>, vector<8x64xf32> -> vector<8x64xf32>
    %440 = arith.addf %438, %439 : vector<8x64xf32>
    %c16_264 = arith.constant 16 : index
    %c0_265 = arith.constant 0 : index
    %441 = vector.load %arg16[%c16_264, %c0_265] : memref<64x64xf32, #tpu.memory_space<vmem>>, vector<8x64xf32>
    %cst_266 = arith.constant dense<0.000000e+00> : vector<8x64xf32>
    %442 = tpu.matmul %434, %361, %cst_266 {dimension_numbers = #tpu.dot_dimension_numbers<[1], [0], [0], [1], [0, 0, 1, 1], [], []>} : vector<8x64xbf16>, vector<64x64xbf16>, vector<8x64xf32> -> vector<8x64xf32>
    %443 = arith.addf %441, %442 : vector<8x64xf32>
    %c16_267 = arith.constant 16 : index
    %c0_268 = arith.constant 0 : index
    %444 = vector.load %arg17[%c16_267, %c0_268] : memref<64x64xf32, #tpu.memory_space<vmem>>, vector<8x64xf32>
    %cst_269 = arith.constant dense<0.000000e+00> : vector<8x64xf32>
    %445 = tpu.matmul %434, %363, %cst_269 {dimension_numbers = #tpu.dot_dimension_numbers<[1], [0], [0], [1], [0, 0, 1, 1], [], []>} : vector<8x64xbf16>, vector<64x64xbf16>, vector<8x64xf32> -> vector<8x64xf32>
    %446 = arith.addf %444, %445 : vector<8x64xf32>
    %447 = arith.negf %440 : vector<8x64xf32>
    %448 = math.exp %447 : vector<8x64xf32>
    %cst_270 = arith.constant 1.000000e+00 : f32
    %449 = vector.broadcast %cst_270 : f32 to vector<8x64xf32>
    %450 = arith.addf %449, %448 : vector<8x64xf32>
    %451 = arith.divf %449, %450 : vector<8x64xf32>
    %452 = arith.mulf %451, %426 : vector<8x64xf32>
    %453 = arith.negf %437 : vector<8x64xf32>
    %454 = math.exp %453 : vector<8x64xf32>
    %cst_271 = arith.constant 1.000000e+00 : f32
    %455 = vector.broadcast %cst_271 : f32 to vector<8x64xf32>
    %456 = arith.addf %455, %454 : vector<8x64xf32>
    %457 = arith.divf %455, %456 : vector<8x64xf32>
    %458 = math.tanh %443 : vector<8x64xf32>
    %459 = arith.mulf %457, %458 : vector<8x64xf32>
    %460 = arith.addf %452, %459 : vector<8x64xf32>
    %461 = arith.negf %446 : vector<8x64xf32>
    %462 = math.exp %461 : vector<8x64xf32>
    %cst_272 = arith.constant 1.000000e+00 : f32
    %463 = vector.broadcast %cst_272 : f32 to vector<8x64xf32>
    %464 = arith.addf %463, %462 : vector<8x64xf32>
    %465 = arith.divf %463, %464 : vector<8x64xf32>
    %466 = math.tanh %460 : vector<8x64xf32>
    %467 = arith.mulf %465, %466 : vector<8x64xf32>
    %468 = arith.truncf %467 : vector<8x64xf32> to vector<8x64xbf16>
    %c24_273 = arith.constant 24 : index
    %c0_274 = arith.constant 0 : index
    %469 = vector.load %arg14[%c24_273, %c0_274] : memref<64x64xf32, #tpu.memory_space<vmem>>, vector<8x64xf32>
    %cst_275 = arith.constant dense<0.000000e+00> : vector<8x64xf32>
    %470 = tpu.matmul %468, %357, %cst_275 {dimension_numbers = #tpu.dot_dimension_numbers<[1], [0], [0], [1], [0, 0, 1, 1], [], []>} : vector<8x64xbf16>, vector<64x64xbf16>, vector<8x64xf32> -> vector<8x64xf32>
    %471 = arith.addf %469, %470 : vector<8x64xf32>
    %c24_276 = arith.constant 24 : index
    %c0_277 = arith.constant 0 : index
    %472 = vector.load %arg15[%c24_276, %c0_277] : memref<64x64xf32, #tpu.memory_space<vmem>>, vector<8x64xf32>
    %cst_278 = arith.constant dense<0.000000e+00> : vector<8x64xf32>
    %473 = tpu.matmul %468, %359, %cst_278 {dimension_numbers = #tpu.dot_dimension_numbers<[1], [0], [0], [1], [0, 0, 1, 1], [], []>} : vector<8x64xbf16>, vector<64x64xbf16>, vector<8x64xf32> -> vector<8x64xf32>
    %474 = arith.addf %472, %473 : vector<8x64xf32>
    %c24_279 = arith.constant 24 : index
    %c0_280 = arith.constant 0 : index
    %475 = vector.load %arg16[%c24_279, %c0_280] : memref<64x64xf32, #tpu.memory_space<vmem>>, vector<8x64xf32>
    %cst_281 = arith.constant dense<0.000000e+00> : vector<8x64xf32>
    %476 = tpu.matmul %468, %361, %cst_281 {dimension_numbers = #tpu.dot_dimension_numbers<[1], [0], [0], [1], [0, 0, 1, 1], [], []>} : vector<8x64xbf16>, vector<64x64xbf16>, vector<8x64xf32> -> vector<8x64xf32>
    %477 = arith.addf %475, %476 : vector<8x64xf32>
    %c24_282 = arith.constant 24 : index
    %c0_283 = arith.constant 0 : index
    %478 = vector.load %arg17[%c24_282, %c0_283] : memref<64x64xf32, #tpu.memory_space<vmem>>, vector<8x64xf32>
    %cst_284 = arith.constant dense<0.000000e+00> : vector<8x64xf32>
    %479 = tpu.matmul %468, %363, %cst_284 {dimension_numbers = #tpu.dot_dimension_numbers<[1], [0], [0], [1], [0, 0, 1, 1], [], []>} : vector<8x64xbf16>, vector<64x64xbf16>, vector<8x64xf32> -> vector<8x64xf32>
    %480 = arith.addf %478, %479 : vector<8x64xf32>
    %481 = arith.negf %474 : vector<8x64xf32>
    %482 = math.exp %481 : vector<8x64xf32>
    %cst_285 = arith.constant 1.000000e+00 : f32
    %483 = vector.broadcast %cst_285 : f32 to vector<8x64xf32>
    %484 = arith.addf %483, %482 : vector<8x64xf32>
    %485 = arith.divf %483, %484 : vector<8x64xf32>
    %486 = arith.mulf %485, %460 : vector<8x64xf32>
    %487 = arith.negf %471 : vector<8x64xf32>
    %488 = math.exp %487 : vector<8x64xf32>
    %cst_286 = arith.constant 1.000000e+00 : f32
    %489 = vector.broadcast %cst_286 : f32 to vector<8x64xf32>
    %490 = arith.addf %489, %488 : vector<8x64xf32>
    %491 = arith.divf %489, %490 : vector<8x64xf32>
    %492 = math.tanh %477 : vector<8x64xf32>
    %493 = arith.mulf %491, %492 : vector<8x64xf32>
    %494 = arith.addf %486, %493 : vector<8x64xf32>
    %495 = arith.negf %480 : vector<8x64xf32>
    %496 = math.exp %495 : vector<8x64xf32>
    %cst_287 = arith.constant 1.000000e+00 : f32
    %497 = vector.broadcast %cst_287 : f32 to vector<8x64xf32>
    %498 = arith.addf %497, %496 : vector<8x64xf32>
    %499 = arith.divf %497, %498 : vector<8x64xf32>
    %500 = math.tanh %494 : vector<8x64xf32>
    %501 = arith.mulf %499, %500 : vector<8x64xf32>
    %502 = arith.truncf %501 : vector<8x64xf32> to vector<8x64xbf16>
    %c32_288 = arith.constant 32 : index
    %c0_289 = arith.constant 0 : index
    %503 = vector.load %arg14[%c32_288, %c0_289] : memref<64x64xf32, #tpu.memory_space<vmem>>, vector<8x64xf32>
    %cst_290 = arith.constant dense<0.000000e+00> : vector<8x64xf32>
    %504 = tpu.matmul %502, %357, %cst_290 {dimension_numbers = #tpu.dot_dimension_numbers<[1], [0], [0], [1], [0, 0, 1, 1], [], []>} : vector<8x64xbf16>, vector<64x64xbf16>, vector<8x64xf32> -> vector<8x64xf32>
    %505 = arith.addf %503, %504 : vector<8x64xf32>
    %c32_291 = arith.constant 32 : index
    %c0_292 = arith.constant 0 : index
    %506 = vector.load %arg15[%c32_291, %c0_292] : memref<64x64xf32, #tpu.memory_space<vmem>>, vector<8x64xf32>
    %cst_293 = arith.constant dense<0.000000e+00> : vector<8x64xf32>
    %507 = tpu.matmul %502, %359, %cst_293 {dimension_numbers = #tpu.dot_dimension_numbers<[1], [0], [0], [1], [0, 0, 1, 1], [], []>} : vector<8x64xbf16>, vector<64x64xbf16>, vector<8x64xf32> -> vector<8x64xf32>
    %508 = arith.addf %506, %507 : vector<8x64xf32>
    %c32_294 = arith.constant 32 : index
    %c0_295 = arith.constant 0 : index
    %509 = vector.load %arg16[%c32_294, %c0_295] : memref<64x64xf32, #tpu.memory_space<vmem>>, vector<8x64xf32>
    %cst_296 = arith.constant dense<0.000000e+00> : vector<8x64xf32>
    %510 = tpu.matmul %502, %361, %cst_296 {dimension_numbers = #tpu.dot_dimension_numbers<[1], [0], [0], [1], [0, 0, 1, 1], [], []>} : vector<8x64xbf16>, vector<64x64xbf16>, vector<8x64xf32> -> vector<8x64xf32>
    %511 = arith.addf %509, %510 : vector<8x64xf32>
    %c32_297 = arith.constant 32 : index
    %c0_298 = arith.constant 0 : index
    %512 = vector.load %arg17[%c32_297, %c0_298] : memref<64x64xf32, #tpu.memory_space<vmem>>, vector<8x64xf32>
    %cst_299 = arith.constant dense<0.000000e+00> : vector<8x64xf32>
    %513 = tpu.matmul %502, %363, %cst_299 {dimension_numbers = #tpu.dot_dimension_numbers<[1], [0], [0], [1], [0, 0, 1, 1], [], []>} : vector<8x64xbf16>, vector<64x64xbf16>, vector<8x64xf32> -> vector<8x64xf32>
    %514 = arith.addf %512, %513 : vector<8x64xf32>
    %515 = arith.negf %508 : vector<8x64xf32>
    %516 = math.exp %515 : vector<8x64xf32>
    %cst_300 = arith.constant 1.000000e+00 : f32
    %517 = vector.broadcast %cst_300 : f32 to vector<8x64xf32>
    %518 = arith.addf %517, %516 : vector<8x64xf32>
    %519 = arith.divf %517, %518 : vector<8x64xf32>
    %520 = arith.mulf %519, %494 : vector<8x64xf32>
    %521 = arith.negf %505 : vector<8x64xf32>
    %522 = math.exp %521 : vector<8x64xf32>
    %cst_301 = arith.constant 1.000000e+00 : f32
    %523 = vector.broadcast %cst_301 : f32 to vector<8x64xf32>
    %524 = arith.addf %523, %522 : vector<8x64xf32>
    %525 = arith.divf %523, %524 : vector<8x64xf32>
    %526 = math.tanh %511 : vector<8x64xf32>
    %527 = arith.mulf %525, %526 : vector<8x64xf32>
    %528 = arith.addf %520, %527 : vector<8x64xf32>
    %529 = arith.negf %514 : vector<8x64xf32>
    %530 = math.exp %529 : vector<8x64xf32>
    %cst_302 = arith.constant 1.000000e+00 : f32
    %531 = vector.broadcast %cst_302 : f32 to vector<8x64xf32>
    %532 = arith.addf %531, %530 : vector<8x64xf32>
    %533 = arith.divf %531, %532 : vector<8x64xf32>
    %534 = math.tanh %528 : vector<8x64xf32>
    %535 = arith.mulf %533, %534 : vector<8x64xf32>
    %536 = arith.truncf %535 : vector<8x64xf32> to vector<8x64xbf16>
    %c40_303 = arith.constant 40 : index
    %c0_304 = arith.constant 0 : index
    %537 = vector.load %arg14[%c40_303, %c0_304] : memref<64x64xf32, #tpu.memory_space<vmem>>, vector<8x64xf32>
    %cst_305 = arith.constant dense<0.000000e+00> : vector<8x64xf32>
    %538 = tpu.matmul %536, %357, %cst_305 {dimension_numbers = #tpu.dot_dimension_numbers<[1], [0], [0], [1], [0, 0, 1, 1], [], []>} : vector<8x64xbf16>, vector<64x64xbf16>, vector<8x64xf32> -> vector<8x64xf32>
    %539 = arith.addf %537, %538 : vector<8x64xf32>
    %c40_306 = arith.constant 40 : index
    %c0_307 = arith.constant 0 : index
    %540 = vector.load %arg15[%c40_306, %c0_307] : memref<64x64xf32, #tpu.memory_space<vmem>>, vector<8x64xf32>
    %cst_308 = arith.constant dense<0.000000e+00> : vector<8x64xf32>
    %541 = tpu.matmul %536, %359, %cst_308 {dimension_numbers = #tpu.dot_dimension_numbers<[1], [0], [0], [1], [0, 0, 1, 1], [], []>} : vector<8x64xbf16>, vector<64x64xbf16>, vector<8x64xf32> -> vector<8x64xf32>
    %542 = arith.addf %540, %541 : vector<8x64xf32>
    %c40_309 = arith.constant 40 : index
    %c0_310 = arith.constant 0 : index
    %543 = vector.load %arg16[%c40_309, %c0_310] : memref<64x64xf32, #tpu.memory_space<vmem>>, vector<8x64xf32>
    %cst_311 = arith.constant dense<0.000000e+00> : vector<8x64xf32>
    %544 = tpu.matmul %536, %361, %cst_311 {dimension_numbers = #tpu.dot_dimension_numbers<[1], [0], [0], [1], [0, 0, 1, 1], [], []>} : vector<8x64xbf16>, vector<64x64xbf16>, vector<8x64xf32> -> vector<8x64xf32>
    %545 = arith.addf %543, %544 : vector<8x64xf32>
    %c40_312 = arith.constant 40 : index
    %c0_313 = arith.constant 0 : index
    %546 = vector.load %arg17[%c40_312, %c0_313] : memref<64x64xf32, #tpu.memory_space<vmem>>, vector<8x64xf32>
    %cst_314 = arith.constant dense<0.000000e+00> : vector<8x64xf32>
    %547 = tpu.matmul %536, %363, %cst_314 {dimension_numbers = #tpu.dot_dimension_numbers<[1], [0], [0], [1], [0, 0, 1, 1], [], []>} : vector<8x64xbf16>, vector<64x64xbf16>, vector<8x64xf32> -> vector<8x64xf32>
    %548 = arith.addf %546, %547 : vector<8x64xf32>
    %549 = arith.negf %542 : vector<8x64xf32>
    %550 = math.exp %549 : vector<8x64xf32>
    %cst_315 = arith.constant 1.000000e+00 : f32
    %551 = vector.broadcast %cst_315 : f32 to vector<8x64xf32>
    %552 = arith.addf %551, %550 : vector<8x64xf32>
    %553 = arith.divf %551, %552 : vector<8x64xf32>
    %554 = arith.mulf %553, %528 : vector<8x64xf32>
    %555 = arith.negf %539 : vector<8x64xf32>
    %556 = math.exp %555 : vector<8x64xf32>
    %cst_316 = arith.constant 1.000000e+00 : f32
    %557 = vector.broadcast %cst_316 : f32 to vector<8x64xf32>
    %558 = arith.addf %557, %556 : vector<8x64xf32>
    %559 = arith.divf %557, %558 : vector<8x64xf32>
    %560 = math.tanh %545 : vector<8x64xf32>
    %561 = arith.mulf %559, %560 : vector<8x64xf32>
    %562 = arith.addf %554, %561 : vector<8x64xf32>
    %563 = arith.negf %548 : vector<8x64xf32>
    %564 = math.exp %563 : vector<8x64xf32>
    %cst_317 = arith.constant 1.000000e+00 : f32
    %565 = vector.broadcast %cst_317 : f32 to vector<8x64xf32>
    %566 = arith.addf %565, %564 : vector<8x64xf32>
    %567 = arith.divf %565, %566 : vector<8x64xf32>
    %568 = math.tanh %562 : vector<8x64xf32>
    %569 = arith.mulf %567, %568 : vector<8x64xf32>
    %570 = arith.truncf %569 : vector<8x64xf32> to vector<8x64xbf16>
    %c48_318 = arith.constant 48 : index
    %c0_319 = arith.constant 0 : index
    %571 = vector.load %arg14[%c48_318, %c0_319] : memref<64x64xf32, #tpu.memory_space<vmem>>, vector<8x64xf32>
    %cst_320 = arith.constant dense<0.000000e+00> : vector<8x64xf32>
    %572 = tpu.matmul %570, %357, %cst_320 {dimension_numbers = #tpu.dot_dimension_numbers<[1], [0], [0], [1], [0, 0, 1, 1], [], []>} : vector<8x64xbf16>, vector<64x64xbf16>, vector<8x64xf32> -> vector<8x64xf32>
    %573 = arith.addf %571, %572 : vector<8x64xf32>
    %c48_321 = arith.constant 48 : index
    %c0_322 = arith.constant 0 : index
    %574 = vector.load %arg15[%c48_321, %c0_322] : memref<64x64xf32, #tpu.memory_space<vmem>>, vector<8x64xf32>
    %cst_323 = arith.constant dense<0.000000e+00> : vector<8x64xf32>
    %575 = tpu.matmul %570, %359, %cst_323 {dimension_numbers = #tpu.dot_dimension_numbers<[1], [0], [0], [1], [0, 0, 1, 1], [], []>} : vector<8x64xbf16>, vector<64x64xbf16>, vector<8x64xf32> -> vector<8x64xf32>
    %576 = arith.addf %574, %575 : vector<8x64xf32>
    %c48_324 = arith.constant 48 : index
    %c0_325 = arith.constant 0 : index
    %577 = vector.load %arg16[%c48_324, %c0_325] : memref<64x64xf32, #tpu.memory_space<vmem>>, vector<8x64xf32>
    %cst_326 = arith.constant dense<0.000000e+00> : vector<8x64xf32>
    %578 = tpu.matmul %570, %361, %cst_326 {dimension_numbers = #tpu.dot_dimension_numbers<[1], [0], [0], [1], [0, 0, 1, 1], [], []>} : vector<8x64xbf16>, vector<64x64xbf16>, vector<8x64xf32> -> vector<8x64xf32>
    %579 = arith.addf %577, %578 : vector<8x64xf32>
    %c48_327 = arith.constant 48 : index
    %c0_328 = arith.constant 0 : index
    %580 = vector.load %arg17[%c48_327, %c0_328] : memref<64x64xf32, #tpu.memory_space<vmem>>, vector<8x64xf32>
    %cst_329 = arith.constant dense<0.000000e+00> : vector<8x64xf32>
    %581 = tpu.matmul %570, %363, %cst_329 {dimension_numbers = #tpu.dot_dimension_numbers<[1], [0], [0], [1], [0, 0, 1, 1], [], []>} : vector<8x64xbf16>, vector<64x64xbf16>, vector<8x64xf32> -> vector<8x64xf32>
    %582 = arith.addf %580, %581 : vector<8x64xf32>
    %583 = arith.negf %576 : vector<8x64xf32>
    %584 = math.exp %583 : vector<8x64xf32>
    %cst_330 = arith.constant 1.000000e+00 : f32
    %585 = vector.broadcast %cst_330 : f32 to vector<8x64xf32>
    %586 = arith.addf %585, %584 : vector<8x64xf32>
    %587 = arith.divf %585, %586 : vector<8x64xf32>
    %588 = arith.mulf %587, %562 : vector<8x64xf32>
    %589 = arith.negf %573 : vector<8x64xf32>
    %590 = math.exp %589 : vector<8x64xf32>
    %cst_331 = arith.constant 1.000000e+00 : f32
    %591 = vector.broadcast %cst_331 : f32 to vector<8x64xf32>
    %592 = arith.addf %591, %590 : vector<8x64xf32>
    %593 = arith.divf %591, %592 : vector<8x64xf32>
    %594 = math.tanh %579 : vector<8x64xf32>
    %595 = arith.mulf %593, %594 : vector<8x64xf32>
    %596 = arith.addf %588, %595 : vector<8x64xf32>
    %597 = arith.negf %582 : vector<8x64xf32>
    %598 = math.exp %597 : vector<8x64xf32>
    %cst_332 = arith.constant 1.000000e+00 : f32
    %599 = vector.broadcast %cst_332 : f32 to vector<8x64xf32>
    %600 = arith.addf %599, %598 : vector<8x64xf32>
    %601 = arith.divf %599, %600 : vector<8x64xf32>
    %602 = math.tanh %596 : vector<8x64xf32>
    %603 = arith.mulf %601, %602 : vector<8x64xf32>
    %604 = arith.truncf %603 : vector<8x64xf32> to vector<8x64xbf16>
    %c56_333 = arith.constant 56 : index
    %c0_334 = arith.constant 0 : index
    %605 = vector.load %arg14[%c56_333, %c0_334] : memref<64x64xf32, #tpu.memory_space<vmem>>, vector<8x64xf32>
    %cst_335 = arith.constant dense<0.000000e+00> : vector<8x64xf32>
    %606 = tpu.matmul %604, %357, %cst_335 {dimension_numbers = #tpu.dot_dimension_numbers<[1], [0], [0], [1], [0, 0, 1, 1], [], []>} : vector<8x64xbf16>, vector<64x64xbf16>, vector<8x64xf32> -> vector<8x64xf32>
    %607 = arith.addf %605, %606 : vector<8x64xf32>
    %c56_336 = arith.constant 56 : index
    %c0_337 = arith.constant 0 : index
    %608 = vector.load %arg15[%c56_336, %c0_337] : memref<64x64xf32, #tpu.memory_space<vmem>>, vector<8x64xf32>
    %cst_338 = arith.constant dense<0.000000e+00> : vector<8x64xf32>
    %609 = tpu.matmul %604, %359, %cst_338 {dimension_numbers = #tpu.dot_dimension_numbers<[1], [0], [0], [1], [0, 0, 1, 1], [], []>} : vector<8x64xbf16>, vector<64x64xbf16>, vector<8x64xf32> -> vector<8x64xf32>
    %610 = arith.addf %608, %609 : vector<8x64xf32>
    %c56_339 = arith.constant 56 : index
    %c0_340 = arith.constant 0 : index
    %611 = vector.load %arg16[%c56_339, %c0_340] : memref<64x64xf32, #tpu.memory_space<vmem>>, vector<8x64xf32>
    %cst_341 = arith.constant dense<0.000000e+00> : vector<8x64xf32>
    %612 = tpu.matmul %604, %361, %cst_341 {dimension_numbers = #tpu.dot_dimension_numbers<[1], [0], [0], [1], [0, 0, 1, 1], [], []>} : vector<8x64xbf16>, vector<64x64xbf16>, vector<8x64xf32> -> vector<8x64xf32>
    %613 = arith.addf %611, %612 : vector<8x64xf32>
    %c56_342 = arith.constant 56 : index
    %c0_343 = arith.constant 0 : index
    %614 = vector.load %arg17[%c56_342, %c0_343] : memref<64x64xf32, #tpu.memory_space<vmem>>, vector<8x64xf32>
    %cst_344 = arith.constant dense<0.000000e+00> : vector<8x64xf32>
    %615 = tpu.matmul %604, %363, %cst_344 {dimension_numbers = #tpu.dot_dimension_numbers<[1], [0], [0], [1], [0, 0, 1, 1], [], []>} : vector<8x64xbf16>, vector<64x64xbf16>, vector<8x64xf32> -> vector<8x64xf32>
    %616 = arith.addf %614, %615 : vector<8x64xf32>
    %617 = arith.negf %610 : vector<8x64xf32>
    %618 = math.exp %617 : vector<8x64xf32>
    %cst_345 = arith.constant 1.000000e+00 : f32
    %619 = vector.broadcast %cst_345 : f32 to vector<8x64xf32>
    %620 = arith.addf %619, %618 : vector<8x64xf32>
    %621 = arith.divf %619, %620 : vector<8x64xf32>
    %622 = arith.mulf %621, %596 : vector<8x64xf32>
    %623 = arith.negf %607 : vector<8x64xf32>
    %624 = math.exp %623 : vector<8x64xf32>
    %cst_346 = arith.constant 1.000000e+00 : f32
    %625 = vector.broadcast %cst_346 : f32 to vector<8x64xf32>
    %626 = arith.addf %625, %624 : vector<8x64xf32>
    %627 = arith.divf %625, %626 : vector<8x64xf32>
    %628 = math.tanh %613 : vector<8x64xf32>
    %629 = arith.mulf %627, %628 : vector<8x64xf32>
    %630 = arith.addf %622, %629 : vector<8x64xf32>
    %631 = arith.negf %616 : vector<8x64xf32>
    %632 = math.exp %631 : vector<8x64xf32>
    %cst_347 = arith.constant 1.000000e+00 : f32
    %633 = vector.broadcast %cst_347 : f32 to vector<8x64xf32>
    %634 = arith.addf %633, %632 : vector<8x64xf32>
    %635 = arith.divf %633, %634 : vector<8x64xf32>
    %636 = math.tanh %630 : vector<8x64xf32>
    %637 = arith.mulf %635, %636 : vector<8x64xf32>
    %c0_348 = arith.constant 0 : index
    %c0_349 = arith.constant 0 : index
    %638 = vector.load %arg7[%c0_348, %c0_349] : memref<1x64xf32, #tpu.memory_space<vmem>>, vector<1x64xf32>
    %639 = vector.broadcast %638 : vector<1x64xf32> to vector<8x64xf32>
    %640 = arith.mulf %637, %639 : vector<8x64xf32>
    %cst_350 = arith.constant dense<0.000000e+00> : vector<8xf32>
    %641 = vector.multi_reduction <add>, %640, %cst_350 [1] : vector<8x64xf32> to vector<8xf32>
    %642 = vector.shape_cast %641 : vector<8xf32> to vector<8x1xf32>
    %c0_351 = arith.constant 0 : index
    %c0_352 = arith.constant 0 : index
    %643 = vector.load %arg8[%c0_351, %c0_352] : memref<1x1xf32, #tpu.memory_space<vmem>>, vector<1x1xf32>
    %644 = vector.broadcast %643 : vector<1x1xf32> to vector<8x1xf32>
    %645 = arith.addf %642, %644 : vector<8x1xf32>
    %c0_353 = arith.constant 0 : index
    %c0_354 = arith.constant 0 : index
    %646 = vector.load %arg9[%c0_353, %c0_354] : memref<8x1xf32, #tpu.memory_space<vmem>>, vector<8x1xf32>
    tpu.vector_store %arg9[%c0_353, %c0_354], %645 {strides = array<i32>} : memref<8x1xf32, #tpu.memory_space<vmem>>, vector<8x1xf32>,
    return
  }
}

</mosaic_0001>

<bundles_post_ra>
// kernel: lstm_model_forward.1
= control target key start
LH: loop header
LB: loop body
LE: loop exit
PB: predicated region body
PF: predicated region fallthrough
CT: control target
= control target key end

     0   :  { %s7879_s0 = inlined_call_operand.vmem [shape: f32[64,6], index: 0, kind: input, shape index: {}]   ;;  %s7880_s1 = inlined_call_operand.vmem [shape: f32[4,6,64], index: 1, kind: input, shape index: {}]   ;;  %s7881_s2 = inlined_call_operand.vmem [shape: bf16[4,64,64], index: 2, kind: input, shape index: {}]   ;;  %s7882_s3 = inlined_call_operand.vmem [shape: f32[4,1,64], index: 3, kind: input, shape index: {}]   ;;  %s7883_s4 = inlined_call_operand.hbm [shape: f32[4,64,64], index: 4, kind: input, shape index: {}]   ;;  %s7884_s5 = inlined_call_operand.hbm [shape: bf16[4,64,64], index: 5, kind: input, shape index: {}]   ;;  %s7885_s6 = inlined_call_operand.vmem [shape: f32[4,1,64], index: 6, kind: input, shape index: {}]   ;;  %s7886_s7 = inlined_call_operand.vmem [shape: f32[1,64], index: 7, kind: input, shape index: {}]   ;;  %s7887_s8 = inlined_call_operand.<no memory space> [shape: f32[1,1], index: 8, kind: input, shape index: {}]   ;;  %s7888_s9 = inlined_call_operand.vmem [shape: f32[8,1], index: 9, kind: output, shape index: {}]  }
   0x1   :  { %v14_v0 = vstv %s7887_s8 }
   0x2   :  { %15 = vst [vmem:[#allocation11] sm:$0x1] %v14_v0 }
   0x3   :  { %16 = vsyncpa [#allocation13], 0 }
   0x4   :  { %17 = vsyncpa [#allocation15], 0  ;;  %s6554_s11 = smov [#allocation12]  }
   0x5   :  { %s31_s12 = sshll.u32 %s6554_s11, 4  ;;  %s32_s12 = int_to_ptr.vmem [resolvable:$true] %s31_s12 }
   0x6   :  { %s6518_s13 = scalar_lea.vmem %s32_s12, 4096  ;;  %p6523_p1 = scmp.lt.s32.totalorder %s32_s12, %s32_s12 }
   0x7   :  { %p6519_p0 = scmp.ne.s32.totalorder %s32_s12, %s6518_s13  ;;  %p6524_p2 = scmp.lt.s32.totalorder %s6518_s13, %s6518_s13 }
   0x9   :  { %p6525_p3 = por %p6524_p2, %p6523_p1 }
   0xb   :  { %p6526_p4 = pnand %p6525_p3, %p6519_p0 }
   0xd   :  { %6529 = shalt.err (!%p6526_p4)
}
   0xe   :  { %s6555_s14 = smov 128   ;;  %s6556_s15 = smov 8  }
   0xf   :  { %37 = dma.hbm_to_vmem [thread:$0]  %s7883_s4, 4096, %s32_s12, [#allocation13], %s6555_s14, %s6555_s14, %s6556_s15  }
  0x10   :  { %s6557_s8 = smov [#allocation14]  }
  0x11   :  { %s43_s18 = sshll.u32 %s6557_s8, 4  ;;  %s44_s18 = int_to_ptr.vmem [resolvable:$true] %s43_s18 }
  0x12   :  { %s6538_s19 = scalar_lea.vmem %s44_s18, 2048  ;;  %p6543_p6 = scmp.lt.s32.totalorder %s44_s18, %s44_s18 }
  0x13   :  { %p6539_p5 = scmp.ne.s32.totalorder %s44_s18, %s6538_s19  ;;  %p6544_p7 = scmp.lt.s32.totalorder %s6538_s19, %s6538_s19 }
  0x15   :  { %p6545_p8 = por %p6544_p7, %p6543_p6 }
  0x17   :  { %p6546_p9 = pnand %p6545_p8, %p6539_p5 }
  0x19   :  { %6549 = shalt.err (!%p6546_p9)
}
  0x1a   :  { %s6558_s20 = smov 64   ;;  %s6559_s21 = smov 4  }
  0x1b   :  { %49 = dma.hbm_to_vmem [thread:$0]  %s7884_s5, 2048, %s44_s18, [#allocation15], %s6558_s20, %s6558_s20, %s6559_s21  }
  0x1c   :  { %6550 = dma.done.wait [#allocation13], 4096  }
  0x1d   :  { %6551 = vsyncadd [#allocation13], 4294963200 }
  0x1e   :  { %6552 = dma.done.wait [#allocation15], 2048  }
  0x1f   :  { %6553 = vsyncadd [#allocation15], 4294965248  ;;  %vm104_vm0 = vcmask 1045504   ;;  %vm79_vm1 = vcmask 48128   ;;  %v71_v1 = vld [vmem:[%s7880_s1] sm:$0x3f] }
  0x20   :  { %v4588_v2 = vld [vmem:[%s7880_s1 + $0x8] sm:$0x3f]  ;;  %v63_v3 = vld [vmem:[%s7879_s0] sm:$0xff]  ;;  %5245 = vmatprep.subr.msk.mxu0 %vm104_vm0, %v71_v1  ;;  %v4600_v5 = vld [vmem:[%s7880_s1 + $0x10] sm:$0x3f]  ;;  %v6560_v12 = vmov 0.0  }
  0x21   :  { %5259 = vmatprep.subr.msk.mxu1 %vm104_vm0, %v4588_v2  ;;  %v64_v4 = vld [vmem:[%s7879_s0 + $0x8] sm:$0xff]  ;;  %5246 = vmatpush3.msk.msra.mxu0 %vm104_vm0, %v71_v1  ;;  %v4612_v6 = vld [vmem:[%s7880_s1 + $0x18] sm:$0x3f]  ;;  %v65_v7 = vld [vmem:[%s7879_s0 + $0x10] sm:$0xff]  ;;  %vm6561_vm2 = vmmov 0   ;;  %v6562_v24 = vmov 0  }
  0x22   :  { %5247 = vmatprep.mubr.msk.f32.mxu0 %vm79_vm1, %v63_v3  ;;  %5260 = vmatpush3.msk.msra.mxu1 %vm104_vm0, %v4588_v2  ;;  %v66_v8 = vld [vmem:[%s7879_s0 + $0x18] sm:$0xff]  ;;  %v67_v9 = vld [vmem:[%s7879_s0 + $0x20] sm:$0xff]  ;;  %v68_v10 = vld [vmem:[%s7879_s0 + $0x28] sm:$0xff]  ;;  %vm213_vm3 = vcmask 523264   ;;  %vm4570_vm4 = vcmask 7168  }
  0x23   :  { %5261 = vmatprep.mubr.msk.f32.mxu1 %vm79_vm1, %v63_v3  ;;  %5248 = vmatmul.mubr.msk.f32.vlgmr.msra.gmra.mxu0 %vm79_vm1, %v64_v4  ;;  %v69_v11 = vld [vmem:[%s7879_s0 + $0x30] sm:$0xff]  ;;  %v70_v13 = vld [vmem:[%s7879_s0 + $0x38] sm:$0xff]  ;;  %v6717_v18 = vld [vmem:[%s7881_s2 + $0x8] sm:$0xff]  }
  0x24   :  { %5262 = vmatmul.mubr.msk.f32.vlgmr.msra.gmra.mxu1 %vm79_vm1, %v64_v4  ;;  %5273 = vmatprep.subr.msk.mxu0 %vm104_vm0, %v4600_v5  ;;  %v6687_v14 = vld [vmem:[%s7881_s2 + $0x18] sm:$0xff]   ;;  %v6699_v16 = vld [vmem:[%s7881_s2 + $0x10] sm:$0xff]   ;;  %v6722_v19 = vld [vmem:[%s7881_s2 + $0x28] sm:$0xff]  }
  0x25   :  { %5287 = vmatprep.subr.msk.mxu1 %vm104_vm0, %v4612_v6  ;;  %5274 = vmatpush3.msk.msra.mxu0 %vm104_vm0, %v4600_v5  ;;  %v6694_v15 = vld [vmem:[%s7881_s2 + $0x38] sm:$0xff]   ;;  %v6704_v17 = vld [vmem:[%s7881_s2 + $0x30] sm:$0xff]   ;;  %v6735_v20 = vld [vmem:[%s7881_s2] sm:$0xff]  }
  0x26   :  { %5288 = vmatpush3.msk.msra.mxu1 %vm104_vm0, %v4612_v6  ;;  %5250 = vmatprep.mubr.msk.f32.mxu0 %vm79_vm1, %v65_v7  ;;  %v6740_v21 = vld [vmem:[%s7881_s2 + $0x20] sm:$0xff]   ;;  %v6757_v22 = vld [vmem:[%s7881_s2 + $0x58] sm:$0xff]   ;;  %v6777_v25 = vld [vmem:[%s7881_s2 + $0x50] sm:$0xff]  }
  0x27   :  { %5264 = vmatprep.mubr.msk.f32.mxu1 %vm79_vm1, %v65_v7  ;;  %5251 = vmatmul.mubr.msk.f32.gmra.mxu0 %vm79_vm1, %v66_v8  ;;  %v6762_v23 = vld [vmem:[%s7881_s2 + $0x78] sm:$0xff]   ;;  %v6782_v26 = vld [vmem:[%s7881_s2 + $0x70] sm:$0xff]   ;;  %v6795_v27 = vld [vmem:[%s7881_s2 + $0x48] sm:$0xff]  }
  0x28   :  { %5265 = vmatmul.mubr.msk.f32.gmra.mxu1 %vm79_vm1, %v66_v8  ;;  %5253 = vmatprep.mubr.msk.f32.mxu0 %vm79_vm1, %v67_v9  ;;  %v6800_v28 = vld [vmem:[%s7881_s2 + $0x68] sm:$0xff]   ;;  %v6809_v29 = vld [vmem:[%s7881_s2 + $0x40] sm:$0xff]  }
  0x29   :  { %5267 = vmatprep.mubr.msk.f32.mxu1 %vm79_vm1, %v67_v9  ;;  %5301 = vmatprep.subr.bf16.mxu0 %v6560_v12  ;;  %v6814_v30 = vld [vmem:[%s7881_s2 + $0x60] sm:$0xff]  }
  0x2a   :  { %5313 = vmatprep.subr.bf16.mxu1 %v6560_v12  ;;  %v4578_v31 = vld [vmem:[%s7882_s3] ss:$0 sm:$0xff]  ;;  %v4590_v32 = vld [vmem:[%s7882_s3 + $0x1] ss:$0 sm:$0xff]  ;;  %v4602_v63 = vld [vmem:[%s7882_s3 + $0x2] ss:$0 sm:$0xff] }
  0x2b   :  { %5254 = vmatmul.mubr.msk.f32.gmra.mxu0 %vm79_vm1, %v68_v10  ;;  %v4614_v0 = vld [vmem:[%s7882_s3 + $0x3] ss:$0 sm:$0xff] }
  0x2c   :  { %5268 = vmatmul.mubr.msk.f32.gmra.mxu1 %vm79_vm1, %v68_v10  ;;  %5256 = vmatprep.mubr.msk.f32.mxu0 %vm79_vm1, %v69_v11 }
  0x2d   :  { %5270 = vmatprep.mubr.msk.f32.mxu1 %vm79_vm1, %v69_v11 }
  0x2f   :  { %5257 = vmatmul.mubr.msk.f32.gmra.mxu0 %vm79_vm1, %v70_v13 }
  0x30   :  { %5271 = vmatmul.mubr.msk.f32.gmra.mxu1 %vm79_vm1, %v70_v13  ;;  %5275 = vmatprep.mubr.msk.f32.mxu0 %vm79_vm1, %v63_v3 }
  0x31   :  { %5289 = vmatprep.mubr.msk.f32.mxu1 %vm79_vm1, %v63_v3 }
  0x33   :  { %5276 = vmatmul.mubr.msk.f32.vlgmr.msra.gmra.mxu0 %vm79_vm1, %v64_v4 }
  0x34   :  { %5290 = vmatmul.mubr.msk.f32.vlgmr.msra.gmra.mxu1 %vm79_vm1, %v64_v4  ;;  %5302 = vmatpush3.bf16.msra.mxu0 %v6687_v14 }
  0x35   :  { %5314 = vmatpush3.bf16.msra.mxu1 %v6694_v15  ;;  %5278 = vmatprep.mubr.msk.f32.mxu0 %vm79_vm1, %v65_v7 }
  0x36   :  { %5292 = vmatprep.mubr.msk.f32.mxu1 %vm79_vm1, %v65_v7  ;;  %5303 = vmatprep.subr.bf16.mxu0 %v6560_v12 }
  0x37   :  { %5315 = vmatprep.subr.bf16.mxu1 %v6560_v12  ;;  %5279 = vmatmul.mubr.msk.f32.gmra.mxu0 %vm79_vm1, %v66_v8 }
  0x38   :  { %5293 = vmatmul.mubr.msk.f32.gmra.mxu1 %vm79_vm1, %v66_v8  ;;  %5304 = vmatpush3.bf16.msra.mxu0 %v6699_v16 }
  0x39   :  { %5316 = vmatpush3.bf16.msra.mxu1 %v6704_v17  ;;  %5281 = vmatprep.mubr.msk.f32.mxu0 %vm79_vm1, %v67_v9 }
  0x3a   :  { %5295 = vmatprep.mubr.msk.f32.mxu1 %vm79_vm1, %v67_v9  ;;  %5305 = vmatprep.subr.bf16.mxu0 %v6560_v12 }
  0x3b   :  { %5317 = vmatprep.subr.bf16.mxu1 %v6560_v12  ;;  %5282 = vmatmul.mubr.msk.f32.gmra.mxu0 %vm79_vm1, %v68_v10 }
  0x3c   :  { %5296 = vmatmul.mubr.msk.f32.gmra.mxu1 %vm79_vm1, %v68_v10  ;;  %5306 = vmatpush3.bf16.msra.mxu0 %v6717_v18 }
  0x3d   :  { %5318 = vmatpush3.bf16.msra.mxu1 %v6722_v19  ;;  %5284 = vmatprep.mubr.msk.f32.mxu0 %vm79_vm1, %v69_v11 }
  0x3e   :  { %5298 = vmatprep.mubr.msk.f32.mxu1 %vm79_vm1, %v69_v11  ;;  %5307 = vmatprep.subr.bf16.mxu0 %v6560_v12 }
  0x3f   :  { %5319 = vmatprep.subr.bf16.mxu1 %v6560_v12  ;;  %5285 = vmatmul.mubr.msk.f32.gmra.mxu0 %vm79_vm1, %v70_v13 }
  0x40   :  { %5299 = vmatmul.mubr.msk.f32.gmra.mxu1 %vm79_vm1, %v70_v13  ;;  %5308 = vmatpush3.bf16.msra.mxu0 %v6735_v20 }
  0x41   :  { %5320 = vmatpush3.bf16.msra.mxu1 %v6740_v21  ;;  %5309 = vmatprep.mubr.msk.bf16.mxu0 %vm6561_vm2, %v6560_v12 }
  0x42   :  { %5321 = vmatprep.mubr.msk.bf16.mxu1 %vm6561_vm2, %v6560_v12  ;;  %5325 = vmatprep.subr.bf16.mxu0 %v6560_v12 }
  0x43   :  { %5337 = vmatprep.subr.bf16.mxu1 %v6560_v12  ;;  %5310 = vmatmul.mubr.bf16.vlgmr.msra.gmra.mxu0 %v6562_v24 }
  0x44   :  { %5322 = vmatmul.mubr.bf16.vlgmr.msra.gmra.mxu1 %v6562_v24  ;;  %5326 = vmatpush3.bf16.msra.mxu0 %v6757_v22 }
  0x45   :  { %5338 = vmatpush3.bf16.msra.mxu1 %v6762_v23  ;;  %5327 = vmatprep.subr.bf16.mxu0 %v6560_v12 }
  0x46   :  { %5339 = vmatprep.subr.bf16.mxu1 %v6560_v12  ;;  %5333 = vmatprep.mubr.msk.bf16.mxu0 %vm6561_vm2, %v6560_v12 }
  0x47   :  { %5345 = vmatprep.mubr.msk.bf16.mxu1 %vm6561_vm2, %v6560_v12 }
  0x48   :  { %5328 = vmatpush3.bf16.msra.mxu0 %v6777_v25 }
  0x49   :  { %5340 = vmatpush3.bf16.msra.mxu1 %v6782_v26  ;;  %5329 = vmatprep.subr.bf16.mxu0 %v6560_v12 }
  0x4a   :  { %5341 = vmatprep.subr.bf16.mxu1 %v6560_v12 }
  0x4c   :  { %5330 = vmatpush3.bf16.msra.mxu0 %v6795_v27 }
  0x4d   :  { %5342 = vmatpush3.bf16.msra.mxu1 %v6800_v28  ;;  %5331 = vmatprep.subr.bf16.mxu0 %v6560_v12 }
  0x4e   :  { %5343 = vmatprep.subr.bf16.mxu1 %v6560_v12 }
  0x50   :  { %5332 = vmatpush3.bf16.msra.mxu0 %v6809_v29 }
  0x51   :  { %5344 = vmatpush3.bf16.msra.mxu1 %v6814_v30  ;;  %5349 = vmatprep.subr.bf16.mxu0 %v6560_v12 }
  0x52   :  { %5361 = vmatprep.subr.bf16.mxu1 %v6560_v12 }
  0x53   :  { %5334 = vmatmul.mubr.bf16.vlgmr.msra.gmra.mxu0 %v6562_v24 }
  0x54   :  { %5346 = vmatmul.mubr.bf16.vlgmr.msra.gmra.mxu1 %v6562_v24  ;;  %5350 = vmatpush3.bf16.msra.mxu0 %v6687_v14 }
  0x55   :  { %5362 = vmatpush3.bf16.msra.mxu1 %v6694_v15  ;;  %5351 = vmatprep.subr.bf16.mxu0 %v6560_v12 }
  0x56   :  { %5363 = vmatprep.subr.bf16.mxu1 %v6560_v12  ;;  %5357 = vmatprep.mubr.msk.bf16.mxu0 %vm6561_vm2, %v6560_v12 }
  0x57   :  { %5369 = vmatprep.mubr.msk.bf16.mxu1 %vm6561_vm2, %v6560_v12 }
  0x58   :  { %5352 = vmatpush3.bf16.msra.mxu0 %v6699_v16 }
  0x59   :  { %5364 = vmatpush3.bf16.msra.mxu1 %v6704_v17  ;;  %5353 = vmatprep.subr.bf16.mxu0 %v6560_v12 }
  0x5a   :  { %5365 = vmatprep.subr.bf16.mxu1 %v6560_v12 }
  0x5c   :  { %5354 = vmatpush3.bf16.msra.mxu0 %v6717_v18 }
  0x5d   :  { %5366 = vmatpush3.bf16.msra.mxu1 %v6722_v19  ;;  %5355 = vmatprep.subr.bf16.mxu0 %v6560_v12 }
  0x5e   :  { %5367 = vmatprep.subr.bf16.mxu1 %v6560_v12 }
  0x60   :  { %5356 = vmatpush3.bf16.msra.mxu0 %v6735_v20 }
  0x61   :  { %5368 = vmatpush3.bf16.msra.mxu1 %v6740_v21  ;;  %5373 = vmatprep.subr.bf16.mxu0 %v6560_v12 }
  0x62   :  { %5385 = vmatprep.subr.bf16.mxu1 %v6560_v12 }
  0xe3   :  { %v5249_v33 = vpop.f32.mrf.mxu0 }
  0xe4   :  { %v5263_v34 = vpop.f32.mrf.mxu1  ;;  %v180_v35 = vadd.f32 %v5249_v33, %v4578_v31 }
  0xe5   :  { %v307_v36 = vadd.f32 %v5263_v34, %v4590_v32  ;;  %v174_v37 = vpop.f32.mrf.mxu0 }
  0xe6   :  { %v301_v38 = vpop.f32.mrf.mxu1  ;;  %215 = vst.msk [vmem:[#allocation2 + $0x8] sm:$0xff] %vm213_vm3, %v180_v35  ;;  %v175_v39 = vadd.f32 %v4578_v31, %v174_v37 }
  0xe7   :  { %341 = vst.msk [vmem:[#allocation3 + $0x8] sm:$0xff] %vm213_vm3, %v307_v36  ;;  %v302_v40 = vadd.f32 %v4590_v32, %v301_v38  ;;  %v5252_v41 = vpop.f32.mrf.mxu0 }
  0xe8   :  { %v5266_v42 = vpop.f32.mrf.mxu1  ;;  %214 = vst.msk [vmem:[#allocation2] sm:$0xff] %vm213_vm3, %v175_v39  ;;  %v190_v43 = vadd.f32 %v5252_v41, %v4578_v31 }
  0xe9   :  { %340 = vst.msk [vmem:[#allocation3] sm:$0xff] %vm213_vm3, %v302_v40  ;;  %v317_v44 = vadd.f32 %v5266_v42, %v4590_v32  ;;  %v184_v45 = vpop.f32.mrf.mxu0 }
  0xea   :  { %v311_v46 = vpop.f32.mrf.mxu1  ;;  %217 = vst.msk [vmem:[#allocation2 + $0x18] sm:$0xff] %vm213_vm3, %v190_v43  ;;  %v185_v47 = vadd.f32 %v4578_v31, %v184_v45 }
  0xeb   :  { %343 = vst.msk [vmem:[#allocation3 + $0x18] sm:$0xff] %vm213_vm3, %v317_v44  ;;  %v312_v48 = vadd.f32 %v4590_v32, %v311_v46  ;;  %v5255_v49 = vpop.f32.mrf.mxu0 }
  0xec   :  { %v5269_v50 = vpop.f32.mrf.mxu1  ;;  %216 = vst.msk [vmem:[#allocation2 + $0x10] sm:$0xff] %vm213_vm3, %v185_v47  ;;  %v200_v51 = vadd.f32 %v5255_v49, %v4578_v31 }
  0xed   :  { %342 = vst.msk [vmem:[#allocation3 + $0x10] sm:$0xff] %vm213_vm3, %v312_v48  ;;  %v327_v52 = vadd.f32 %v5269_v50, %v4590_v32  ;;  %v194_v53 = vpop.f32.mrf.mxu0 }
  0xee   :  { %v321_v54 = vpop.f32.mrf.mxu1  ;;  %219 = vst.msk [vmem:[#allocation2 + $0x28] sm:$0xff] %vm213_vm3, %v200_v51  ;;  %v195_v55 = vadd.f32 %v4578_v31, %v194_v53 }
  0xef   :  { %345 = vst.msk [vmem:[#allocation3 + $0x28] sm:$0xff] %vm213_vm3, %v327_v52  ;;  %v322_v56 = vadd.f32 %v4590_v32, %v321_v54  ;;  %v5258_v57 = vpop.f32.mrf.mxu0  ;;  %v635_v53 = vld [vmem:[#allocation2] sm:$0xff] }
  0xf0   :  { %v5272_v58 = vpop.f32.mrf.mxu1  ;;  %218 = vst.msk [vmem:[#allocation2 + $0x20] sm:$0xff] %vm213_vm3, %v195_v55  ;;  %v210_v59 = vadd.f32 %v5258_v57, %v4578_v31  ;;  %v704_v55 = vld [vmem:[#allocation3] sm:$0xff] }
  0xf1   :  { %344 = vst.msk [vmem:[#allocation3 + $0x20] sm:$0xff] %vm213_vm3, %v322_v56  ;;  %v337_v60 = vadd.f32 %v5272_v58, %v4590_v32  ;;  %v204_v61 = vpop.f32.mrf.mxu0 }
  0xf2   :  { %v331_v62 = vpop.f32.mrf.mxu1  ;;  %221 = vst.msk [vmem:[#allocation2 + $0x38] sm:$0xff] %vm213_vm3, %v210_v59  ;;  %v205_v1 = vadd.f32 %v4578_v31, %v204_v61 }
  0xf3   :  { %347 = vst.msk [vmem:[#allocation3 + $0x38] sm:$0xff] %vm213_vm3, %v337_v60  ;;  %v332_v2 = vadd.f32 %v4590_v32, %v331_v62  ;;  %v5277_v3 = vpop.f32.mrf.mxu0 }
  0xf4   :  { %v5291_v4 = vpop.f32.mrf.mxu1  ;;  %220 = vst.msk [vmem:[#allocation2 + $0x30] sm:$0xff] %vm213_vm3, %v205_v1  ;;  %v433_v5 = vadd.f32 %v5277_v3, %v4602_v63 }
  0xf5   :  { %346 = vst.msk [vmem:[#allocation3 + $0x30] sm:$0xff] %vm213_vm3, %v332_v2  ;;  %v559_v6 = vadd.f32 %v5291_v4, %v4614_v0  ;;  %v427_v7 = vpop.f32.mrf.mxu0 }
  0xf6   :  { %v553_v8 = vpop.f32.mrf.mxu1  ;;  %467 = vst.msk [vmem:[#allocation4 + $0x8] sm:$0xff] %vm213_vm3, %v433_v5  ;;  %v428_v9 = vadd.f32 %v4602_v63, %v427_v7 }
  0xf7   :  { %593 = vst.msk [vmem:[#allocation5 + $0x8] sm:$0xff] %vm213_vm3, %v559_v6  ;;  %v554_v10 = vadd.f32 %v4614_v0, %v553_v8  ;;  %v5280_v11 = vpop.f32.mrf.mxu0 }
  0xf8   :  { %v5294_v13 = vpop.f32.mrf.mxu1  ;;  %466 = vst.msk [vmem:[#allocation4] sm:$0xff] %vm213_vm3, %v428_v9  ;;  %v443_v31 = vadd.f32 %v5280_v11, %v4602_v63 }
  0xf9   :  { %592 = vst.msk [vmem:[#allocation5] sm:$0xff] %vm213_vm3, %v554_v10  ;;  %v569_v32 = vadd.f32 %v5294_v13, %v4614_v0  ;;  %v437_v33 = vpop.f32.mrf.mxu0 }
  0xfa   :  { %v563_v34 = vpop.f32.mrf.mxu1  ;;  %469 = vst.msk [vmem:[#allocation4 + $0x18] sm:$0xff] %vm213_vm3, %v443_v31  ;;  %v438_v35 = vadd.f32 %v4602_v63, %v437_v33 }
  0xfb   :  { %595 = vst.msk [vmem:[#allocation5 + $0x18] sm:$0xff] %vm213_vm3, %v569_v32  ;;  %v564_v36 = vadd.f32 %v4614_v0, %v563_v34  ;;  %v5283_v37 = vpop.f32.mrf.mxu0 }
  0xfc   :  { %v5297_v38 = vpop.f32.mrf.mxu1  ;;  %468 = vst.msk [vmem:[#allocation4 + $0x10] sm:$0xff] %vm213_vm3, %v438_v35  ;;  %v453_v39 = vadd.f32 %v5283_v37, %v4602_v63 }
  0xfd   :  { %594 = vst.msk [vmem:[#allocation5 + $0x10] sm:$0xff] %vm213_vm3, %v564_v36  ;;  %v579_v40 = vadd.f32 %v5297_v38, %v4614_v0  ;;  %v447_v41 = vpop.f32.mrf.mxu0 }
  0xfe   :  { %v573_v42 = vpop.f32.mrf.mxu1  ;;  %471 = vst.msk [vmem:[#allocation4 + $0x28] sm:$0xff] %vm213_vm3, %v453_v39  ;;  %v448_v43 = vadd.f32 %v4602_v63, %v447_v41 }
  0xff   :  { %597 = vst.msk [vmem:[#allocation5 + $0x28] sm:$0xff] %vm213_vm3, %v579_v40  ;;  %v574_v44 = vadd.f32 %v4614_v0, %v573_v42  ;;  %v5286_v45 = vpop.f32.mrf.mxu0  ;;  %v770_v3 = vld [vmem:[#allocation4] sm:$0xff] }
 0x100   :  { %v5300_v46 = vpop.f32.mrf.mxu1  ;;  %470 = vst.msk [vmem:[#allocation4 + $0x20] sm:$0xff] %vm213_vm3, %v448_v43  ;;  %v463_v47 = vadd.f32 %v5286_v45, %v4602_v63  ;;  %v836_v5 = vld [vmem:[#allocation5] sm:$0xff] }
 0x101   :  { %596 = vst.msk [vmem:[#allocation5 + $0x20] sm:$0xff] %vm213_vm3, %v574_v44  ;;  %v589_v48 = vadd.f32 %v5300_v46, %v4614_v0  ;;  %v457_v49 = vpop.f32.mrf.mxu0 }
 0x102   :  { %v583_v50 = vpop.f32.mrf.mxu1  ;;  %473 = vst.msk [vmem:[#allocation4 + $0x38] sm:$0xff] %vm213_vm3, %v463_v47  ;;  %v458_v51 = vadd.f32 %v4602_v63, %v457_v49 }
 0x103   :  { %599 = vst.msk [vmem:[#allocation5 + $0x38] sm:$0xff] %vm213_vm3, %v589_v48  ;;  %v584_v52 = vadd.f32 %v4614_v0, %v583_v50  ;;  %v697_v54 = vpop.f32.mrf.mxu0  ;;  %v928_v50 = vld [vmem:[#allocation2 + $0x8] sm:$0xff] }
 0x104   :  { %v763_v56 = vpop.f32.mrf.mxu1  ;;  %472 = vst.msk [vmem:[#allocation4 + $0x30] sm:$0xff] %vm213_vm3, %v458_v51  ;;  %v703_v57 = vadd.f32 %v697_v54, %v635_v53 }
 0x105   :  { %598 = vst.msk [vmem:[#allocation5 + $0x30] sm:$0xff] %vm213_vm3, %v584_v52  ;;  %v769_v58 = vadd.f32 %v763_v56, %v704_v55  ;;  %v5311_v59 = vpop.f32.mrf.mxu0  ;;  %v973_v52 = vld [vmem:[#allocation3 + $0x8] sm:$0xff] }
 0x106   :  { %v5323_v60 = vpop.f32.mrf.mxu1  ;;  %v4665_v61 = vmul.f32 -1.442695, %v703_v57 }
 0x107   :  { %v4664_v62 = vmul.f32 -1.442695, %v769_v58  ;;  %v700_v1 = vpop.f32.mrf.mxu0 }
 0x108   :  { %v766_v2 = vpop.f32.mrf.mxu1  ;;  %6222 = vpow2.f32 %v4665_v61 }
 0x109   :  { %6224 = vpow2.f32 %v4664_v62  ;;  %v5312_v63 = vpop.f32.mrf.mxu0  ;;  %v1015_v2 = vld [vmem:[#allocation4 + $0x8] sm:$0xff] }
 0x10a   :  { %v5324_v0 = vpop.f32.mrf.mxu1 }
 0x10b   :  { %v1057_v0 = vld [vmem:[#allocation5 + $0x8] sm:$0xff] }
 0x113   :  { %v829_v4 = vpop.f32.mrf.mxu0 }
 0x114   :  { %v895_v6 = vpop.f32.mrf.mxu1  ;;  %v835_v7 = vadd.f32 %v829_v4, %v770_v3 }
 0x115   :  { %v901_v8 = vadd.f32 %v895_v6, %v836_v5  ;;  %v6223_v9 = vpop.eup %6222  ;;  %v5335_v10 = vpop.f32.mrf.mxu0 }
 0x116   :  { %v5347_v11 = vpop.f32.mrf.mxu1  ;;  %v6225_v13 = vpop.eup %6224  ;;  %v912_v31 = vadd.f32 1.0, %v6223_v9  ;;  %6226 = vtanh.f32 %v835_v7 }
 0x117   :  { %v4666_v32 = vmul.f32 -1.442695, %v901_v8  ;;  %v905_v33 = vadd.f32 1.0, %v6225_v13  ;;  %v832_v34 = vpop.f32.mrf.mxu0 }
 0x118   :  { %v898_v35 = vpop.f32.mrf.mxu1  ;;  %6228 = vrcp.f32 %v912_v31 }
 0x119   :  { %6230 = vrcp.f32 %v905_v33  ;;  %v5336_v36 = vpop.f32.mrf.mxu0 }
 0x11a   :  { %v5348_v37 = vpop.f32.mrf.mxu1  ;;  %6232 = vpow2.f32 %v4666_v32 }
 0x123   :  { %v6227_v38 = vpop.eup %6226 }
 0x125   :  { %v6229_v39 = vpop.eup %6228 }
 0x126   :  { %v6231_v40 = vpop.eup %6230  ;;  %v916_v41 = vmul.f32 %v6229_v39, %v6227_v38 }
 0x127   :  { %v6233_v42 = vpop.eup %6232  ;;  %v908_v43 = vmul.f32 0.0, %v6231_v40 }
 0x128   :  { %v921_v44 = vadd.f32 1.0, %v6233_v42 }
 0x129   :  { %v6888_v45 = vadd.f32 %v916_v41, %v908_v43 }
 0x12a   :  { %6234 = vrcp.f32 %v921_v44 }
 0x12b   :  { %6236 = vtanh.f32 %v6888_v45 }
 0x137   :  { %v6235_v46 = vpop.eup %6234 }
 0x138   :  { %v6237_v47 = vpop.eup %6236 }
 0x139   :  { %v925_v48 = vmul.f32 %v6237_v47, %v6235_v46 }
 0x13b   :  { %926 = vst.msk [vmem:[#allocation10] sm:$0xff] %vm213_vm3, %v925_v48  ;;  %v927_v49 = vpack.c.bf16 %v925_v48, %v925_v48 }
 0x13d   :  { %5358 = vmatmul.mubr.msk.bf16.vlgmr.msra.gmra.mxu0 %vm213_vm3, %v927_v49  ;;  %5370 = vmatmul.mubr.msk.bf16.vlgmr.msra.gmra.mxu1 %vm213_vm3, %v927_v49 }
 0x13e   :  { %5374 = vmatpush3.bf16.msra.mxu0 %v6757_v22  ;;  %5386 = vmatpush3.bf16.msra.mxu1 %v6762_v23 }
 0x13f   :  { %5375 = vmatprep.subr.bf16.mxu0 %v6560_v12  ;;  %5387 = vmatprep.subr.bf16.mxu1 %v6560_v12 }
 0x140   :  { %5381 = vmatprep.mubr.msk.bf16.mxu0 %vm6561_vm2, %v6560_v12  ;;  %5393 = vmatprep.mubr.msk.bf16.mxu1 %vm6561_vm2, %v6560_v12 }
 0x142   :  { %5376 = vmatpush3.bf16.msra.mxu0 %v6777_v25  ;;  %5388 = vmatpush3.bf16.msra.mxu1 %v6782_v26 }
 0x143   :  { %5377 = vmatprep.subr.bf16.mxu0 %v6560_v12  ;;  %5389 = vmatprep.subr.bf16.mxu1 %v6560_v12 }
 0x146   :  { %5378 = vmatpush3.bf16.msra.mxu0 %v6795_v27  ;;  %5390 = vmatpush3.bf16.msra.mxu1 %v6800_v28 }
 0x147   :  { %5379 = vmatprep.subr.bf16.mxu0 %v6560_v12  ;;  %5391 = vmatprep.subr.bf16.mxu1 %v6560_v12 }
 0x14a   :  { %5380 = vmatpush3.bf16.msra.mxu0 %v6809_v29  ;;  %5392 = vmatpush3.bf16.msra.mxu1 %v6814_v30 }
 0x14b   :  { %5397 = vmatprep.subr.bf16.mxu0 %v6560_v12  ;;  %5409 = vmatprep.subr.bf16.mxu1 %v6560_v12 }
 0x14d   :  { %5382 = vmatmul.mubr.msk.bf16.vlgmr.msra.gmra.mxu0 %vm213_vm3, %v927_v49  ;;  %5394 = vmatmul.mubr.msk.bf16.vlgmr.msra.gmra.mxu1 %vm213_vm3, %v927_v49  ;;  %v1170_v49 = vld [vmem:[#allocation3 + $0x10] sm:$0xff] }
 0x14e   :  { %5398 = vmatpush3.bf16.msra.mxu0 %v6687_v14  ;;  %5410 = vmatpush3.bf16.msra.mxu1 %v6694_v15 }
 0x14f   :  { %5399 = vmatprep.subr.bf16.mxu0 %v6560_v12  ;;  %5411 = vmatprep.subr.bf16.mxu1 %v6560_v12 }
 0x150   :  { %5405 = vmatprep.mubr.msk.bf16.mxu0 %vm6561_vm2, %v6560_v12  ;;  %5417 = vmatprep.mubr.msk.bf16.mxu1 %vm6561_vm2, %v6560_v12 }
 0x152   :  { %5400 = vmatpush3.bf16.msra.mxu0 %v6699_v16  ;;  %5412 = vmatpush3.bf16.msra.mxu1 %v6704_v17 }
 0x153   :  { %5401 = vmatprep.subr.bf16.mxu0 %v6560_v12  ;;  %5413 = vmatprep.subr.bf16.mxu1 %v6560_v12 }
 0x156   :  { %5402 = vmatpush3.bf16.msra.mxu0 %v6717_v18  ;;  %5414 = vmatpush3.bf16.msra.mxu1 %v6722_v19 }
 0x157   :  { %5403 = vmatprep.subr.bf16.mxu0 %v6560_v12  ;;  %5415 = vmatprep.subr.bf16.mxu1 %v6560_v12 }
 0x15a   :  { %5404 = vmatpush3.bf16.msra.mxu0 %v6735_v20  ;;  %5416 = vmatpush3.bf16.msra.mxu1 %v6740_v21 }
 0x15b   :  { %5421 = vmatprep.subr.bf16.mxu0 %v6560_v12  ;;  %5433 = vmatprep.subr.bf16.mxu1 %v6560_v12 }
 0x1fd   :  { %v966_v51 = vpop.f32.mrf.mxu0  ;;  %v1008_v53 = vpop.f32.mrf.mxu1 }
 0x1fe   :  { %v972_v54 = vadd.f32 %v966_v51, %v928_v50  ;;  %v1014_v55 = vadd.f32 %v1008_v53, %v973_v52 }
 0x1ff   :  { %v5359_v56 = vpop.f32.mrf.mxu0  ;;  %v5371_v57 = vpop.f32.mrf.mxu1 }
 0x200   :  { %v4672_v58 = vmul.f32 -1.442695, %v972_v54  ;;  %v4671_v59 = vmul.f32 -1.442695, %v1014_v55 }
 0x201   :  { %v969_v60 = vpop.f32.mrf.mxu0  ;;  %v1011_v61 = vpop.f32.mrf.mxu1 }
 0x202   :  { %6238 = vpow2.f32 %v4672_v58  ;;  %v1212_v61 = vld [vmem:[#allocation4 + $0x10] sm:$0xff] }
 0x203   :  { %6240 = vpow2.f32 %v4671_v59  ;;  %v5360_v62 = vpop.f32.mrf.mxu0  ;;  %v5372_v1 = vpop.f32.mrf.mxu1 }
 0x204   :  { %v1254_v1 = vld [vmem:[#allocation5 + $0x10] sm:$0xff] }
 0x20d   :  { %v1050_v63 = vpop.f32.mrf.mxu0  ;;  %v1092_v3 = vpop.f32.mrf.mxu1 }
 0x20e   :  { %v1056_v4 = vadd.f32 %v1050_v63, %v1015_v2  ;;  %v1098_v5 = vadd.f32 %v1092_v3, %v1057_v0 }
 0x20f   :  { %v6239_v6 = vpop.eup %6238  ;;  %v5383_v7 = vpop.f32.mrf.mxu0 }
 0x210   :  { %v5395_v8 = vpop.f32.mrf.mxu1  ;;  %v6241_v9 = vpop.eup %6240  ;;  %v1109_v10 = vadd.f32 1.0, %v6239_v6  ;;  %v4673_v11 = vmul.f32 -1.442695, %v1098_v5  ;;  %6242 = vtanh.f32 %v1056_v4 }
 0x211   :  { %v1102_v13 = vadd.f32 1.0, %v6241_v9  ;;  %v1053_v31 = vpop.f32.mrf.mxu0 }
 0x212   :  { %v1095_v32 = vpop.f32.mrf.mxu1  ;;  %6244 = vrcp.f32 %v1109_v10 }
 0x213   :  { %6246 = vrcp.f32 %v1102_v13  ;;  %v5384_v33 = vpop.f32.mrf.mxu0 }
 0x214   :  { %v5396_v34 = vpop.f32.mrf.mxu1  ;;  %6248 = vpow2.f32 %v4673_v11 }
 0x21d   :  { %v6243_v35 = vpop.eup %6242 }
 0x21f   :  { %v6245_v36 = vpop.eup %6244 }
 0x220   :  { %v6247_v37 = vpop.eup %6246  ;;  %v1113_v38 = vmul.f32 %v6245_v36, %v6243_v35 }
 0x221   :  { %v6249_v39 = vpop.eup %6248  ;;  %v1105_v40 = vmul.f32 %v6247_v37, %v6888_v45  ;;  %v1125_v45 = vld [vmem:[#allocation2 + $0x10] sm:$0xff] }
 0x222   :  { %v1118_v41 = vadd.f32 1.0, %v6249_v39 }
 0x223   :  { %v6937_v42 = vadd.f32 %v1113_v38, %v1105_v40 }
 0x224   :  { %6250 = vrcp.f32 %v1118_v41 }
 0x225   :  { %6252 = vtanh.f32 %v6937_v42 }
 0x231   :  { %v6251_v43 = vpop.eup %6250 }
 0x232   :  { %v6253_v44 = vpop.eup %6252 }
 0x233   :  { %v1122_v46 = vmul.f32 %v6253_v44, %v6251_v43 }
 0x235   :  { %1123 = vst.msk [vmem:[#allocation10 + $0x8] sm:$0xff] %vm213_vm3, %v1122_v46  ;;  %v1124_v47 = vpack.c.bf16 %v1122_v46, %v1122_v46 }
 0x237   :  { %5406 = vmatmul.mubr.msk.bf16.vlgmr.msra.gmra.mxu0 %vm213_vm3, %v1124_v47  ;;  %5418 = vmatmul.mubr.msk.bf16.vlgmr.msra.gmra.mxu1 %vm213_vm3, %v1124_v47 }
 0x238   :  { %5422 = vmatpush3.bf16.msra.mxu0 %v6757_v22  ;;  %5434 = vmatpush3.bf16.msra.mxu1 %v6762_v23 }
 0x239   :  { %5423 = vmatprep.subr.bf16.mxu0 %v6560_v12  ;;  %5435 = vmatprep.subr.bf16.mxu1 %v6560_v12 }
 0x23a   :  { %5429 = vmatprep.mubr.msk.bf16.mxu0 %vm6561_vm2, %v6560_v12  ;;  %5441 = vmatprep.mubr.msk.bf16.mxu1 %vm6561_vm2, %v6560_v12 }
 0x23c   :  { %5424 = vmatpush3.bf16.msra.mxu0 %v6777_v25  ;;  %5436 = vmatpush3.bf16.msra.mxu1 %v6782_v26 }
 0x23d   :  { %5425 = vmatprep.subr.bf16.mxu0 %v6560_v12  ;;  %5437 = vmatprep.subr.bf16.mxu1 %v6560_v12 }
 0x240   :  { %5426 = vmatpush3.bf16.msra.mxu0 %v6795_v27  ;;  %5438 = vmatpush3.bf16.msra.mxu1 %v6800_v28 }
 0x241   :  { %5427 = vmatprep.subr.bf16.mxu0 %v6560_v12  ;;  %5439 = vmatprep.subr.bf16.mxu1 %v6560_v12 }
 0x244   :  { %5428 = vmatpush3.bf16.msra.mxu0 %v6809_v29  ;;  %5440 = vmatpush3.bf16.msra.mxu1 %v6814_v30 }
 0x245   :  { %5445 = vmatprep.subr.bf16.mxu0 %v6560_v12  ;;  %5457 = vmatprep.subr.bf16.mxu1 %v6560_v12 }
 0x247   :  { %5430 = vmatmul.mubr.msk.bf16.vlgmr.msra.gmra.mxu0 %vm213_vm3, %v1124_v47  ;;  %5442 = vmatmul.mubr.msk.bf16.vlgmr.msra.gmra.mxu1 %vm213_vm3, %v1124_v47 }
 0x248   :  { %5446 = vmatpush3.bf16.msra.mxu0 %v6687_v14  ;;  %5458 = vmatpush3.bf16.msra.mxu1 %v6694_v15 }
 0x249   :  { %5447 = vmatprep.subr.bf16.mxu0 %v6560_v12  ;;  %5459 = vmatprep.subr.bf16.mxu1 %v6560_v12 }
 0x24a   :  { %5453 = vmatprep.mubr.msk.bf16.mxu0 %vm6561_vm2, %v6560_v12  ;;  %5465 = vmatprep.mubr.msk.bf16.mxu1 %vm6561_vm2, %v6560_v12 }
 0x24c   :  { %5448 = vmatpush3.bf16.msra.mxu0 %v6699_v16  ;;  %5460 = vmatpush3.bf16.msra.mxu1 %v6704_v17 }
 0x24d   :  { %5449 = vmatprep.subr.bf16.mxu0 %v6560_v12  ;;  %5461 = vmatprep.subr.bf16.mxu1 %v6560_v12 }
 0x250   :  { %5450 = vmatpush3.bf16.msra.mxu0 %v6717_v18  ;;  %5462 = vmatpush3.bf16.msra.mxu1 %v6722_v19 }
 0x251   :  { %5451 = vmatprep.subr.bf16.mxu0 %v6560_v12  ;;  %5463 = vmatprep.subr.bf16.mxu1 %v6560_v12 }
 0x254   :  { %5452 = vmatpush3.bf16.msra.mxu0 %v6735_v20  ;;  %5464 = vmatpush3.bf16.msra.mxu1 %v6740_v21 }
 0x255   :  { %5469 = vmatprep.subr.bf16.mxu0 %v6560_v12  ;;  %5481 = vmatprep.subr.bf16.mxu1 %v6560_v12 }
 0x2f7   :  { %v1163_v48 = vpop.f32.mrf.mxu0  ;;  %v1205_v50 = vpop.f32.mrf.mxu1 }
 0x2f8   :  { %v1169_v51 = vadd.f32 %v1163_v48, %v1125_v45  ;;  %v1211_v52 = vadd.f32 %v1205_v50, %v1170_v49  ;;  %v1409_v50 = vld [vmem:[#allocation4 + $0x18] sm:$0xff] }
 0x2f9   :  { %v5407_v53 = vpop.f32.mrf.mxu0  ;;  %v5419_v54 = vpop.f32.mrf.mxu1 }
 0x2fa   :  { %v4679_v55 = vmul.f32 -1.442695, %v1169_v51  ;;  %v4678_v56 = vmul.f32 -1.442695, %v1211_v52  ;;  %v1451_v52 = vld [vmem:[#allocation5 + $0x18] sm:$0xff] }
 0x2fb   :  { %v1166_v57 = vpop.f32.mrf.mxu0  ;;  %v1208_v58 = vpop.f32.mrf.mxu1 }
 0x2fc   :  { %6254 = vpow2.f32 %v4679_v55 }
 0x2fd   :  { %6256 = vpow2.f32 %v4678_v56  ;;  %v5408_v59 = vpop.f32.mrf.mxu0  ;;  %v5420_v60 = vpop.f32.mrf.mxu1 }
 0x307   :  { %v1247_v62 = vpop.f32.mrf.mxu0  ;;  %v1289_v2 = vpop.f32.mrf.mxu1 }
 0x308   :  { %v1253_v63 = vadd.f32 %v1247_v62, %v1212_v61  ;;  %v1295_v0 = vadd.f32 %v1289_v2, %v1254_v1 }
 0x309   :  { %v6255_v3 = vpop.eup %6254  ;;  %v5431_v4 = vpop.f32.mrf.mxu0 }
 0x30a   :  { %v5443_v5 = vpop.f32.mrf.mxu1  ;;  %v6257_v6 = vpop.eup %6256  ;;  %v1306_v7 = vadd.f32 1.0, %v6255_v3  ;;  %v4680_v8 = vmul.f32 -1.442695, %v1295_v0  ;;  %6258 = vtanh.f32 %v1253_v63 }
 0x30b   :  { %v1299_v9 = vadd.f32 1.0, %v6257_v6  ;;  %v1250_v10 = vpop.f32.mrf.mxu0 }
 0x30c   :  { %v1292_v11 = vpop.f32.mrf.mxu1  ;;  %6260 = vrcp.f32 %v1306_v7 }
 0x30d   :  { %6262 = vrcp.f32 %v1299_v9  ;;  %v5432_v13 = vpop.f32.mrf.mxu0 }
 0x30e   :  { %v5444_v31 = vpop.f32.mrf.mxu1  ;;  %6264 = vpow2.f32 %v4680_v8 }
 0x317   :  { %v6259_v32 = vpop.eup %6258 }
 0x319   :  { %v6261_v33 = vpop.eup %6260 }
 0x31a   :  { %v6263_v34 = vpop.eup %6262  ;;  %v1310_v35 = vmul.f32 %v6261_v33, %v6259_v32  ;;  %v1519_v33 = vld [vmem:[#allocation2 + $0x20] sm:$0xff] }
 0x31b   :  { %v6265_v36 = vpop.eup %6264  ;;  %v1302_v37 = vmul.f32 %v6263_v34, %v6937_v42 }
 0x31c   :  { %v1315_v38 = vadd.f32 1.0, %v6265_v36 }
 0x31d   :  { %v6986_v39 = vadd.f32 %v1310_v35, %v1302_v37  ;;  %v1564_v35 = vld [vmem:[#allocation3 + $0x20] sm:$0xff] }
 0x31e   :  { %6266 = vrcp.f32 %v1315_v38 }
 0x31f   :  { %6268 = vtanh.f32 %v6986_v39 }
 0x32b   :  { %v6267_v40 = vpop.eup %6266 }
 0x32c   :  { %v6269_v41 = vpop.eup %6268 }
 0x32d   :  { %v1319_v43 = vmul.f32 %v6269_v41, %v6267_v40 }
 0x32f   :  { %1320 = vst.msk [vmem:[#allocation10 + $0x10] sm:$0xff] %vm213_vm3, %v1319_v43  ;;  %v1321_v44 = vpack.c.bf16 %v1319_v43, %v1319_v43 }
 0x331   :  { %5454 = vmatmul.mubr.msk.bf16.vlgmr.msra.gmra.mxu0 %vm213_vm3, %v1321_v44  ;;  %5466 = vmatmul.mubr.msk.bf16.vlgmr.msra.gmra.mxu1 %vm213_vm3, %v1321_v44 }
 0x332   :  { %5470 = vmatpush3.bf16.msra.mxu0 %v6757_v22  ;;  %5482 = vmatpush3.bf16.msra.mxu1 %v6762_v23 }
 0x333   :  { %5471 = vmatprep.subr.bf16.mxu0 %v6560_v12  ;;  %5483 = vmatprep.subr.bf16.mxu1 %v6560_v12 }
 0x334   :  { %5477 = vmatprep.mubr.msk.bf16.mxu0 %vm6561_vm2, %v6560_v12  ;;  %5489 = vmatprep.mubr.msk.bf16.mxu1 %vm6561_vm2, %v6560_v12 }
 0x336   :  { %5472 = vmatpush3.bf16.msra.mxu0 %v6777_v25  ;;  %5484 = vmatpush3.bf16.msra.mxu1 %v6782_v26 }
 0x337   :  { %5473 = vmatprep.subr.bf16.mxu0 %v6560_v12  ;;  %5485 = vmatprep.subr.bf16.mxu1 %v6560_v12 }
 0x33a   :  { %5474 = vmatpush3.bf16.msra.mxu0 %v6795_v27  ;;  %5486 = vmatpush3.bf16.msra.mxu1 %v6800_v28 }
 0x33b   :  { %5475 = vmatprep.subr.bf16.mxu0 %v6560_v12  ;;  %5487 = vmatprep.subr.bf16.mxu1 %v6560_v12 }
 0x33e   :  { %5476 = vmatpush3.bf16.msra.mxu0 %v6809_v29  ;;  %5488 = vmatpush3.bf16.msra.mxu1 %v6814_v30 }
 0x33f   :  { %5493 = vmatprep.subr.bf16.mxu0 %v6560_v12  ;;  %5505 = vmatprep.subr.bf16.mxu1 %v6560_v12 }
 0x341   :  { %5478 = vmatmul.mubr.msk.bf16.vlgmr.msra.gmra.mxu0 %vm213_vm3, %v1321_v44  ;;  %5490 = vmatmul.mubr.msk.bf16.vlgmr.msra.gmra.mxu1 %vm213_vm3, %v1321_v44 }
 0x342   :  { %5494 = vmatpush3.bf16.msra.mxu0 %v6687_v14  ;;  %5506 = vmatpush3.bf16.msra.mxu1 %v6694_v15  ;;  %v1322_v14 = vld [vmem:[#allocation2 + $0x18] sm:$0xff] }
 0x343   :  { %5495 = vmatprep.subr.bf16.mxu0 %v6560_v12  ;;  %5507 = vmatprep.subr.bf16.mxu1 %v6560_v12 }
 0x344   :  { %5501 = vmatprep.mubr.msk.bf16.mxu0 %vm6561_vm2, %v6560_v12  ;;  %5513 = vmatprep.mubr.msk.bf16.mxu1 %vm6561_vm2, %v6560_v12 }
 0x346   :  { %5496 = vmatpush3.bf16.msra.mxu0 %v6699_v16  ;;  %5508 = vmatpush3.bf16.msra.mxu1 %v6704_v17  ;;  %v1367_v16 = vld [vmem:[#allocation3 + $0x18] sm:$0xff] }
 0x347   :  { %5497 = vmatprep.subr.bf16.mxu0 %v6560_v12  ;;  %5509 = vmatprep.subr.bf16.mxu1 %v6560_v12 }
 0x34a   :  { %5498 = vmatpush3.bf16.msra.mxu0 %v6717_v18  ;;  %5510 = vmatpush3.bf16.msra.mxu1 %v6722_v19 }
 0x34b   :  { %5499 = vmatprep.subr.bf16.mxu0 %v6560_v12  ;;  %5511 = vmatprep.subr.bf16.mxu1 %v6560_v12 }
 0x34e   :  { %5500 = vmatpush3.bf16.msra.mxu0 %v6735_v20  ;;  %5512 = vmatpush3.bf16.msra.mxu1 %v6740_v21 }
 0x34f   :  { %5517 = vmatprep.subr.bf16.mxu0 %v6560_v12  ;;  %5529 = vmatprep.subr.bf16.mxu1 %v6560_v12 }
 0x3f1   :  { %v1360_v15 = vpop.f32.mrf.mxu0  ;;  %v1402_v17 = vpop.f32.mrf.mxu1 }
 0x3f2   :  { %v1366_v42 = vadd.f32 %v1360_v15, %v1322_v14  ;;  %v1408_v18 = vadd.f32 %v1402_v17, %v1367_v16  ;;  %v1606_v17 = vld [vmem:[#allocation4 + $0x20] sm:$0xff] }
 0x3f3   :  { %v5455_v46 = vpop.f32.mrf.mxu0  ;;  %v5467_v19 = vpop.f32.mrf.mxu1 }
 0x3f4   :  { %v4686_v47 = vmul.f32 -1.442695, %v1366_v42  ;;  %v4685_v45 = vmul.f32 -1.442695, %v1408_v18  ;;  %v1648_v18 = vld [vmem:[#allocation5 + $0x20] sm:$0xff] }
 0x3f5   :  { %v1363_v48 = vpop.f32.mrf.mxu0  ;;  %v1405_v49 = vpop.f32.mrf.mxu1 }
 0x3f6   :  { %6270 = vpow2.f32 %v4686_v47 }
 0x3f7   :  { %6272 = vpow2.f32 %v4685_v45  ;;  %v5456_v20 = vpop.f32.mrf.mxu0  ;;  %v5468_v21 = vpop.f32.mrf.mxu1 }
 0x401   :  { %v1444_v51 = vpop.f32.mrf.mxu0  ;;  %v1486_v53 = vpop.f32.mrf.mxu1 }
 0x402   :  { %v1450_v54 = vadd.f32 %v1444_v51, %v1409_v50  ;;  %v1492_v55 = vadd.f32 %v1486_v53, %v1451_v52 }
 0x403   :  { %v6271_v56 = vpop.eup %6270  ;;  %v5479_v57 = vpop.f32.mrf.mxu0 }
 0x404   :  { %v5491_v58 = vpop.f32.mrf.mxu1  ;;  %v6273_v59 = vpop.eup %6272  ;;  %v1503_v60 = vadd.f32 1.0, %v6271_v56  ;;  %v4687_v61 = vmul.f32 -1.442695, %v1492_v55  ;;  %6274 = vtanh.f32 %v1450_v54 }
 0x405   :  { %v1496_v62 = vadd.f32 1.0, %v6273_v59  ;;  %v1447_v1 = vpop.f32.mrf.mxu0 }
 0x406   :  { %v1489_v2 = vpop.f32.mrf.mxu1  ;;  %6276 = vrcp.f32 %v1503_v60 }
 0x407   :  { %6278 = vrcp.f32 %v1496_v62  ;;  %v5480_v63 = vpop.f32.mrf.mxu0 }
 0x408   :  { %v5492_v0 = vpop.f32.mrf.mxu1  ;;  %6280 = vpow2.f32 %v4687_v61 }
 0x411   :  { %v6275_v3 = vpop.eup %6274 }
 0x413   :  { %v6277_v4 = vpop.eup %6276 }
 0x414   :  { %v6279_v5 = vpop.eup %6278  ;;  %v1507_v6 = vmul.f32 %v6277_v4, %v6275_v3  ;;  %v7133_v4 = vld [vmem:[%s7881_s2 + $0x58] sm:$0xff]  }
 0x415   :  { %v6281_v7 = vpop.eup %6280  ;;  %v1499_v8 = vmul.f32 %v6279_v5, %v6986_v39  ;;  %v7139_v5 = vld [vmem:[%s7881_s2 + $0x78] sm:$0xff]  }
 0x416   :  { %v1512_v9 = vadd.f32 1.0, %v6281_v7  ;;  %v7157_v7 = vld [vmem:[%s7881_s2 + $0x70] sm:$0xff]  }
 0x417   :  { %v7035_v10 = vadd.f32 %v1507_v6, %v1499_v8  ;;  %v7151_v6 = vld [vmem:[%s7881_s2 + $0x50] sm:$0xff]   ;;  %v7165_v8 = vld [vmem:[%s7881_s2 + $0x48] sm:$0xff]  }
 0x418   :  { %6282 = vrcp.f32 %v1512_v9  ;;  %v7171_v9 = vld [vmem:[%s7881_s2 + $0x68] sm:$0xff]  }
 0x419   :  { %6284 = vtanh.f32 %v7035_v10 }
 0x425   :  { %v6283_v11 = vpop.eup %6282 }
 0x426   :  { %v6285_v13 = vpop.eup %6284 }
 0x427   :  { %v1516_v31 = vmul.f32 %v6285_v13, %v6283_v11  ;;  %v7185_v11 = vld [vmem:[%s7881_s2 + $0x60] sm:$0xff]   ;;  %v1716_v13 = vld [vmem:[#allocation2 + $0x28] sm:$0xff] }
 0x429   :  { %1517 = vst.msk [vmem:[#allocation10 + $0x18] sm:$0xff] %vm213_vm3, %v1516_v31  ;;  %v1518_v32 = vpack.c.bf16 %v1516_v31, %v1516_v31 }
 0x42b   :  { %5502 = vmatmul.mubr.msk.bf16.vlgmr.msra.gmra.mxu0 %vm213_vm3, %v1518_v32  ;;  %5514 = vmatmul.mubr.msk.bf16.vlgmr.msra.gmra.mxu1 %vm213_vm3, %v1518_v32 }
 0x42c   :  { %5518 = vmatpush3.bf16.msra.mxu0 %v6757_v22  ;;  %5530 = vmatpush3.bf16.msra.mxu1 %v6762_v23  ;;  %v7066_v22 = vld [vmem:[%s7881_s2 + $0x18] sm:$0xff]  }
 0x42d   :  { %5519 = vmatprep.subr.bf16.mxu0 %v6560_v12  ;;  %5531 = vmatprep.subr.bf16.mxu1 %v6560_v12  ;;  %v7072_v23 = vld [vmem:[%s7881_s2 + $0x38] sm:$0xff]  }
 0x42e   :  { %5525 = vmatprep.mubr.msk.bf16.mxu0 %vm6561_vm2, %v6560_v12  ;;  %5537 = vmatprep.mubr.msk.bf16.mxu1 %vm6561_vm2, %v6560_v12 }
 0x430   :  { %5520 = vmatpush3.bf16.msra.mxu0 %v6777_v25  ;;  %5532 = vmatpush3.bf16.msra.mxu1 %v6782_v26  ;;  %v7084_v25 = vld [vmem:[%s7881_s2 + $0x10] sm:$0xff]  }
 0x431   :  { %5521 = vmatprep.subr.bf16.mxu0 %v6560_v12  ;;  %5533 = vmatprep.subr.bf16.mxu1 %v6560_v12  ;;  %v7090_v26 = vld [vmem:[%s7881_s2 + $0x30] sm:$0xff]  }
 0x434   :  { %5522 = vmatpush3.bf16.msra.mxu0 %v6795_v27  ;;  %5534 = vmatpush3.bf16.msra.mxu1 %v6800_v28  ;;  %v7098_v27 = vld [vmem:[%s7881_s2 + $0x8] sm:$0xff]  }
 0x435   :  { %5523 = vmatprep.subr.bf16.mxu0 %v6560_v12  ;;  %5535 = vmatprep.subr.bf16.mxu1 %v6560_v12  ;;  %v7104_v28 = vld [vmem:[%s7881_s2 + $0x28] sm:$0xff]  }
 0x438   :  { %5524 = vmatpush3.bf16.msra.mxu0 %v6809_v29  ;;  %5536 = vmatpush3.bf16.msra.mxu1 %v6814_v30  ;;  %v7112_v29 = vld [vmem:[%s7881_s2] sm:$0xff]  }
 0x439   :  { %5541 = vmatprep.subr.bf16.mxu0 %v6560_v12  ;;  %5553 = vmatprep.subr.bf16.mxu1 %v6560_v12  ;;  %v7118_v30 = vld [vmem:[%s7881_s2 + $0x20] sm:$0xff]  }
 0x43b   :  { %5526 = vmatmul.mubr.msk.bf16.vlgmr.msra.gmra.mxu0 %vm213_vm3, %v1518_v32  ;;  %5538 = vmatmul.mubr.msk.bf16.vlgmr.msra.gmra.mxu1 %vm213_vm3, %v1518_v32  ;;  %v1761_v32 = vld [vmem:[#allocation3 + $0x28] sm:$0xff] }
 0x43c   :  { %5542 = vmatpush3.bf16.msra.mxu0 %v7066_v22  ;;  %5554 = vmatpush3.bf16.msra.mxu1 %v7072_v23 }
 0x43d   :  { %5543 = vmatprep.subr.bf16.mxu0 %v6560_v12  ;;  %5555 = vmatprep.subr.bf16.mxu1 %v6560_v12 }
 0x43e   :  { %5549 = vmatprep.mubr.msk.bf16.mxu0 %vm6561_vm2, %v6560_v12  ;;  %5561 = vmatprep.mubr.msk.bf16.mxu1 %vm6561_vm2, %v6560_v12 }
 0x440   :  { %5544 = vmatpush3.bf16.msra.mxu0 %v7084_v25  ;;  %5556 = vmatpush3.bf16.msra.mxu1 %v7090_v26 }
 0x441   :  { %5545 = vmatprep.subr.bf16.mxu0 %v6560_v12  ;;  %5557 = vmatprep.subr.bf16.mxu1 %v6560_v12 }
 0x444   :  { %5546 = vmatpush3.bf16.msra.mxu0 %v7098_v27  ;;  %5558 = vmatpush3.bf16.msra.mxu1 %v7104_v28 }
 0x445   :  { %5547 = vmatprep.subr.bf16.mxu0 %v6560_v12  ;;  %5559 = vmatprep.subr.bf16.mxu1 %v6560_v12 }
 0x448   :  { %5548 = vmatpush3.bf16.msra.mxu0 %v7112_v29  ;;  %5560 = vmatpush3.bf16.msra.mxu1 %v7118_v30 }
 0x449   :  { %5565 = vmatprep.subr.bf16.mxu0 %v6560_v12  ;;  %5577 = vmatprep.subr.bf16.mxu1 %v6560_v12 }
 0x4eb   :  { %v1557_v34 = vpop.f32.mrf.mxu0  ;;  %v1599_v36 = vpop.f32.mrf.mxu1 }
 0x4ec   :  { %v1563_v37 = vadd.f32 %v1557_v34, %v1519_v33  ;;  %v1605_v38 = vadd.f32 %v1599_v36, %v1564_v35 }
 0x4ed   :  { %v5503_v39 = vpop.f32.mrf.mxu0  ;;  %v5515_v40 = vpop.f32.mrf.mxu1 }
 0x4ee   :  { %v4693_v41 = vmul.f32 -1.442695, %v1563_v37  ;;  %v4692_v43 = vmul.f32 -1.442695, %v1605_v38 }
 0x4ef   :  { %v1560_v44 = vpop.f32.mrf.mxu0  ;;  %v1602_v14 = vpop.f32.mrf.mxu1 }
 0x4f0   :  { %6286 = vpow2.f32 %v4693_v41  ;;  %v1803_v14 = vld [vmem:[#allocation4 + $0x28] sm:$0xff] }
 0x4f1   :  { %6288 = vpow2.f32 %v4692_v43  ;;  %v5504_v15 = vpop.f32.mrf.mxu0  ;;  %v5516_v16 = vpop.f32.mrf.mxu1 }
 0x4f2   :  { %v1845_v16 = vld [vmem:[#allocation5 + $0x28] sm:$0xff] }
 0x4fb   :  { %v1641_v42 = vpop.f32.mrf.mxu0  ;;  %v1683_v46 = vpop.f32.mrf.mxu1 }
 0x4fc   :  { %v1647_v19 = vadd.f32 %v1641_v42, %v1606_v17  ;;  %v1689_v47 = vadd.f32 %v1683_v46, %v1648_v18 }
 0x4fd   :  { %v6287_v45 = vpop.eup %6286  ;;  %v5527_v48 = vpop.f32.mrf.mxu0 }
 0x4fe   :  { %v5539_v49 = vpop.f32.mrf.mxu1  ;;  %v6289_v20 = vpop.eup %6288  ;;  %v1700_v21 = vadd.f32 1.0, %v6287_v45  ;;  %v4694_v50 = vmul.f32 -1.442695, %v1689_v47  ;;  %6290 = vtanh.f32 %v1647_v19 }
 0x4ff   :  { %v1693_v51 = vadd.f32 1.0, %v6289_v20  ;;  %v1644_v52 = vpop.f32.mrf.mxu0 }
 0x500   :  { %v1686_v53 = vpop.f32.mrf.mxu1  ;;  %6292 = vrcp.f32 %v1700_v21 }
 0x501   :  { %6294 = vrcp.f32 %v1693_v51  ;;  %v5528_v54 = vpop.f32.mrf.mxu0 }
 0x502   :  { %v5540_v55 = vpop.f32.mrf.mxu1  ;;  %6296 = vpow2.f32 %v4694_v50 }
 0x50b   :  { %v6291_v56 = vpop.eup %6290 }
 0x50d   :  { %v6293_v57 = vpop.eup %6292 }
 0x50e   :  { %v6295_v58 = vpop.eup %6294  ;;  %v1704_v59 = vmul.f32 %v6293_v57, %v6291_v56 }
 0x50f   :  { %v6297_v60 = vpop.eup %6296  ;;  %v1696_v61 = vmul.f32 %v6295_v58, %v7035_v10  ;;  %v7179_v10 = vld [vmem:[%s7881_s2 + $0x40] sm:$0xff]  }
 0x510   :  { %v1709_v62 = vadd.f32 1.0, %v6297_v60 }
 0x511   :  { %v7124_v1 = vadd.f32 %v1704_v59, %v1696_v61 }
 0x512   :  { %6298 = vrcp.f32 %v1709_v62 }
 0x513   :  { %6300 = vtanh.f32 %v7124_v1 }
 0x51f   :  { %v6299_v2 = vpop.eup %6298 }
 0x520   :  { %v6301_v63 = vpop.eup %6300 }
 0x521   :  { %v1713_v0 = vmul.f32 %v6301_v63, %v6299_v2 }
 0x523   :  { %1714 = vst.msk [vmem:[#allocation10 + $0x20] sm:$0xff] %vm213_vm3, %v1713_v0  ;;  %v1715_v3 = vpack.c.bf16 %v1713_v0, %v1713_v0 }
 0x525   :  { %5550 = vmatmul.mubr.msk.bf16.vlgmr.msra.gmra.mxu0 %vm213_vm3, %v1715_v3  ;;  %5562 = vmatmul.mubr.msk.bf16.vlgmr.msra.gmra.mxu1 %vm213_vm3, %v1715_v3 }
 0x526   :  { %5566 = vmatpush3.bf16.msra.mxu0 %v7133_v4  ;;  %5578 = vmatpush3.bf16.msra.mxu1 %v7139_v5 }
 0x527   :  { %5567 = vmatprep.subr.bf16.mxu0 %v6560_v12  ;;  %5579 = vmatprep.subr.bf16.mxu1 %v6560_v12 }
 0x528   :  { %5573 = vmatprep.mubr.msk.bf16.mxu0 %vm6561_vm2, %v6560_v12  ;;  %5585 = vmatprep.mubr.msk.bf16.mxu1 %vm6561_vm2, %v6560_v12 }
 0x52a   :  { %5568 = vmatpush3.bf16.msra.mxu0 %v7151_v6  ;;  %5580 = vmatpush3.bf16.msra.mxu1 %v7157_v7 }
 0x52b   :  { %5569 = vmatprep.subr.bf16.mxu0 %v6560_v12  ;;  %5581 = vmatprep.subr.bf16.mxu1 %v6560_v12 }
 0x52e   :  { %5570 = vmatpush3.bf16.msra.mxu0 %v7165_v8  ;;  %5582 = vmatpush3.bf16.msra.mxu1 %v7171_v9 }
 0x52f   :  { %5571 = vmatprep.subr.bf16.mxu0 %v6560_v12  ;;  %5583 = vmatprep.subr.bf16.mxu1 %v6560_v12 }
 0x532   :  { %5572 = vmatpush3.bf16.msra.mxu0 %v7179_v10  ;;  %5584 = vmatpush3.bf16.msra.mxu1 %v7185_v11 }
 0x533   :  { %5589 = vmatprep.subr.bf16.mxu0 %v6560_v12  ;;  %5601 = vmatprep.subr.bf16.mxu1 %v6560_v12 }
 0x535   :  { %5574 = vmatmul.mubr.msk.bf16.vlgmr.msra.gmra.mxu0 %vm213_vm3, %v1715_v3  ;;  %5586 = vmatmul.mubr.msk.bf16.vlgmr.msra.gmra.mxu1 %vm213_vm3, %v1715_v3 }
 0x536   :  { %5590 = vmatpush3.bf16.msra.mxu0 %v7066_v22  ;;  %5602 = vmatpush3.bf16.msra.mxu1 %v7072_v23 }
 0x537   :  { %5591 = vmatprep.subr.bf16.mxu0 %v6560_v12  ;;  %5603 = vmatprep.subr.bf16.mxu1 %v6560_v12 }
 0x538   :  { %5597 = vmatprep.mubr.msk.bf16.mxu0 %vm6561_vm2, %v6560_v12  ;;  %5609 = vmatprep.mubr.msk.bf16.mxu1 %vm6561_vm2, %v6560_v12 }
 0x53a   :  { %5592 = vmatpush3.bf16.msra.mxu0 %v7084_v25  ;;  %5604 = vmatpush3.bf16.msra.mxu1 %v7090_v26 }
 0x53b   :  { %5593 = vmatprep.subr.bf16.mxu0 %v6560_v12  ;;  %5605 = vmatprep.subr.bf16.mxu1 %v6560_v12 }
 0x53e   :  { %5594 = vmatpush3.bf16.msra.mxu0 %v7098_v27  ;;  %5606 = vmatpush3.bf16.msra.mxu1 %v7104_v28 }
 0x53f   :  { %5595 = vmatprep.subr.bf16.mxu0 %v6560_v12  ;;  %5607 = vmatprep.subr.bf16.mxu1 %v6560_v12 }
 0x542   :  { %5596 = vmatpush3.bf16.msra.mxu0 %v7112_v29  ;;  %5608 = vmatpush3.bf16.msra.mxu1 %v7118_v30 }
 0x543   :  { %5613 = vmatprep.subr.bf16.mxu0 %v6560_v12  ;;  %5625 = vmatprep.subr.bf16.mxu1 %v6560_v12 }
 0x5e5   :  { %v1754_v31 = vpop.f32.mrf.mxu0  ;;  %v1796_v33 = vpop.f32.mrf.mxu1 }
 0x5e6   :  { %v1760_v34 = vadd.f32 %v1754_v31, %v1716_v13  ;;  %v1802_v35 = vadd.f32 %v1796_v33, %v1761_v32  ;;  %v2000_v33 = vld [vmem:[#allocation4 + $0x30] sm:$0xff] }
 0x5e7   :  { %v5551_v36 = vpop.f32.mrf.mxu0  ;;  %v5563_v37 = vpop.f32.mrf.mxu1 }
 0x5e8   :  { %v4700_v38 = vmul.f32 -1.442695, %v1760_v34  ;;  %v4699_v39 = vmul.f32 -1.442695, %v1802_v35  ;;  %v2042_v35 = vld [vmem:[#allocation5 + $0x30] sm:$0xff] }
 0x5e9   :  { %v1757_v40 = vpop.f32.mrf.mxu0  ;;  %v1799_v41 = vpop.f32.mrf.mxu1 }
 0x5ea   :  { %6302 = vpow2.f32 %v4700_v38 }
 0x5eb   :  { %6304 = vpow2.f32 %v4699_v39  ;;  %v5552_v43 = vpop.f32.mrf.mxu0  ;;  %v5564_v44 = vpop.f32.mrf.mxu1 }
 0x5f5   :  { %v1838_v15 = vpop.f32.mrf.mxu0  ;;  %v1880_v17 = vpop.f32.mrf.mxu1 }
 0x5f6   :  { %v1844_v42 = vadd.f32 %v1838_v15, %v1803_v14  ;;  %v1886_v18 = vadd.f32 %v1880_v17, %v1845_v16 }
 0x5f7   :  { %v6303_v46 = vpop.eup %6302  ;;  %v5575_v19 = vpop.f32.mrf.mxu0 }
 0x5f8   :  { %v5587_v47 = vpop.f32.mrf.mxu1  ;;  %v6305_v45 = vpop.eup %6304  ;;  %v1897_v48 = vadd.f32 1.0, %v6303_v46  ;;  %v4701_v49 = vmul.f32 -1.442695, %v1886_v18  ;;  %6306 = vtanh.f32 %v1844_v42 }
 0x5f9   :  { %v1890_v20 = vadd.f32 1.0, %v6305_v45  ;;  %v1841_v21 = vpop.f32.mrf.mxu0 }
 0x5fa   :  { %v1883_v50 = vpop.f32.mrf.mxu1  ;;  %6308 = vrcp.f32 %v1897_v48 }
 0x5fb   :  { %6310 = vrcp.f32 %v1890_v20  ;;  %v5576_v51 = vpop.f32.mrf.mxu0 }
 0x5fc   :  { %v5588_v52 = vpop.f32.mrf.mxu1  ;;  %6312 = vpow2.f32 %v4701_v49 }
 0x605   :  { %v6307_v53 = vpop.eup %6306 }
 0x607   :  { %v6309_v54 = vpop.eup %6308 }
 0x608   :  { %v6311_v55 = vpop.eup %6310  ;;  %v1901_v56 = vmul.f32 %v6309_v54, %v6307_v53  ;;  %v2471_v54 = vld [vmem:[#allocation12 + $0x60] sm:$0xff] }
 0x609   :  { %v6313_v57 = vpop.eup %6312  ;;  %v1893_v58 = vmul.f32 %v6311_v55, %v7124_v1  ;;  %v2317_v55 = vld [vmem:[#allocation12 + $0x18] sm:$0xff] }
 0x60a   :  { %v1906_v59 = vadd.f32 1.0, %v6313_v57  ;;  %v2316_v57 = vld [vmem:[#allocation12 + $0x10] sm:$0xff] }
 0x60b   :  { %v7213_v60 = vadd.f32 %v1901_v56, %v1893_v58  ;;  %v2470_v56 = vld [vmem:[#allocation12 + $0x58] sm:$0xff]  ;;  %v2469_v58 = vld [vmem:[#allocation12 + $0x50] sm:$0xff] }
 0x60c   :  { %6314 = vrcp.f32 %v1906_v59  ;;  %v2315_v59 = vld [vmem:[#allocation12 + $0x8] sm:$0xff] }
 0x60d   :  { %6316 = vtanh.f32 %v7213_v60 }
 0x619   :  { %v6315_v61 = vpop.eup %6314 }
 0x61a   :  { %v6317_v62 = vpop.eup %6316 }
 0x61b   :  { %v1910_v2 = vmul.f32 %v6317_v62, %v6315_v61  ;;  %v2314_v61 = vld [vmem:[#allocation12] sm:$0xff] }
 0x61c   :  { %v2467_v62 = vld [vmem:[#allocation12 + $0x40] sm:$0xff] }
 0x61d   :  { %1911 = vst.msk [vmem:[#allocation10 + $0x28] sm:$0xff] %vm213_vm3, %v1910_v2  ;;  %v1912_v63 = vpack.c.bf16 %v1910_v2, %v1910_v2  ;;  %v7294_v2 = vld [vmem:[#allocation10 + $0x8] sm:$0xff] }
 0x61f   :  { %5598 = vmatmul.mubr.msk.bf16.vlgmr.msra.gmra.mxu0 %vm213_vm3, %v1912_v63  ;;  %5610 = vmatmul.mubr.msk.bf16.vlgmr.msra.gmra.mxu1 %vm213_vm3, %v1912_v63 }
 0x620   :  { %5614 = vmatpush3.bf16.msra.mxu0 %v7133_v4  ;;  %5626 = vmatpush3.bf16.msra.mxu1 %v7139_v5 }
 0x621   :  { %5615 = vmatprep.subr.bf16.mxu0 %v6560_v12  ;;  %5627 = vmatprep.subr.bf16.mxu1 %v6560_v12 }
 0x622   :  { %5621 = vmatprep.mubr.msk.bf16.mxu0 %vm6561_vm2, %v6560_v12  ;;  %5633 = vmatprep.mubr.msk.bf16.mxu1 %vm6561_vm2, %v6560_v12 }
 0x624   :  { %5616 = vmatpush3.bf16.msra.mxu0 %v7151_v6  ;;  %5628 = vmatpush3.bf16.msra.mxu1 %v7157_v7 }
 0x625   :  { %5617 = vmatprep.subr.bf16.mxu0 %v6560_v12  ;;  %5629 = vmatprep.subr.bf16.mxu1 %v6560_v12 }
 0x628   :  { %5618 = vmatpush3.bf16.msra.mxu0 %v7165_v8  ;;  %5630 = vmatpush3.bf16.msra.mxu1 %v7171_v9 }
 0x629   :  { %5619 = vmatprep.subr.bf16.mxu0 %v6560_v12  ;;  %5631 = vmatprep.subr.bf16.mxu1 %v6560_v12 }
 0x62c   :  { %5620 = vmatpush3.bf16.msra.mxu0 %v7179_v10  ;;  %5632 = vmatpush3.bf16.msra.mxu1 %v7185_v11 }
 0x62d   :  { %5637 = vmatprep.subr.bf16.mxu0 %v6560_v12  ;;  %5649 = vmatprep.subr.bf16.mxu1 %v6560_v12 }
 0x62f   :  { %5622 = vmatmul.mubr.msk.bf16.vlgmr.msra.gmra.mxu0 %vm213_vm3, %v1912_v63  ;;  %5634 = vmatmul.mubr.msk.bf16.vlgmr.msra.gmra.mxu1 %vm213_vm3, %v1912_v63  ;;  %v7300_v63 = vld [vmem:[#allocation10 + $0x10] sm:$0xff] }
 0x630   :  { %5638 = vmatpush3.bf16.msra.mxu0 %v7066_v22  ;;  %5650 = vmatpush3.bf16.msra.mxu1 %v7072_v23  ;;  %v1913_v22 = vld [vmem:[#allocation2 + $0x30] sm:$0xff] }
 0x631   :  { %5639 = vmatprep.subr.bf16.mxu0 %v6560_v12  ;;  %5651 = vmatprep.subr.bf16.mxu1 %v6560_v12 }
 0x632   :  { %5645 = vmatprep.mubr.msk.bf16.mxu0 %vm6561_vm2, %v6560_v12  ;;  %5657 = vmatprep.mubr.msk.bf16.mxu1 %vm6561_vm2, %v6560_v12 }
 0x634   :  { %5640 = vmatpush3.bf16.msra.mxu0 %v7084_v25  ;;  %5652 = vmatpush3.bf16.msra.mxu1 %v7090_v26  ;;  %v1958_v25 = vld [vmem:[#allocation3 + $0x30] sm:$0xff] }
 0x635   :  { %5641 = vmatprep.subr.bf16.mxu0 %v6560_v12  ;;  %5653 = vmatprep.subr.bf16.mxu1 %v6560_v12 }
 0x638   :  { %5642 = vmatpush3.bf16.msra.mxu0 %v7098_v27  ;;  %5654 = vmatpush3.bf16.msra.mxu1 %v7104_v28 }
 0x639   :  { %5643 = vmatprep.subr.bf16.mxu0 %v6560_v12  ;;  %5655 = vmatprep.subr.bf16.mxu1 %v6560_v12 }
 0x63c   :  { %5644 = vmatpush3.bf16.msra.mxu0 %v7112_v29  ;;  %5656 = vmatpush3.bf16.msra.mxu1 %v7118_v30 }
 0x63d   :  { %5661 = vmatprep.subr.bf16.mxu0 %v6560_v12  ;;  %5673 = vmatprep.subr.bf16.mxu1 %v6560_v12 }
 0x6df   :  { %v1951_v23 = vpop.f32.mrf.mxu0  ;;  %v1993_v26 = vpop.f32.mrf.mxu1 }
 0x6e0   :  { %v1957_v1 = vadd.f32 %v1951_v23, %v1913_v22  ;;  %v1999_v27 = vadd.f32 %v1993_v26, %v1958_v25  ;;  %v7306_v22 = vld [vmem:[#allocation10 + $0x18] sm:$0xff]  ;;  %v7312_v23 = vld [vmem:[#allocation10 + $0x20] sm:$0xff]  ;;  %v7318_v25 = vld [vmem:[#allocation10 + $0x28] sm:$0xff] }
 0x6e1   :  { %v5599_v0 = vpop.f32.mrf.mxu0  ;;  %v5611_v28 = vpop.f32.mrf.mxu1 }
 0x6e2   :  { %v4707_v3 = vmul.f32 -1.442695, %v1957_v1  ;;  %v4706_v13 = vmul.f32 -1.442695, %v1999_v27  ;;  %v2604_v1 = vld [vmem:[#allocation12 + $0xb8] sm:$0xff]  ;;  %v2603_v0 = vld [vmem:[#allocation12 + $0xb0] sm:$0xff] }
 0x6e3   :  { %v1954_v31 = vpop.f32.mrf.mxu0  ;;  %v1996_v32 = vpop.f32.mrf.mxu1  ;;  %v2734_v27 = vld [vmem:[#allocation12 + $0xf8] sm:$0xff]  ;;  %v2733_v28 = vld [vmem:[#allocation12 + $0xf0] sm:$0xff] }
 0x6e4   :  { %6318 = vpow2.f32 %v4707_v3  ;;  %v2602_v3 = vld [vmem:[#allocation12 + $0xa8] sm:$0xff]  ;;  %v2601_v31 = vld [vmem:[#allocation12 + $0xa0] sm:$0xff] }
 0x6e5   :  { %6320 = vpow2.f32 %v4706_v13  ;;  %v5600_v29 = vpop.f32.mrf.mxu0  ;;  %v5612_v30 = vpop.f32.mrf.mxu1  ;;  %v2732_v13 = vld [vmem:[#allocation12 + $0xe8] sm:$0xff]  ;;  %v2731_v32 = vld [vmem:[#allocation12 + $0xe0] sm:$0xff] }
 0x6e6   :  { %v2600_v29 = vld [vmem:[#allocation12 + $0x98] sm:$0xff] }
 0x6e7   :  { %v2730_v30 = vld [vmem:[#allocation12 + $0xd8] sm:$0xff] }
 0x6ef   :  { %v2035_v34 = vpop.f32.mrf.mxu0  ;;  %v2077_v36 = vpop.f32.mrf.mxu1 }
 0x6f0   :  { %v2041_v37 = vadd.f32 %v2035_v34, %v2000_v33  ;;  %v2083_v38 = vadd.f32 %v2077_v36, %v2042_v35  ;;  %v2599_v33 = vld [vmem:[#allocation12 + $0x90] sm:$0xff]  ;;  %v2598_v35 = vld [vmem:[#allocation12 + $0x88] sm:$0xff] }
 0x6f1   :  { %v6319_v39 = vpop.eup %6318  ;;  %v5623_v40 = vpop.f32.mrf.mxu0  ;;  %v2729_v34 = vld [vmem:[#allocation12 + $0xd0] sm:$0xff]  ;;  %v2728_v36 = vld [vmem:[#allocation12 + $0xc8] sm:$0xff] }
 0x6f2   :  { %v5635_v41 = vpop.f32.mrf.mxu1  ;;  %v6321_v43 = vpop.eup %6320  ;;  %v2094_v44 = vadd.f32 1.0, %v6319_v39  ;;  %v4708_v14 = vmul.f32 -1.442695, %v2083_v38  ;;  %6322 = vtanh.f32 %v2041_v37  ;;  %v2597_v37 = vld [vmem:[#allocation12 + $0x80] sm:$0xff]  ;;  %v2110_v39 = vld [vmem:[#allocation2 + $0x38] sm:$0xff] }
 0x6f3   :  { %v2087_v15 = vadd.f32 1.0, %v6321_v43  ;;  %v2038_v16 = vpop.f32.mrf.mxu0  ;;  %v2727_v38 = vld [vmem:[#allocation12 + $0xc0] sm:$0xff]  ;;  %v2155_v41 = vld [vmem:[#allocation3 + $0x38] sm:$0xff] }
 0x6f4   :  { %v2080_v17 = vpop.f32.mrf.mxu1  ;;  %6324 = vrcp.f32 %v2094_v44 }
 0x6f5   :  { %6326 = vrcp.f32 %v2087_v15  ;;  %v5624_v42 = vpop.f32.mrf.mxu0 }
 0x6f6   :  { %v5636_v18 = vpop.f32.mrf.mxu1  ;;  %6328 = vpow2.f32 %v4708_v14 }
 0x6ff   :  { %v6323_v46 = vpop.eup %6322 }
 0x701   :  { %v6325_v19 = vpop.eup %6324 }
 0x702   :  { %v6327_v47 = vpop.eup %6326  ;;  %v2098_v45 = vmul.f32 %v6325_v19, %v6323_v46 }
 0x703   :  { %v6329_v48 = vpop.eup %6328  ;;  %v2090_v49 = vmul.f32 %v6327_v47, %v7213_v60  ;;  %v2468_v60 = vld [vmem:[#allocation12 + $0x48] sm:$0xff] }
 0x704   :  { %v2103_v20 = vadd.f32 1.0, %v6329_v48 }
 0x705   :  { %v7262_v21 = vadd.f32 %v2098_v45, %v2090_v49  ;;  %v2197_v45 = vld [vmem:[#allocation4 + $0x38] sm:$0xff] }
 0x706   :  { %6330 = vrcp.f32 %v2103_v20  ;;  %v2239_v49 = vld [vmem:[#allocation5 + $0x38] sm:$0xff] }
 0x707   :  { %6332 = vtanh.f32 %v7262_v21 }
 0x713   :  { %v6331_v50 = vpop.eup %6330 }
 0x714   :  { %v6333_v51 = vpop.eup %6332 }
 0x715   :  { %v2107_v52 = vmul.f32 %v6333_v51, %v6331_v50 }
 0x717   :  { %2108 = vst.msk [vmem:[#allocation10 + $0x30] sm:$0xff] %vm213_vm3, %v2107_v52  ;;  %v2109_v53 = vpack.c.bf16 %v2107_v52, %v2107_v52 }
 0x719   :  { %5646 = vmatmul.mubr.msk.bf16.vlgmr.msra.gmra.mxu0 %vm213_vm3, %v2109_v53  ;;  %5658 = vmatmul.mubr.msk.bf16.vlgmr.msra.gmra.mxu1 %vm213_vm3, %v2109_v53 }
 0x71a   :  { %5662 = vmatpush3.bf16.msra.mxu0 %v7133_v4  ;;  %5674 = vmatpush3.bf16.msra.mxu1 %v7139_v5  ;;  %v2321_v4 = vld [vmem:[#allocation12 + $0x38] sm:$0xff] }
 0x71b   :  { %5663 = vmatprep.subr.bf16.mxu0 %v6560_v12  ;;  %5675 = vmatprep.subr.bf16.mxu1 %v6560_v12  ;;  %v2474_v5 = vld [vmem:[#allocation12 + $0x78] sm:$0xff] }
 0x71c   :  { %5669 = vmatprep.mubr.msk.bf16.mxu0 %vm6561_vm2, %v6560_v12  ;;  %5681 = vmatprep.mubr.msk.bf16.mxu1 %vm6561_vm2, %v6560_v12 }
 0x71e   :  { %5664 = vmatpush3.bf16.msra.mxu0 %v7151_v6  ;;  %5676 = vmatpush3.bf16.msra.mxu1 %v7157_v7  ;;  %v7288_v6 = vld [vmem:[#allocation10] sm:$0xff]  ;;  %v2320_v7 = vld [vmem:[#allocation12 + $0x30] sm:$0xff] }
 0x71f   :  { %5665 = vmatprep.subr.bf16.mxu0 %v6560_v12  ;;  %5677 = vmatprep.subr.bf16.mxu1 %v6560_v12  ;;  %v7324_v26 = vld [vmem:[#allocation10 + $0x30] sm:$0xff] }
 0x722   :  { %5666 = vmatpush3.bf16.msra.mxu0 %v7165_v8  ;;  %5678 = vmatpush3.bf16.msra.mxu1 %v7171_v9  ;;  %v2473_v8 = vld [vmem:[#allocation12 + $0x70] sm:$0xff]  ;;  %v2319_v9 = vld [vmem:[#allocation12 + $0x28] sm:$0xff] }
 0x723   :  { %5667 = vmatprep.subr.bf16.mxu0 %v6560_v12  ;;  %5679 = vmatprep.subr.bf16.mxu1 %v6560_v12 }
 0x726   :  { %5668 = vmatpush3.bf16.msra.mxu0 %v7179_v10  ;;  %5680 = vmatpush3.bf16.msra.mxu1 %v7185_v11  ;;  %v2472_v10 = vld [vmem:[#allocation12 + $0x68] sm:$0xff]  ;;  %v2318_v11 = vld [vmem:[#allocation12 + $0x20] sm:$0xff] }
 0x727   :  { %5685 = vmatprep.subr.mxu0 %v2321_v4  ;;  %5713 = vmatprep.subr.mxu1 %v2474_v5 }
 0x729   :  { %5670 = vmatmul.mubr.msk.bf16.vlgmr.msra.gmra.mxu0 %vm213_vm3, %v2109_v53  ;;  %5682 = vmatmul.mubr.msk.bf16.vlgmr.msra.gmra.mxu1 %vm213_vm3, %v2109_v53 }
 0x72a   :  { %5686 = vmatpush3.msra.mxu0 %v2321_v4  ;;  %5701 = vmatprep.mubr.msk.f32.mxu0 %vm213_vm3, %v7288_v6 }
 0x72b   :  { %5714 = vmatpush3.msra.mxu1 %v2474_v5  ;;  %5729 = vmatprep.mubr.msk.f32.mxu1 %vm213_vm3, %v7288_v6 }
 0x72c   :  { %5687 = vmatprep.subr.mxu0 %v2320_v7  ;;  %5715 = vmatprep.subr.mxu1 %v2473_v8 }
 0x72d   :  { %5688 = vmatpush3.msra.mxu0 %v2320_v7  ;;  %5716 = vmatpush3.msra.mxu1 %v2473_v8 }
 0x72e   :  { %5689 = vmatprep.subr.mxu0 %v2319_v9  ;;  %5717 = vmatprep.subr.mxu1 %v2472_v10 }
 0x72f   :  { %5690 = vmatpush3.msra.mxu0 %v2319_v9  ;;  %5718 = vmatpush3.msra.mxu1 %v2472_v10 }
 0x730   :  { %5691 = vmatprep.subr.mxu0 %v2318_v11  ;;  %5719 = vmatprep.subr.mxu1 %v2471_v54 }
 0x731   :  { %5692 = vmatpush3.msra.mxu0 %v2318_v11  ;;  %5720 = vmatpush3.msra.mxu1 %v2471_v54 }
 0x732   :  { %5693 = vmatprep.subr.mxu0 %v2317_v55  ;;  %5721 = vmatprep.subr.mxu1 %v2470_v56 }
 0x733   :  { %5694 = vmatpush3.msra.mxu0 %v2317_v55  ;;  %5722 = vmatpush3.msra.mxu1 %v2470_v56  ;;  %v7335_v56 = vld [vmem:[%s7885_s6] ss:$0 sm:$0xff] }
 0x734   :  { %5695 = vmatprep.subr.mxu0 %v2316_v57  ;;  %5723 = vmatprep.subr.mxu1 %v2469_v58 }
 0x735   :  { %5696 = vmatpush3.msra.mxu0 %v2316_v57  ;;  %5724 = vmatpush3.msra.mxu1 %v2469_v58  ;;  %v7340_v57 = vld [vmem:[%s7885_s6 + $0x1] ss:$0 sm:$0xff] }
 0x736   :  { %5697 = vmatprep.subr.mxu0 %v2315_v59  ;;  %5725 = vmatprep.subr.mxu1 %v2468_v60 }
 0x737   :  { %5698 = vmatpush3.msra.mxu0 %v2315_v59  ;;  %5726 = vmatpush3.msra.mxu1 %v2468_v60 }
 0x738   :  { %5699 = vmatprep.subr.mxu0 %v2314_v61  ;;  %5727 = vmatprep.subr.mxu1 %v2467_v62 }
 0x739   :  { %5700 = vmatpush3.msra.mxu0 %v2314_v61  ;;  %5728 = vmatpush3.msra.mxu1 %v2467_v62 }
 0x73a   :  { %5702 = vmatmul.mubr.msk.f32.vlgmr.msra.gmra.mxu0 %vm213_vm3, %v7294_v2  ;;  %5730 = vmatmul.mubr.msk.f32.vlgmr.msra.gmra.mxu1 %vm213_vm3, %v7294_v2 }
 0x73b   :  { %5704 = vmatprep.mubr.msk.f32.mxu0 %vm213_vm3, %v7300_v63  ;;  %5732 = vmatprep.mubr.msk.f32.mxu1 %vm213_vm3, %v7300_v63 }
 0x73c   :  { %5741 = vmatprep.subr.mxu0 %v2604_v1  ;;  %5769 = vmatprep.subr.mxu1 %v2734_v27 }
 0x73d   :  { %5742 = vmatpush3.msra.mxu0 %v2604_v1  ;;  %5770 = vmatpush3.msra.mxu1 %v2734_v27 }
 0x73e   :  { %5705 = vmatmul.mubr.msk.f32.gmra.mxu0 %vm213_vm3, %v7306_v22  ;;  %5733 = vmatmul.mubr.msk.f32.gmra.mxu1 %vm213_vm3, %v7306_v22 }
 0x73f   :  { %5707 = vmatprep.mubr.msk.f32.mxu0 %vm213_vm3, %v7312_v23  ;;  %5735 = vmatprep.mubr.msk.f32.mxu1 %vm213_vm3, %v7312_v23 }
 0x740   :  { %5743 = vmatprep.subr.mxu0 %v2603_v0  ;;  %5771 = vmatprep.subr.mxu1 %v2733_v28 }
 0x741   :  { %5744 = vmatpush3.msra.mxu0 %v2603_v0  ;;  %5772 = vmatpush3.msra.mxu1 %v2733_v28 }
 0x742   :  { %5708 = vmatmul.mubr.msk.f32.gmra.mxu0 %vm213_vm3, %v7318_v25  ;;  %5736 = vmatmul.mubr.msk.f32.gmra.mxu1 %vm213_vm3, %v7318_v25 }
 0x743   :  { %5710 = vmatprep.mubr.msk.f32.mxu0 %vm213_vm3, %v7324_v26  ;;  %5738 = vmatprep.mubr.msk.f32.mxu1 %vm213_vm3, %v7324_v26 }
 0x744   :  { %5745 = vmatprep.subr.mxu0 %v2602_v3  ;;  %5773 = vmatprep.subr.mxu1 %v2732_v13 }
 0x745   :  { %5746 = vmatpush3.msra.mxu0 %v2602_v3  ;;  %5774 = vmatpush3.msra.mxu1 %v2732_v13 }
 0x746   :  { %5747 = vmatprep.subr.mxu0 %v2601_v31  ;;  %5775 = vmatprep.subr.mxu1 %v2731_v32 }
 0x747   :  { %5748 = vmatpush3.msra.mxu0 %v2601_v31  ;;  %5776 = vmatpush3.msra.mxu1 %v2731_v32 }
 0x748   :  { %5749 = vmatprep.subr.mxu0 %v2600_v29  ;;  %5777 = vmatprep.subr.mxu1 %v2730_v30 }
 0x749   :  { %5750 = vmatpush3.msra.mxu0 %v2600_v29  ;;  %5778 = vmatpush3.msra.mxu1 %v2730_v30 }
 0x74a   :  { %5751 = vmatprep.subr.mxu0 %v2599_v33  ;;  %5779 = vmatprep.subr.mxu1 %v2729_v34 }
 0x74b   :  { %5752 = vmatpush3.msra.mxu0 %v2599_v33  ;;  %5780 = vmatpush3.msra.mxu1 %v2729_v34 }
 0x74c   :  { %5753 = vmatprep.subr.mxu0 %v2598_v35  ;;  %5781 = vmatprep.subr.mxu1 %v2728_v36 }
 0x74d   :  { %5754 = vmatpush3.msra.mxu0 %v2598_v35  ;;  %5782 = vmatpush3.msra.mxu1 %v2728_v36 }
 0x74e   :  { %5755 = vmatprep.subr.mxu0 %v2597_v37  ;;  %5783 = vmatprep.subr.mxu1 %v2727_v38 }
 0x74f   :  { %5756 = vmatpush3.msra.mxu0 %v2597_v37  ;;  %5784 = vmatpush3.msra.mxu1 %v2727_v38 }
 0x750   :  { %5797 = vmatprep.subr.bf16.mxu0 %v6560_v12  ;;  %5809 = vmatprep.subr.bf16.mxu1 %v6560_v12 }
 0x7d9   :  { %v2148_v40 = vpop.f32.mrf.mxu0  ;;  %v2190_v43 = vpop.f32.mrf.mxu1 }
 0x7da   :  { %v2154_v44 = vadd.f32 %v2148_v40, %v2110_v39  ;;  %v2196_v14 = vadd.f32 %v2190_v43, %v2155_v41 }
 0x7db   :  { %v5647_v15 = vpop.f32.mrf.mxu0  ;;  %v5659_v16 = vpop.f32.mrf.mxu1 }
 0x7dc   :  { %v4714_v17 = vmul.f32 -1.442695, %v2154_v44  ;;  %v4713_v42 = vmul.f32 -1.442695, %v2196_v14 }
 0x7dd   :  { %v2151_v18 = vpop.f32.mrf.mxu0  ;;  %v2193_v46 = vpop.f32.mrf.mxu1 }
 0x7de   :  { %6334 = vpow2.f32 %v4714_v17 }
 0x7df   :  { %6336 = vpow2.f32 %v4713_v42  ;;  %v5648_v19 = vpop.f32.mrf.mxu0  ;;  %v5660_v47 = vpop.f32.mrf.mxu1 }
 0x7e9   :  { %v2232_v48 = vpop.f32.mrf.mxu0  ;;  %v2274_v20 = vpop.f32.mrf.mxu1 }
 0x7ea   :  { %v2238_v50 = vadd.f32 %v2232_v48, %v2197_v45  ;;  %v2280_v51 = vadd.f32 %v2274_v20, %v2239_v49  ;;  %v7374_v45 = vld [vmem:[#allocation14 + $0x18] sm:$0xff]   ;;  %v7384_v49 = vld [vmem:[#allocation14 + $0x10] sm:$0xff]  }
 0x7eb   :  { %v6335_v52 = vpop.eup %6334  ;;  %v5671_v53 = vpop.f32.mrf.mxu0  ;;  %v7376_v48 = vld [vmem:[#allocation14 + $0x38] sm:$0xff]   ;;  %v7386_v20 = vld [vmem:[#allocation14 + $0x30] sm:$0xff]  }
 0x7ec   :  { %v5683_v4 = vpop.f32.mrf.mxu1  ;;  %v6337_v5 = vpop.eup %6336  ;;  %v2291_v7 = vadd.f32 1.0, %v6335_v52  ;;  %v4715_v8 = vmul.f32 -1.442695, %v2280_v51  ;;  %6338 = vtanh.f32 %v2238_v50  ;;  %v7446_v50 = vld [vmem:[#allocation14 + $0x70] sm:$0xff]   ;;  %v7456_v51 = vld [vmem:[#allocation14 + $0x48] sm:$0xff]   ;;  %v7464_v53 = vld [vmem:[#allocation14 + $0x40] sm:$0xff]  }
 0x7ed   :  { %v2284_v9 = vadd.f32 1.0, %v6337_v5  ;;  %v2235_v10 = vpop.f32.mrf.mxu0  ;;  %v7458_v52 = vld [vmem:[#allocation14 + $0x68] sm:$0xff]   ;;  %v7466_v4 = vld [vmem:[#allocation14 + $0x60] sm:$0xff]  }
 0x7ee   :  { %v2277_v11 = vpop.f32.mrf.mxu1  ;;  %6340 = vrcp.f32 %v2291_v7 }
 0x7ef   :  { %6342 = vrcp.f32 %v2284_v9  ;;  %v5672_v54 = vpop.f32.mrf.mxu0  ;;  %v4736_v11 = vld [vmem:[%s7885_s6 + $0x2] ss:$0 sm:$0xff] }
 0x7f0   :  { %v5684_v55 = vpop.f32.mrf.mxu1  ;;  %6344 = vpow2.f32 %v4715_v8  ;;  %v4746_v54 = vld [vmem:[%s7885_s6 + $0x3] ss:$0 sm:$0xff] }
 0x7f9   :  { %v6339_v58 = vpop.eup %6338 }
 0x7fa   :  { %v5703_v59 = vpop.f32.mrf.mxu0  ;;  %v5731_v60 = vpop.f32.mrf.mxu1 }
 0x7fb   :  { %v6341_v61 = vpop.eup %6340  ;;  %v2425_v62 = vadd.f32 %v5703_v59, %v7335_v56  ;;  %v2555_v1 = vadd.f32 %v5731_v60, %v7340_v57 }
 0x7fc   :  { %v6343_v27 = vpop.eup %6342  ;;  %v2295_v0 = vmul.f32 %v6341_v61, %v6339_v58  ;;  %v2419_v28 = vpop.f32.mrf.mxu0 }
 0x7fd   :  { %v2549_v3 = vpop.f32.mrf.mxu1  ;;  %v6345_v13 = vpop.eup %6344  ;;  %v2287_v31 = vmul.f32 %v6343_v27, %v7262_v21  ;;  %2459 = vst.msk [vmem:[#allocation6 + $0x8] sm:$0xff] %vm213_vm3, %v2425_v62  ;;  %2589 = vst.msk [vmem:[#allocation7 + $0x8] sm:$0xff] %vm213_vm3, %v2555_v1  ;;  %v2420_v32 = vadd.f32 %v7335_v56, %v2419_v28 }
 0x7fe   :  { %v2550_v29 = vadd.f32 %v7340_v57, %v2549_v3  ;;  %v2300_v30 = vadd.f32 1.0, %v6345_v13  ;;  %v5706_v33 = vpop.f32.mrf.mxu0 }
 0x7ff   :  { %v5734_v34 = vpop.f32.mrf.mxu1  ;;  %v2296_v35 = vadd.f32 %v2295_v0, %v2287_v31  ;;  %2458 = vst.msk [vmem:[#allocation6] sm:$0xff] %vm213_vm3, %v2420_v32  ;;  %v2435_v36 = vadd.f32 %v5706_v33, %v7335_v56 }
 0x800   :  { %2588 = vst.msk [vmem:[#allocation7] sm:$0xff] %vm213_vm3, %v2550_v29  ;;  %v2565_v21 = vadd.f32 %v5734_v34, %v7340_v57  ;;  %6346 = vrcp.f32 %v2300_v30  ;;  %v2429_v37 = vpop.f32.mrf.mxu0 }
 0x801   :  { %v2559_v38 = vpop.f32.mrf.mxu1  ;;  %6348 = vtanh.f32 %v2296_v35  ;;  %2461 = vst.msk [vmem:[#allocation6 + $0x18] sm:$0xff] %vm213_vm3, %v2435_v36  ;;  %v2430_v39 = vadd.f32 %v7335_v56, %v2429_v37 }
 0x802   :  { %2591 = vst.msk [vmem:[#allocation7 + $0x18] sm:$0xff] %vm213_vm3, %v2565_v21  ;;  %v2560_v40 = vadd.f32 %v7340_v57, %v2559_v38  ;;  %v5709_v41 = vpop.f32.mrf.mxu0 }
 0x803   :  { %v5737_v43 = vpop.f32.mrf.mxu1  ;;  %2460 = vst.msk [vmem:[#allocation6 + $0x10] sm:$0xff] %vm213_vm3, %v2430_v39  ;;  %v2445_v44 = vadd.f32 %v5709_v41, %v7335_v56 }
 0x804   :  { %2590 = vst.msk [vmem:[#allocation7 + $0x10] sm:$0xff] %vm213_vm3, %v2560_v40  ;;  %v2575_v14 = vadd.f32 %v5737_v43, %v7340_v57  ;;  %v2439_v15 = vpop.f32.mrf.mxu0 }
 0x805   :  { %v2569_v16 = vpop.f32.mrf.mxu1  ;;  %2463 = vst.msk [vmem:[#allocation6 + $0x28] sm:$0xff] %vm213_vm3, %v2445_v44  ;;  %v2440_v17 = vadd.f32 %v7335_v56, %v2439_v15 }
 0x806   :  { %2593 = vst.msk [vmem:[#allocation7 + $0x28] sm:$0xff] %vm213_vm3, %v2575_v14  ;;  %v2570_v42 = vadd.f32 %v7340_v57, %v2569_v16 }
 0x807   :  { %2462 = vst.msk [vmem:[#allocation6 + $0x20] sm:$0xff] %vm213_vm3, %v2440_v17 }
 0x808   :  { %2592 = vst.msk [vmem:[#allocation7 + $0x20] sm:$0xff] %vm213_vm3, %v2570_v42  ;;  %v2891_v42 = vld [vmem:[#allocation6] sm:$0xff] }
 0x80d   :  { %v6347_v18 = vpop.eup %6346 }
 0x80e   :  { %v6349_v46 = vpop.eup %6348 }
 0x80f   :  { %v2304_v19 = vmul.f32 %v6349_v46, %v6347_v18  ;;  %v2957_v46 = vld [vmem:[#allocation7] sm:$0xff] }
 0x811   :  { %2305 = vst.msk [vmem:[#allocation10 + $0x38] sm:$0xff] %vm213_vm3, %v2304_v19 }
 0x818   :  { %v2313_v47 = vld [vmem:[#allocation10 + $0x38] sm:$0xff] }
 0x819   :  { %5711 = vmatmul.mubr.msk.f32.gmra.mxu0 %vm213_vm3, %v2313_v47  ;;  %5739 = vmatmul.mubr.msk.f32.gmra.mxu1 %vm213_vm3, %v2313_v47 }
 0x81a   :  { %5757 = vmatprep.mubr.msk.f32.mxu0 %vm213_vm3, %v7288_v6  ;;  %5785 = vmatprep.mubr.msk.f32.mxu1 %vm213_vm3, %v7288_v6  ;;  %v7400_v6 = vld [vmem:[#allocation14 + $0x8] sm:$0xff]  }
 0x81d   :  { %5758 = vmatmul.mubr.msk.f32.vlgmr.msra.gmra.mxu0 %vm213_vm3, %v7294_v2  ;;  %5786 = vmatmul.mubr.msk.f32.vlgmr.msra.gmra.mxu1 %vm213_vm3, %v7294_v2  ;;  %v7402_v2 = vld [vmem:[#allocation14 + $0x28] sm:$0xff]  }
 0x81e   :  { %5798 = vmatpush3.bf16.msra.mxu0 %v7374_v45  ;;  %5810 = vmatpush3.bf16.msra.mxu1 %v7376_v48 }
 0x81f   :  { %5760 = vmatprep.mubr.msk.f32.mxu0 %vm213_vm3, %v7300_v63  ;;  %5788 = vmatprep.mubr.msk.f32.mxu1 %vm213_vm3, %v7300_v63  ;;  %v7416_v63 = vld [vmem:[#allocation14] sm:$0xff]  }
 0x820   :  { %5799 = vmatprep.subr.bf16.mxu0 %v6560_v12  ;;  %5811 = vmatprep.subr.bf16.mxu1 %v6560_v12 }
 0x821   :  { %5761 = vmatmul.mubr.msk.f32.gmra.mxu0 %vm213_vm3, %v7306_v22  ;;  %5789 = vmatmul.mubr.msk.f32.gmra.mxu1 %vm213_vm3, %v7306_v22  ;;  %v7418_v22 = vld [vmem:[#allocation14 + $0x20] sm:$0xff]  }
 0x822   :  { %5800 = vmatpush3.bf16.msra.mxu0 %v7384_v49  ;;  %5812 = vmatpush3.bf16.msra.mxu1 %v7386_v20 }
 0x823   :  { %5763 = vmatprep.mubr.msk.f32.mxu0 %vm213_vm3, %v7312_v23  ;;  %5791 = vmatprep.mubr.msk.f32.mxu1 %vm213_vm3, %v7312_v23  ;;  %v7430_v23 = vld [vmem:[#allocation14 + $0x58] sm:$0xff]  }
 0x824   :  { %5801 = vmatprep.subr.bf16.mxu0 %v6560_v12  ;;  %5813 = vmatprep.subr.bf16.mxu1 %v6560_v12 }
 0x825   :  { %5764 = vmatmul.mubr.msk.f32.gmra.mxu0 %vm213_vm3, %v7318_v25  ;;  %5792 = vmatmul.mubr.msk.f32.gmra.mxu1 %vm213_vm3, %v7318_v25  ;;  %v7432_v25 = vld [vmem:[#allocation14 + $0x78] sm:$0xff]  }
 0x826   :  { %5802 = vmatpush3.bf16.msra.mxu0 %v7400_v6  ;;  %5814 = vmatpush3.bf16.msra.mxu1 %v7402_v2 }
 0x827   :  { %5766 = vmatprep.mubr.msk.f32.mxu0 %vm213_vm3, %v7324_v26  ;;  %5794 = vmatprep.mubr.msk.f32.mxu1 %vm213_vm3, %v7324_v26  ;;  %v7444_v26 = vld [vmem:[#allocation14 + $0x50] sm:$0xff]  }
 0x828   :  { %5803 = vmatprep.subr.bf16.mxu0 %v6560_v12  ;;  %5815 = vmatprep.subr.bf16.mxu1 %v6560_v12 }
 0x829   :  { %5767 = vmatmul.mubr.msk.f32.gmra.mxu0 %vm213_vm3, %v2313_v47  ;;  %5795 = vmatmul.mubr.msk.f32.gmra.mxu1 %vm213_vm3, %v2313_v47 }
 0x82a   :  { %5804 = vmatpush3.bf16.msra.mxu0 %v7416_v63  ;;  %5816 = vmatpush3.bf16.msra.mxu1 %v7418_v22 }
 0x82b   :  { %5805 = vmatprep.mubr.msk.bf16.mxu0 %vm6561_vm2, %v6560_v12  ;;  %5817 = vmatprep.mubr.msk.bf16.mxu1 %vm6561_vm2, %v6560_v12 }
 0x82c   :  { %5821 = vmatprep.subr.bf16.mxu0 %v6560_v12  ;;  %5833 = vmatprep.subr.bf16.mxu1 %v6560_v12 }
 0x82d   :  { %5806 = vmatmul.mubr.bf16.vlgmr.msra.gmra.mxu0 %v6562_v24  ;;  %5818 = vmatmul.mubr.bf16.vlgmr.msra.gmra.mxu1 %v6562_v24 }
 0x82e   :  { %5822 = vmatpush3.bf16.msra.mxu0 %v7430_v23  ;;  %5834 = vmatpush3.bf16.msra.mxu1 %v7432_v25 }
 0x82f   :  { %5823 = vmatprep.subr.bf16.mxu0 %v6560_v12  ;;  %5835 = vmatprep.subr.bf16.mxu1 %v6560_v12 }
 0x830   :  { %5829 = vmatprep.mubr.msk.bf16.mxu0 %vm6561_vm2, %v6560_v12  ;;  %5841 = vmatprep.mubr.msk.bf16.mxu1 %vm6561_vm2, %v6560_v12 }
 0x832   :  { %5824 = vmatpush3.bf16.msra.mxu0 %v7444_v26  ;;  %5836 = vmatpush3.bf16.msra.mxu1 %v7446_v50 }
 0x833   :  { %5825 = vmatprep.subr.bf16.mxu0 %v6560_v12  ;;  %5837 = vmatprep.subr.bf16.mxu1 %v6560_v12 }
 0x836   :  { %5826 = vmatpush3.bf16.msra.mxu0 %v7456_v51  ;;  %5838 = vmatpush3.bf16.msra.mxu1 %v7458_v52 }
 0x837   :  { %5827 = vmatprep.subr.bf16.mxu0 %v6560_v12  ;;  %5839 = vmatprep.subr.bf16.mxu1 %v6560_v12 }
 0x83a   :  { %5828 = vmatpush3.bf16.msra.mxu0 %v7464_v53  ;;  %5840 = vmatpush3.bf16.msra.mxu1 %v7466_v4 }
 0x83b   :  { %5845 = vmatprep.subr.bf16.mxu0 %v6560_v12  ;;  %5857 = vmatprep.subr.bf16.mxu1 %v6560_v12 }
 0x83d   :  { %5830 = vmatmul.mubr.bf16.vlgmr.msra.gmra.mxu0 %v6562_v24  ;;  %5842 = vmatmul.mubr.bf16.vlgmr.msra.gmra.mxu1 %v6562_v24 }
 0x83e   :  { %5846 = vmatpush3.bf16.msra.mxu0 %v7374_v45  ;;  %5858 = vmatpush3.bf16.msra.mxu1 %v7376_v48 }
 0x83f   :  { %5847 = vmatprep.subr.bf16.mxu0 %v6560_v12  ;;  %5859 = vmatprep.subr.bf16.mxu1 %v6560_v12 }
 0x840   :  { %5853 = vmatprep.mubr.msk.bf16.mxu0 %vm6561_vm2, %v6560_v12  ;;  %5865 = vmatprep.mubr.msk.bf16.mxu1 %vm6561_vm2, %v6560_v12 }
 0x842   :  { %5848 = vmatpush3.bf16.msra.mxu0 %v7384_v49  ;;  %5860 = vmatpush3.bf16.msra.mxu1 %v7386_v20 }
 0x843   :  { %5849 = vmatprep.subr.bf16.mxu0 %v6560_v12  ;;  %5861 = vmatprep.subr.bf16.mxu1 %v6560_v12 }
 0x846   :  { %5850 = vmatpush3.bf16.msra.mxu0 %v7400_v6  ;;  %5862 = vmatpush3.bf16.msra.mxu1 %v7402_v2 }
 0x847   :  { %5851 = vmatprep.subr.bf16.mxu0 %v6560_v12  ;;  %5863 = vmatprep.subr.bf16.mxu1 %v6560_v12 }
 0x84a   :  { %5852 = vmatpush3.bf16.msra.mxu0 %v7416_v63  ;;  %5864 = vmatpush3.bf16.msra.mxu1 %v7418_v22 }
 0x84b   :  { %5869 = vmatprep.subr.bf16.mxu0 %v6560_v12  ;;  %5881 = vmatprep.subr.bf16.mxu1 %v6560_v12 }
 0x8d9   :  { %v5712_v24 = vpop.f32.mrf.mxu0  ;;  %v5740_v5 = vpop.f32.mrf.mxu1 }
 0x8da   :  { %v2455_v7 = vadd.f32 %v5712_v24, %v7335_v56  ;;  %v2585_v8 = vadd.f32 %v5740_v5, %v7340_v57 }
 0x8db   :  { %v2449_v9 = vpop.f32.mrf.mxu0  ;;  %v2579_v10 = vpop.f32.mrf.mxu1 }
 0x8dc   :  { %2465 = vst.msk [vmem:[#allocation6 + $0x38] sm:$0xff] %vm213_vm3, %v2455_v7  ;;  %2595 = vst.msk [vmem:[#allocation7 + $0x38] sm:$0xff] %vm213_vm3, %v2585_v8  ;;  %v2450_v55 = vadd.f32 %v7335_v56, %v2449_v9  ;;  %v2580_v58 = vadd.f32 %v7340_v57, %v2579_v10 }
 0x8dd   :  { %v5759_v59 = vpop.f32.mrf.mxu0  ;;  %v5787_v60 = vpop.f32.mrf.mxu1 }
 0x8de   :  { %2464 = vst.msk [vmem:[#allocation6 + $0x30] sm:$0xff] %vm213_vm3, %v2450_v55  ;;  %2594 = vst.msk [vmem:[#allocation7 + $0x30] sm:$0xff] %vm213_vm3, %v2580_v58  ;;  %v2685_v61 = vadd.f32 %v5759_v59, %v4736_v11  ;;  %v2815_v62 = vadd.f32 %v5787_v60, %v4746_v54 }
 0x8df   :  { %v2679_v1 = vpop.f32.mrf.mxu0  ;;  %v2809_v27 = vpop.f32.mrf.mxu1 }
 0x8e0   :  { %2719 = vst.msk [vmem:[#allocation8 + $0x8] sm:$0xff] %vm213_vm3, %v2685_v61  ;;  %2849 = vst.msk [vmem:[#allocation9 + $0x8] sm:$0xff] %vm213_vm3, %v2815_v62  ;;  %v2680_v0 = vadd.f32 %v4736_v11, %v2679_v1  ;;  %v2810_v28 = vadd.f32 %v4746_v54, %v2809_v27 }
 0x8e1   :  { %v5762_v3 = vpop.f32.mrf.mxu0  ;;  %v5790_v56 = vpop.f32.mrf.mxu1 }
 0x8e2   :  { %2718 = vst.msk [vmem:[#allocation8] sm:$0xff] %vm213_vm3, %v2680_v0  ;;  %2848 = vst.msk [vmem:[#allocation9] sm:$0xff] %vm213_vm3, %v2810_v28  ;;  %v2695_v57 = vadd.f32 %v5762_v3, %v4736_v11  ;;  %v2825_v13 = vadd.f32 %v5790_v56, %v4746_v54 }
 0x8e3   :  { %v2689_v31 = vpop.f32.mrf.mxu0  ;;  %v2819_v32 = vpop.f32.mrf.mxu1 }
 0x8e4   :  { %2721 = vst.msk [vmem:[#allocation8 + $0x18] sm:$0xff] %vm213_vm3, %v2695_v57  ;;  %2851 = vst.msk [vmem:[#allocation9 + $0x18] sm:$0xff] %vm213_vm3, %v2825_v13  ;;  %v2690_v29 = vadd.f32 %v4736_v11, %v2689_v31  ;;  %v2820_v30 = vadd.f32 %v4746_v54, %v2819_v32 }
 0x8e5   :  { %v5765_v33 = vpop.f32.mrf.mxu0  ;;  %v5793_v34 = vpop.f32.mrf.mxu1 }
 0x8e6   :  { %2720 = vst.msk [vmem:[#allocation8 + $0x10] sm:$0xff] %vm213_vm3, %v2690_v29  ;;  %2850 = vst.msk [vmem:[#allocation9 + $0x10] sm:$0xff] %vm213_vm3, %v2820_v30  ;;  %v2705_v35 = vadd.f32 %v5765_v33, %v4736_v11  ;;  %v2835_v36 = vadd.f32 %v5793_v34, %v4746_v54 }
 0x8e7   :  { %v2699_v21 = vpop.f32.mrf.mxu0  ;;  %v2829_v37 = vpop.f32.mrf.mxu1 }
 0x8e8   :  { %2723 = vst.msk [vmem:[#allocation8 + $0x28] sm:$0xff] %vm213_vm3, %v2705_v35  ;;  %2853 = vst.msk [vmem:[#allocation9 + $0x28] sm:$0xff] %vm213_vm3, %v2835_v36  ;;  %v2700_v38 = vadd.f32 %v4736_v11, %v2699_v21  ;;  %v2830_v39 = vadd.f32 %v4746_v54, %v2829_v37 }
 0x8e9   :  { %v5768_v40 = vpop.f32.mrf.mxu0  ;;  %v5796_v41 = vpop.f32.mrf.mxu1  ;;  %v3023_v58 = vld [vmem:[#allocation8] sm:$0xff] }
 0x8ea   :  { %2722 = vst.msk [vmem:[#allocation8 + $0x20] sm:$0xff] %vm213_vm3, %v2700_v38  ;;  %2852 = vst.msk [vmem:[#allocation9 + $0x20] sm:$0xff] %vm213_vm3, %v2830_v39  ;;  %v2715_v43 = vadd.f32 %v5768_v40, %v4736_v11  ;;  %v2845_v44 = vadd.f32 %v5796_v41, %v4746_v54  ;;  %v3089_v60 = vld [vmem:[#allocation9] sm:$0xff] }
 0x8eb   :  { %v2709_v14 = vpop.f32.mrf.mxu0  ;;  %v2839_v15 = vpop.f32.mrf.mxu1 }
 0x8ec   :  { %2725 = vst.msk [vmem:[#allocation8 + $0x38] sm:$0xff] %vm213_vm3, %v2715_v43  ;;  %2855 = vst.msk [vmem:[#allocation9 + $0x38] sm:$0xff] %vm213_vm3, %v2845_v44  ;;  %v2710_v16 = vadd.f32 %v4736_v11, %v2709_v14  ;;  %v2840_v17 = vadd.f32 %v4746_v54, %v2839_v15  ;;  %v3180_v14 = vld [vmem:[#allocation6 + $0x8] sm:$0xff] }
 0x8ed   :  { %v2950_v18 = vpop.f32.mrf.mxu0  ;;  %v3016_v19 = vpop.f32.mrf.mxu1 }
 0x8ee   :  { %2724 = vst.msk [vmem:[#allocation8 + $0x30] sm:$0xff] %vm213_vm3, %v2710_v16  ;;  %2854 = vst.msk [vmem:[#allocation9 + $0x30] sm:$0xff] %vm213_vm3, %v2840_v17  ;;  %v2956_v47 = vadd.f32 %v2950_v18, %v2891_v42  ;;  %v3022_v24 = vadd.f32 %v3016_v19, %v2957_v46  ;;  %v3225_v16 = vld [vmem:[#allocation7 + $0x8] sm:$0xff] }
 0x8ef   :  { %v5807_v5 = vpop.f32.mrf.mxu0  ;;  %v5819_v7 = vpop.f32.mrf.mxu1 }
 0x8f0   :  { %v4772_v8 = vmul.f32 -1.442695, %v2956_v47  ;;  %v4771_v9 = vmul.f32 -1.442695, %v3022_v24 }
 0x8f1   :  { %v2953_v10 = vpop.f32.mrf.mxu0  ;;  %v3019_v55 = vpop.f32.mrf.mxu1 }
 0x8f2   :  { %6350 = vpow2.f32 %v4772_v8  ;;  %v3267_v10 = vld [vmem:[#allocation8 + $0x8] sm:$0xff] }
 0x8f3   :  { %6352 = vpow2.f32 %v4771_v9  ;;  %v5808_v11 = vpop.f32.mrf.mxu0  ;;  %v5820_v54 = vpop.f32.mrf.mxu1 }
 0x8f4   :  { %v3309_v11 = vld [vmem:[#allocation9 + $0x8] sm:$0xff] }
 0x8fd   :  { %v3082_v59 = vpop.f32.mrf.mxu0  ;;  %v3148_v61 = vpop.f32.mrf.mxu1 }
 0x8fe   :  { %v3088_v62 = vadd.f32 %v3082_v59, %v3023_v58  ;;  %v3154_v1 = vadd.f32 %v3148_v61, %v3089_v60 }
 0x8ff   :  { %v6351_v27 = vpop.eup %6350  ;;  %v5831_v0 = vpop.f32.mrf.mxu0 }
 0x900   :  { %v5843_v28 = vpop.f32.mrf.mxu1  ;;  %v6353_v3 = vpop.eup %6352  ;;  %v3165_v56 = vadd.f32 1.0, %v6351_v27  ;;  %v4773_v57 = vmul.f32 -1.442695, %v3154_v1  ;;  %6354 = vtanh.f32 %v3088_v62 }
 0x901   :  { %v3158_v13 = vadd.f32 1.0, %v6353_v3  ;;  %v3085_v31 = vpop.f32.mrf.mxu0 }
 0x902   :  { %v3151_v32 = vpop.f32.mrf.mxu1  ;;  %6356 = vrcp.f32 %v3165_v56 }
 0x903   :  { %6358 = vrcp.f32 %v3158_v13  ;;  %v5832_v29 = vpop.f32.mrf.mxu0 }
 0x904   :  { %v5844_v30 = vpop.f32.mrf.mxu1  ;;  %6360 = vpow2.f32 %v4773_v57 }
 0x90d   :  { %v6355_v33 = vpop.eup %6354 }
 0x90f   :  { %v6357_v34 = vpop.eup %6356 }
 0x910   :  { %v6359_v35 = vpop.eup %6358  ;;  %v3169_v36 = vmul.f32 %v6357_v34, %v6355_v33 }
 0x911   :  { %v6361_v21 = vpop.eup %6360  ;;  %v3161_v37 = vmul.f32 0.0, %v6359_v35 }
 0x912   :  { %v3174_v38 = vadd.f32 1.0, %v6361_v21 }
 0x913   :  { %v7526_v39 = vadd.f32 %v3169_v36, %v3161_v37 }
 0x914   :  { %6362 = vrcp.f32 %v3174_v38 }
 0x915   :  { %6364 = vtanh.f32 %v7526_v39 }
 0x921   :  { %v6363_v40 = vpop.eup %6362 }
 0x922   :  { %v6365_v41 = vpop.eup %6364 }
 0x923   :  { %v3178_v43 = vmul.f32 %v6365_v41, %v6363_v40 }
 0x925   :  { %v3179_v44 = vpack.c.bf16 %v3178_v43, %v3178_v43  ;;  %v3421_v43 = vld [vmem:[#allocation7 + $0x10] sm:$0xff] }
 0x927   :  { %5854 = vmatmul.mubr.msk.bf16.vlgmr.msra.gmra.mxu0 %vm213_vm3, %v3179_v44  ;;  %5866 = vmatmul.mubr.msk.bf16.vlgmr.msra.gmra.mxu1 %vm213_vm3, %v3179_v44 }
 0x928   :  { %5870 = vmatpush3.bf16.msra.mxu0 %v7430_v23  ;;  %5882 = vmatpush3.bf16.msra.mxu1 %v7432_v25 }
 0x929   :  { %5871 = vmatprep.subr.bf16.mxu0 %v6560_v12  ;;  %5883 = vmatprep.subr.bf16.mxu1 %v6560_v12 }
 0x92a   :  { %5877 = vmatprep.mubr.msk.bf16.mxu0 %vm6561_vm2, %v6560_v12  ;;  %5889 = vmatprep.mubr.msk.bf16.mxu1 %vm6561_vm2, %v6560_v12 }
 0x92c   :  { %5872 = vmatpush3.bf16.msra.mxu0 %v7444_v26  ;;  %5884 = vmatpush3.bf16.msra.mxu1 %v7446_v50 }
 0x92d   :  { %5873 = vmatprep.subr.bf16.mxu0 %v6560_v12  ;;  %5885 = vmatprep.subr.bf16.mxu1 %v6560_v12 }
 0x930   :  { %5874 = vmatpush3.bf16.msra.mxu0 %v7456_v51  ;;  %5886 = vmatpush3.bf16.msra.mxu1 %v7458_v52 }
 0x931   :  { %5875 = vmatprep.subr.bf16.mxu0 %v6560_v12  ;;  %5887 = vmatprep.subr.bf16.mxu1 %v6560_v12 }
 0x934   :  { %5876 = vmatpush3.bf16.msra.mxu0 %v7464_v53  ;;  %5888 = vmatpush3.bf16.msra.mxu1 %v7466_v4 }
 0x935   :  { %5893 = vmatprep.subr.bf16.mxu0 %v6560_v12  ;;  %5905 = vmatprep.subr.bf16.mxu1 %v6560_v12 }
 0x937   :  { %5878 = vmatmul.mubr.msk.bf16.vlgmr.msra.gmra.mxu0 %vm213_vm3, %v3179_v44  ;;  %5890 = vmatmul.mubr.msk.bf16.vlgmr.msra.gmra.mxu1 %vm213_vm3, %v3179_v44 }
 0x938   :  { %5894 = vmatpush3.bf16.msra.mxu0 %v7374_v45  ;;  %5906 = vmatpush3.bf16.msra.mxu1 %v7376_v48 }
 0x939   :  { %5895 = vmatprep.subr.bf16.mxu0 %v6560_v12  ;;  %5907 = vmatprep.subr.bf16.mxu1 %v6560_v12 }
 0x93a   :  { %5901 = vmatprep.mubr.msk.bf16.mxu0 %vm6561_vm2, %v6560_v12  ;;  %5913 = vmatprep.mubr.msk.bf16.mxu1 %vm6561_vm2, %v6560_v12 }
 0x93c   :  { %5896 = vmatpush3.bf16.msra.mxu0 %v7384_v49  ;;  %5908 = vmatpush3.bf16.msra.mxu1 %v7386_v20 }
 0x93d   :  { %5897 = vmatprep.subr.bf16.mxu0 %v6560_v12  ;;  %5909 = vmatprep.subr.bf16.mxu1 %v6560_v12 }
 0x940   :  { %5898 = vmatpush3.bf16.msra.mxu0 %v7400_v6  ;;  %5910 = vmatpush3.bf16.msra.mxu1 %v7402_v2 }
 0x941   :  { %5899 = vmatprep.subr.bf16.mxu0 %v6560_v12  ;;  %5911 = vmatprep.subr.bf16.mxu1 %v6560_v12 }
 0x944   :  { %5900 = vmatpush3.bf16.msra.mxu0 %v7416_v63  ;;  %5912 = vmatpush3.bf16.msra.mxu1 %v7418_v22 }
 0x945   :  { %5917 = vmatprep.subr.bf16.mxu0 %v6560_v12  ;;  %5929 = vmatprep.subr.bf16.mxu1 %v6560_v12 }
 0x9e7   :  { %v3218_v15 = vpop.f32.mrf.mxu0  ;;  %v3260_v17 = vpop.f32.mrf.mxu1 }
 0x9e8   :  { %v3224_v42 = vadd.f32 %v3218_v15, %v3180_v14  ;;  %v3266_v18 = vadd.f32 %v3260_v17, %v3225_v16 }
 0x9e9   :  { %v5855_v46 = vpop.f32.mrf.mxu0  ;;  %v5867_v19 = vpop.f32.mrf.mxu1 }
 0x9ea   :  { %v4779_v47 = vmul.f32 -1.442695, %v3224_v42  ;;  %v4778_v24 = vmul.f32 -1.442695, %v3266_v18 }
 0x9eb   :  { %v3221_v5 = vpop.f32.mrf.mxu0  ;;  %v3263_v7 = vpop.f32.mrf.mxu1 }
 0x9ec   :  { %6366 = vpow2.f32 %v4779_v47  ;;  %v3463_v5 = vld [vmem:[#allocation8 + $0x10] sm:$0xff] }
 0x9ed   :  { %6368 = vpow2.f32 %v4778_v24  ;;  %v5856_v8 = vpop.f32.mrf.mxu0  ;;  %v5868_v9 = vpop.f32.mrf.mxu1 }
 0x9ee   :  { %v3505_v8 = vld [vmem:[#allocation9 + $0x10] sm:$0xff] }
 0x9f7   :  { %v3302_v55 = vpop.f32.mrf.mxu0  ;;  %v3344_v54 = vpop.f32.mrf.mxu1 }
 0x9f8   :  { %v3308_v58 = vadd.f32 %v3302_v55, %v3267_v10  ;;  %v3350_v59 = vadd.f32 %v3344_v54, %v3309_v11 }
 0x9f9   :  { %v6367_v60 = vpop.eup %6366  ;;  %v5879_v61 = vpop.f32.mrf.mxu0 }
 0x9fa   :  { %v5891_v62 = vpop.f32.mrf.mxu1  ;;  %v6369_v1 = vpop.eup %6368  ;;  %v3361_v27 = vadd.f32 1.0, %v6367_v60  ;;  %v4780_v0 = vmul.f32 -1.442695, %v3350_v59  ;;  %6370 = vtanh.f32 %v3308_v58 }
 0x9fb   :  { %v3354_v28 = vadd.f32 1.0, %v6369_v1  ;;  %v3305_v3 = vpop.f32.mrf.mxu0 }
 0x9fc   :  { %v3347_v56 = vpop.f32.mrf.mxu1  ;;  %6372 = vrcp.f32 %v3361_v27 }
 0x9fd   :  { %6374 = vrcp.f32 %v3354_v28  ;;  %v5880_v57 = vpop.f32.mrf.mxu0 }
 0x9fe   :  { %v5892_v13 = vpop.f32.mrf.mxu1  ;;  %6376 = vpow2.f32 %v4780_v0 }
 0xa07   :  { %v6371_v31 = vpop.eup %6370 }
 0xa09   :  { %v6373_v32 = vpop.eup %6372 }
 0xa0a   :  { %v6375_v29 = vpop.eup %6374  ;;  %v3365_v30 = vmul.f32 %v6373_v32, %v6371_v31 }
 0xa0b   :  { %v6377_v33 = vpop.eup %6376  ;;  %v3357_v34 = vmul.f32 %v6375_v29, %v7526_v39  ;;  %v3376_v39 = vld [vmem:[#allocation6 + $0x10] sm:$0xff] }
 0xa0c   :  { %v3370_v35 = vadd.f32 1.0, %v6377_v33 }
 0xa0d   :  { %v7574_v36 = vadd.f32 %v3365_v30, %v3357_v34 }
 0xa0e   :  { %6378 = vrcp.f32 %v3370_v35 }
 0xa0f   :  { %6380 = vtanh.f32 %v7574_v36 }
 0xa1b   :  { %v6379_v21 = vpop.eup %6378 }
 0xa1c   :  { %v6381_v37 = vpop.eup %6380 }
 0xa1d   :  { %v3374_v38 = vmul.f32 %v6381_v37, %v6379_v21 }
 0xa1f   :  { %v3375_v40 = vpack.c.bf16 %v3374_v38, %v3374_v38  ;;  %v3617_v38 = vld [vmem:[#allocation7 + $0x18] sm:$0xff] }
 0xa21   :  { %5902 = vmatmul.mubr.msk.bf16.vlgmr.msra.gmra.mxu0 %vm213_vm3, %v3375_v40  ;;  %5914 = vmatmul.mubr.msk.bf16.vlgmr.msra.gmra.mxu1 %vm213_vm3, %v3375_v40 }
 0xa22   :  { %5918 = vmatpush3.bf16.msra.mxu0 %v7430_v23  ;;  %5930 = vmatpush3.bf16.msra.mxu1 %v7432_v25 }
 0xa23   :  { %5919 = vmatprep.subr.bf16.mxu0 %v6560_v12  ;;  %5931 = vmatprep.subr.bf16.mxu1 %v6560_v12 }
 0xa24   :  { %5925 = vmatprep.mubr.msk.bf16.mxu0 %vm6561_vm2, %v6560_v12  ;;  %5937 = vmatprep.mubr.msk.bf16.mxu1 %vm6561_vm2, %v6560_v12 }
 0xa26   :  { %5920 = vmatpush3.bf16.msra.mxu0 %v7444_v26  ;;  %5932 = vmatpush3.bf16.msra.mxu1 %v7446_v50 }
 0xa27   :  { %5921 = vmatprep.subr.bf16.mxu0 %v6560_v12  ;;  %5933 = vmatprep.subr.bf16.mxu1 %v6560_v12 }
 0xa2a   :  { %5922 = vmatpush3.bf16.msra.mxu0 %v7456_v51  ;;  %5934 = vmatpush3.bf16.msra.mxu1 %v7458_v52 }
 0xa2b   :  { %5923 = vmatprep.subr.bf16.mxu0 %v6560_v12  ;;  %5935 = vmatprep.subr.bf16.mxu1 %v6560_v12 }
 0xa2e   :  { %5924 = vmatpush3.bf16.msra.mxu0 %v7464_v53  ;;  %5936 = vmatpush3.bf16.msra.mxu1 %v7466_v4 }
 0xa2f   :  { %5941 = vmatprep.subr.bf16.mxu0 %v6560_v12  ;;  %5953 = vmatprep.subr.bf16.mxu1 %v6560_v12 }
 0xa31   :  { %5926 = vmatmul.mubr.msk.bf16.vlgmr.msra.gmra.mxu0 %vm213_vm3, %v3375_v40  ;;  %5938 = vmatmul.mubr.msk.bf16.vlgmr.msra.gmra.mxu1 %vm213_vm3, %v3375_v40 }
 0xa32   :  { %5942 = vmatpush3.bf16.msra.mxu0 %v7374_v45  ;;  %5954 = vmatpush3.bf16.msra.mxu1 %v7376_v48 }
 0xa33   :  { %5943 = vmatprep.subr.bf16.mxu0 %v6560_v12  ;;  %5955 = vmatprep.subr.bf16.mxu1 %v6560_v12 }
 0xa34   :  { %5949 = vmatprep.mubr.msk.bf16.mxu0 %vm6561_vm2, %v6560_v12  ;;  %5961 = vmatprep.mubr.msk.bf16.mxu1 %vm6561_vm2, %v6560_v12 }
 0xa36   :  { %5944 = vmatpush3.bf16.msra.mxu0 %v7384_v49  ;;  %5956 = vmatpush3.bf16.msra.mxu1 %v7386_v20 }
 0xa37   :  { %5945 = vmatprep.subr.bf16.mxu0 %v6560_v12  ;;  %5957 = vmatprep.subr.bf16.mxu1 %v6560_v12 }
 0xa3a   :  { %5946 = vmatpush3.bf16.msra.mxu0 %v7400_v6  ;;  %5958 = vmatpush3.bf16.msra.mxu1 %v7402_v2 }
 0xa3b   :  { %5947 = vmatprep.subr.bf16.mxu0 %v6560_v12  ;;  %5959 = vmatprep.subr.bf16.mxu1 %v6560_v12 }
 0xa3e   :  { %5948 = vmatpush3.bf16.msra.mxu0 %v7416_v63  ;;  %5960 = vmatpush3.bf16.msra.mxu1 %v7418_v22 }
 0xa3f   :  { %5965 = vmatprep.subr.bf16.mxu0 %v6560_v12  ;;  %5977 = vmatprep.subr.bf16.mxu1 %v6560_v12 }
 0xae1   :  { %v3414_v41 = vpop.f32.mrf.mxu0  ;;  %v3456_v44 = vpop.f32.mrf.mxu1 }
 0xae2   :  { %v3420_v14 = vadd.f32 %v3414_v41, %v3376_v39  ;;  %v3462_v15 = vadd.f32 %v3456_v44, %v3421_v43 }
 0xae3   :  { %v5903_v16 = vpop.f32.mrf.mxu0  ;;  %v5915_v17 = vpop.f32.mrf.mxu1 }
 0xae4   :  { %v4786_v42 = vmul.f32 -1.442695, %v3420_v14  ;;  %v4785_v18 = vmul.f32 -1.442695, %v3462_v15 }
 0xae5   :  { %v3417_v46 = vpop.f32.mrf.mxu0  ;;  %v3459_v19 = vpop.f32.mrf.mxu1 }
 0xae6   :  { %6382 = vpow2.f32 %v4786_v42  ;;  %v3659_v46 = vld [vmem:[#allocation8 + $0x18] sm:$0xff] }
 0xae7   :  { %6384 = vpow2.f32 %v4785_v18  ;;  %v5904_v47 = vpop.f32.mrf.mxu0  ;;  %v5916_v24 = vpop.f32.mrf.mxu1 }
 0xae8   :  { %v3701_v47 = vld [vmem:[#allocation9 + $0x18] sm:$0xff] }
 0xaf1   :  { %v3498_v7 = vpop.f32.mrf.mxu0  ;;  %v3540_v9 = vpop.f32.mrf.mxu1 }
 0xaf2   :  { %v3504_v10 = vadd.f32 %v3498_v7, %v3463_v5  ;;  %v3546_v55 = vadd.f32 %v3540_v9, %v3505_v8 }
 0xaf3   :  { %v6383_v11 = vpop.eup %6382  ;;  %v5927_v54 = vpop.f32.mrf.mxu0 }
 0xaf4   :  { %v5939_v58 = vpop.f32.mrf.mxu1  ;;  %v6385_v59 = vpop.eup %6384  ;;  %v3557_v60 = vadd.f32 1.0, %v6383_v11  ;;  %v4787_v61 = vmul.f32 -1.442695, %v3546_v55  ;;  %6386 = vtanh.f32 %v3504_v10 }
 0xaf5   :  { %v3550_v62 = vadd.f32 1.0, %v6385_v59  ;;  %v3501_v1 = vpop.f32.mrf.mxu0 }
 0xaf6   :  { %v3543_v27 = vpop.f32.mrf.mxu1  ;;  %6388 = vrcp.f32 %v3557_v60 }
 0xaf7   :  { %6390 = vrcp.f32 %v3550_v62  ;;  %v5928_v0 = vpop.f32.mrf.mxu0 }
 0xaf8   :  { %v5940_v28 = vpop.f32.mrf.mxu1  ;;  %6392 = vpow2.f32 %v4787_v61 }
 0xb01   :  { %v6387_v3 = vpop.eup %6386 }
 0xb03   :  { %v6389_v56 = vpop.eup %6388 }
 0xb04   :  { %v6391_v57 = vpop.eup %6390  ;;  %v3561_v13 = vmul.f32 %v6389_v56, %v6387_v3 }
 0xb05   :  { %v6393_v31 = vpop.eup %6392  ;;  %v3553_v32 = vmul.f32 %v6391_v57, %v7574_v36  ;;  %v3572_v36 = vld [vmem:[#allocation6 + $0x18] sm:$0xff] }
 0xb06   :  { %v3566_v29 = vadd.f32 1.0, %v6393_v31 }
 0xb07   :  { %v7622_v30 = vadd.f32 %v3561_v13, %v3553_v32 }
 0xb08   :  { %6394 = vrcp.f32 %v3566_v29 }
 0xb09   :  { %6396 = vtanh.f32 %v7622_v30 }
 0xb15   :  { %v6395_v33 = vpop.eup %6394 }
 0xb16   :  { %v6397_v34 = vpop.eup %6396 }
 0xb17   :  { %v3570_v35 = vmul.f32 %v6397_v34, %v6395_v33 }
 0xb19   :  { %v3571_v21 = vpack.c.bf16 %v3570_v35, %v3570_v35 }
 0xb1b   :  { %5950 = vmatmul.mubr.msk.bf16.vlgmr.msra.gmra.mxu0 %vm213_vm3, %v3571_v21  ;;  %5962 = vmatmul.mubr.msk.bf16.vlgmr.msra.gmra.mxu1 %vm213_vm3, %v3571_v21 }
 0xb1c   :  { %5966 = vmatpush3.bf16.msra.mxu0 %v7430_v23  ;;  %5978 = vmatpush3.bf16.msra.mxu1 %v7432_v25 }
 0xb1d   :  { %5967 = vmatprep.subr.bf16.mxu0 %v6560_v12  ;;  %5979 = vmatprep.subr.bf16.mxu1 %v6560_v12 }
 0xb1e   :  { %5973 = vmatprep.mubr.msk.bf16.mxu0 %vm6561_vm2, %v6560_v12  ;;  %5985 = vmatprep.mubr.msk.bf16.mxu1 %vm6561_vm2, %v6560_v12 }
 0xb20   :  { %5968 = vmatpush3.bf16.msra.mxu0 %v7444_v26  ;;  %5980 = vmatpush3.bf16.msra.mxu1 %v7446_v50 }
 0xb21   :  { %5969 = vmatprep.subr.bf16.mxu0 %v6560_v12  ;;  %5981 = vmatprep.subr.bf16.mxu1 %v6560_v12 }
 0xb24   :  { %5970 = vmatpush3.bf16.msra.mxu0 %v7456_v51  ;;  %5982 = vmatpush3.bf16.msra.mxu1 %v7458_v52 }
 0xb25   :  { %5971 = vmatprep.subr.bf16.mxu0 %v6560_v12  ;;  %5983 = vmatprep.subr.bf16.mxu1 %v6560_v12 }
 0xb28   :  { %5972 = vmatpush3.bf16.msra.mxu0 %v7464_v53  ;;  %5984 = vmatpush3.bf16.msra.mxu1 %v7466_v4 }
 0xb29   :  { %5989 = vmatprep.subr.bf16.mxu0 %v6560_v12  ;;  %6001 = vmatprep.subr.bf16.mxu1 %v6560_v12 }
 0xb2b   :  { %5974 = vmatmul.mubr.msk.bf16.vlgmr.msra.gmra.mxu0 %vm213_vm3, %v3571_v21  ;;  %5986 = vmatmul.mubr.msk.bf16.vlgmr.msra.gmra.mxu1 %vm213_vm3, %v3571_v21 }
 0xb2c   :  { %5990 = vmatpush3.bf16.msra.mxu0 %v7374_v45  ;;  %6002 = vmatpush3.bf16.msra.mxu1 %v7376_v48 }
 0xb2d   :  { %5991 = vmatprep.subr.bf16.mxu0 %v6560_v12  ;;  %6003 = vmatprep.subr.bf16.mxu1 %v6560_v12 }
 0xb2e   :  { %5997 = vmatprep.mubr.msk.bf16.mxu0 %vm6561_vm2, %v6560_v12  ;;  %6009 = vmatprep.mubr.msk.bf16.mxu1 %vm6561_vm2, %v6560_v12 }
 0xb30   :  { %5992 = vmatpush3.bf16.msra.mxu0 %v7384_v49  ;;  %6004 = vmatpush3.bf16.msra.mxu1 %v7386_v20 }
 0xb31   :  { %5993 = vmatprep.subr.bf16.mxu0 %v6560_v12  ;;  %6005 = vmatprep.subr.bf16.mxu1 %v6560_v12 }
 0xb34   :  { %5994 = vmatpush3.bf16.msra.mxu0 %v7400_v6  ;;  %6006 = vmatpush3.bf16.msra.mxu1 %v7402_v2 }
 0xb35   :  { %5995 = vmatprep.subr.bf16.mxu0 %v6560_v12  ;;  %6007 = vmatprep.subr.bf16.mxu1 %v6560_v12 }
 0xb38   :  { %5996 = vmatpush3.bf16.msra.mxu0 %v7416_v63  ;;  %6008 = vmatpush3.bf16.msra.mxu1 %v7418_v22 }
 0xb39   :  { %6013 = vmatprep.subr.bf16.mxu0 %v6560_v12  ;;  %6025 = vmatprep.subr.bf16.mxu1 %v6560_v12 }
 0xbdb   :  { %v3610_v37 = vpop.f32.mrf.mxu0  ;;  %v3652_v40 = vpop.f32.mrf.mxu1 }
 0xbdc   :  { %v3616_v39 = vadd.f32 %v3610_v37, %v3572_v36  ;;  %v3658_v41 = vadd.f32 %v3652_v40, %v3617_v38 }
 0xbdd   :  { %v5951_v43 = vpop.f32.mrf.mxu0  ;;  %v5963_v44 = vpop.f32.mrf.mxu1 }
 0xbde   :  { %v4793_v14 = vmul.f32 -1.442695, %v3616_v39  ;;  %v4792_v15 = vmul.f32 -1.442695, %v3658_v41 }
 0xbdf   :  { %v3613_v16 = vpop.f32.mrf.mxu0  ;;  %v3655_v17 = vpop.f32.mrf.mxu1 }
 0xbe0   :  { %6398 = vpow2.f32 %v4793_v14 }
 0xbe1   :  { %6400 = vpow2.f32 %v4792_v15  ;;  %v5952_v42 = vpop.f32.mrf.mxu0  ;;  %v5964_v18 = vpop.f32.mrf.mxu1 }
 0xbeb   :  { %v3694_v19 = vpop.f32.mrf.mxu0  ;;  %v3736_v24 = vpop.f32.mrf.mxu1 }
 0xbec   :  { %v3700_v5 = vadd.f32 %v3694_v19, %v3659_v46  ;;  %v3742_v7 = vadd.f32 %v3736_v24, %v3701_v47 }
 0xbed   :  { %v6399_v8 = vpop.eup %6398  ;;  %v5975_v9 = vpop.f32.mrf.mxu0 }
 0xbee   :  { %v5987_v10 = vpop.f32.mrf.mxu1  ;;  %v6401_v55 = vpop.eup %6400  ;;  %v3753_v11 = vadd.f32 1.0, %v6399_v8  ;;  %v4794_v54 = vmul.f32 -1.442695, %v3742_v7  ;;  %6402 = vtanh.f32 %v3700_v5 }
 0xbef   :  { %v3746_v58 = vadd.f32 1.0, %v6401_v55  ;;  %v3697_v59 = vpop.f32.mrf.mxu0  ;;  %v7723_v55 = vld [vmem:[#allocation14 + $0x58] sm:$0xff]  }
 0xbf0   :  { %v3739_v60 = vpop.f32.mrf.mxu1  ;;  %6404 = vrcp.f32 %v3753_v11  ;;  %v7726_v11 = vld [vmem:[#allocation14 + $0x78] sm:$0xff]   ;;  %v7743_v59 = vld [vmem:[#allocation14 + $0x48] sm:$0xff]  }
 0xbf1   :  { %6406 = vrcp.f32 %v3746_v58  ;;  %v5976_v61 = vpop.f32.mrf.mxu0  ;;  %v7738_v58 = vld [vmem:[#allocation14 + $0x70] sm:$0xff]   ;;  %v7746_v60 = vld [vmem:[#allocation14 + $0x68] sm:$0xff]  }
 0xbf2   :  { %v5988_v62 = vpop.f32.mrf.mxu1  ;;  %6408 = vpow2.f32 %v4794_v54  ;;  %v7735_v54 = vld [vmem:[#allocation14 + $0x50] sm:$0xff]   ;;  %v7751_v61 = vld [vmem:[#allocation14 + $0x40] sm:$0xff]  }
 0xbf3   :  { %v7754_v62 = vld [vmem:[#allocation14 + $0x60] sm:$0xff]  }
 0xbfb   :  { %v6403_v1 = vpop.eup %6402 }
 0xbfd   :  { %v6405_v27 = vpop.eup %6404 }
 0xbfe   :  { %v6407_v0 = vpop.eup %6406  ;;  %v3757_v28 = vmul.f32 %v6405_v27, %v6403_v1  ;;  %v7761_v1 = vld [vmem:[#allocation14 + $0x18] sm:$0xff]  }
 0xbff   :  { %v6409_v3 = vpop.eup %6408  ;;  %v3749_v56 = vmul.f32 %v6407_v0, %v7622_v30  ;;  %v3897_v30 = vld [vmem:[#allocation9 + $0x20] sm:$0xff]  ;;  %v7773_v0 = vld [vmem:[#allocation14 + $0x10] sm:$0xff]  }
 0xc00   :  { %v3762_v57 = vadd.f32 1.0, %v6409_v3  ;;  %v7764_v27 = vld [vmem:[#allocation14 + $0x38] sm:$0xff]   ;;  %v7781_v3 = vld [vmem:[#allocation14 + $0x8] sm:$0xff]  }
 0xc01   :  { %v7670_v13 = vadd.f32 %v3757_v28, %v3749_v56  ;;  %v7776_v28 = vld [vmem:[#allocation14 + $0x30] sm:$0xff]   ;;  %v7784_v56 = vld [vmem:[#allocation14 + $0x28] sm:$0xff]  }
 0xc02   :  { %6410 = vrcp.f32 %v3762_v57  ;;  %v7789_v57 = vld [vmem:[#allocation14] sm:$0xff]  }
 0xc03   :  { %6412 = vtanh.f32 %v7670_v13 }
 0xc0f   :  { %v6411_v31 = vpop.eup %6410 }
 0xc10   :  { %v6413_v32 = vpop.eup %6412 }
 0xc11   :  { %v3766_v29 = vmul.f32 %v6413_v32, %v6411_v31  ;;  %v3964_v31 = vld [vmem:[#allocation6 + $0x28] sm:$0xff] }
 0xc13   :  { %v3767_v33 = vpack.c.bf16 %v3766_v29, %v3766_v29  ;;  %v4009_v29 = vld [vmem:[#allocation7 + $0x28] sm:$0xff] }
 0xc15   :  { %5998 = vmatmul.mubr.msk.bf16.vlgmr.msra.gmra.mxu0 %vm213_vm3, %v3767_v33  ;;  %6010 = vmatmul.mubr.msk.bf16.vlgmr.msra.gmra.mxu1 %vm213_vm3, %v3767_v33 }
 0xc16   :  { %6014 = vmatpush3.bf16.msra.mxu0 %v7430_v23  ;;  %6026 = vmatpush3.bf16.msra.mxu1 %v7432_v25 }
 0xc17   :  { %6015 = vmatprep.subr.bf16.mxu0 %v6560_v12  ;;  %6027 = vmatprep.subr.bf16.mxu1 %v6560_v12 }
 0xc18   :  { %6021 = vmatprep.mubr.msk.bf16.mxu0 %vm6561_vm2, %v6560_v12  ;;  %6033 = vmatprep.mubr.msk.bf16.mxu1 %vm6561_vm2, %v6560_v12 }
 0xc1a   :  { %6016 = vmatpush3.bf16.msra.mxu0 %v7444_v26  ;;  %6028 = vmatpush3.bf16.msra.mxu1 %v7446_v50 }
 0xc1b   :  { %6017 = vmatprep.subr.bf16.mxu0 %v6560_v12  ;;  %6029 = vmatprep.subr.bf16.mxu1 %v6560_v12 }
 0xc1e   :  { %6018 = vmatpush3.bf16.msra.mxu0 %v7456_v51  ;;  %6030 = vmatpush3.bf16.msra.mxu1 %v7458_v52 }
 0xc1f   :  { %6019 = vmatprep.subr.bf16.mxu0 %v6560_v12  ;;  %6031 = vmatprep.subr.bf16.mxu1 %v6560_v12 }
 0xc22   :  { %6020 = vmatpush3.bf16.msra.mxu0 %v7464_v53  ;;  %6032 = vmatpush3.bf16.msra.mxu1 %v7466_v4  ;;  %v3855_v53 = vld [vmem:[#allocation8 + $0x20] sm:$0xff] }
 0xc23   :  { %6037 = vmatprep.subr.bf16.mxu0 %v6560_v12  ;;  %6049 = vmatprep.subr.bf16.mxu1 %v6560_v12 }
 0xc25   :  { %6022 = vmatmul.mubr.msk.bf16.vlgmr.msra.gmra.mxu0 %vm213_vm3, %v3767_v33  ;;  %6034 = vmatmul.mubr.msk.bf16.vlgmr.msra.gmra.mxu1 %vm213_vm3, %v3767_v33 }
 0xc26   :  { %6038 = vmatpush3.bf16.msra.mxu0 %v7374_v45  ;;  %6050 = vmatpush3.bf16.msra.mxu1 %v7376_v48  ;;  %v3768_v45 = vld [vmem:[#allocation6 + $0x20] sm:$0xff] }
 0xc27   :  { %6039 = vmatprep.subr.bf16.mxu0 %v6560_v12  ;;  %6051 = vmatprep.subr.bf16.mxu1 %v6560_v12 }
 0xc28   :  { %6045 = vmatprep.mubr.msk.bf16.mxu0 %vm6561_vm2, %v6560_v12  ;;  %6057 = vmatprep.mubr.msk.bf16.mxu1 %vm6561_vm2, %v6560_v12 }
 0xc2a   :  { %6040 = vmatpush3.bf16.msra.mxu0 %v7384_v49  ;;  %6052 = vmatpush3.bf16.msra.mxu1 %v7386_v20  ;;  %v3813_v49 = vld [vmem:[#allocation7 + $0x20] sm:$0xff] }
 0xc2b   :  { %6041 = vmatprep.subr.bf16.mxu0 %v6560_v12  ;;  %6053 = vmatprep.subr.bf16.mxu1 %v6560_v12 }
 0xc2e   :  { %6042 = vmatpush3.bf16.msra.mxu0 %v7400_v6  ;;  %6054 = vmatpush3.bf16.msra.mxu1 %v7402_v2 }
 0xc2f   :  { %6043 = vmatprep.subr.bf16.mxu0 %v6560_v12  ;;  %6055 = vmatprep.subr.bf16.mxu1 %v6560_v12 }
 0xc32   :  { %6044 = vmatpush3.bf16.msra.mxu0 %v7416_v63  ;;  %6056 = vmatpush3.bf16.msra.mxu1 %v7418_v22 }
 0xc33   :  { %6061 = vmatprep.subr.bf16.mxu0 %v6560_v12  ;;  %6073 = vmatprep.subr.bf16.mxu1 %v6560_v12 }
 0xcd5   :  { %v3806_v48 = vpop.f32.mrf.mxu0  ;;  %v3848_v20 = vpop.f32.mrf.mxu1 }
 0xcd6   :  { %v3812_v23 = vadd.f32 %v3806_v48, %v3768_v45  ;;  %v3854_v6 = vadd.f32 %v3848_v20, %v3813_v49 }
 0xcd7   :  { %v5999_v25 = vpop.f32.mrf.mxu0  ;;  %v6011_v2 = vpop.f32.mrf.mxu1 }
 0xcd8   :  { %v4800_v26 = vmul.f32 -1.442695, %v3812_v23  ;;  %v4799_v50 = vmul.f32 -1.442695, %v3854_v6 }
 0xcd9   :  { %v3809_v51 = vpop.f32.mrf.mxu0  ;;  %v3851_v52 = vpop.f32.mrf.mxu1 }
 0xcda   :  { %6414 = vpow2.f32 %v4800_v26  ;;  %v4051_v51 = vld [vmem:[#allocation8 + $0x28] sm:$0xff] }
 0xcdb   :  { %6416 = vpow2.f32 %v4799_v50  ;;  %v6000_v63 = vpop.f32.mrf.mxu0  ;;  %v6012_v22 = vpop.f32.mrf.mxu1 }
 0xcdc   :  { %v4093_v63 = vld [vmem:[#allocation9 + $0x28] sm:$0xff] }
 0xce5   :  { %v3890_v4 = vpop.f32.mrf.mxu0  ;;  %v3932_v34 = vpop.f32.mrf.mxu1 }
 0xce6   :  { %v3896_v35 = vadd.f32 %v3890_v4, %v3855_v53  ;;  %v3938_v21 = vadd.f32 %v3932_v34, %v3897_v30 }
 0xce7   :  { %v6415_v36 = vpop.eup %6414  ;;  %v6023_v37 = vpop.f32.mrf.mxu0 }
 0xce8   :  { %v6035_v38 = vpop.f32.mrf.mxu1  ;;  %v6417_v40 = vpop.eup %6416  ;;  %v3949_v39 = vadd.f32 1.0, %v6415_v36  ;;  %v4801_v41 = vmul.f32 -1.442695, %v3938_v21  ;;  %6418 = vtanh.f32 %v3896_v35 }
 0xce9   :  { %v3942_v43 = vadd.f32 1.0, %v6417_v40  ;;  %v3893_v44 = vpop.f32.mrf.mxu0 }
 0xcea   :  { %v3935_v14 = vpop.f32.mrf.mxu1  ;;  %6420 = vrcp.f32 %v3949_v39 }
 0xceb   :  { %6422 = vrcp.f32 %v3942_v43  ;;  %v6024_v15 = vpop.f32.mrf.mxu0 }
 0xcec   :  { %v6036_v16 = vpop.f32.mrf.mxu1  ;;  %6424 = vpow2.f32 %v4801_v41 }
 0xcf5   :  { %v6419_v17 = vpop.eup %6418 }
 0xcf7   :  { %v6421_v42 = vpop.eup %6420 }
 0xcf8   :  { %v6423_v18 = vpop.eup %6422  ;;  %v3953_v46 = vmul.f32 %v6421_v42, %v6419_v17 }
 0xcf9   :  { %v6425_v19 = vpop.eup %6424  ;;  %v3945_v47 = vmul.f32 %v6423_v18, %v7670_v13  ;;  %v7792_v13 = vld [vmem:[#allocation14 + $0x20] sm:$0xff]  }
 0xcfa   :  { %v3958_v24 = vadd.f32 1.0, %v6425_v19 }
 0xcfb   :  { %v7718_v5 = vadd.f32 %v3953_v46, %v3945_v47 }
 0xcfc   :  { %6426 = vrcp.f32 %v3958_v24 }
 0xcfd   :  { %6428 = vtanh.f32 %v7718_v5 }
 0xd09   :  { %v6427_v7 = vpop.eup %6426 }
 0xd0a   :  { %v6429_v8 = vpop.eup %6428 }
 0xd0b   :  { %v3962_v9 = vmul.f32 %v6429_v8, %v6427_v7 }
 0xd0d   :  { %v3963_v10 = vpack.c.bf16 %v3962_v9, %v3962_v9  ;;  %v4205_v9 = vld [vmem:[#allocation7 + $0x30] sm:$0xff] }
 0xd0f   :  { %6046 = vmatmul.mubr.msk.bf16.vlgmr.msra.gmra.mxu0 %vm213_vm3, %v3963_v10  ;;  %6058 = vmatmul.mubr.msk.bf16.vlgmr.msra.gmra.mxu1 %vm213_vm3, %v3963_v10 }
 0xd10   :  { %6062 = vmatpush3.bf16.msra.mxu0 %v7723_v55  ;;  %6074 = vmatpush3.bf16.msra.mxu1 %v7726_v11 }
 0xd11   :  { %6063 = vmatprep.subr.bf16.mxu0 %v6560_v12  ;;  %6075 = vmatprep.subr.bf16.mxu1 %v6560_v12 }
 0xd12   :  { %6069 = vmatprep.mubr.msk.bf16.mxu0 %vm6561_vm2, %v6560_v12  ;;  %6081 = vmatprep.mubr.msk.bf16.mxu1 %vm6561_vm2, %v6560_v12 }
 0xd14   :  { %6064 = vmatpush3.bf16.msra.mxu0 %v7735_v54  ;;  %6076 = vmatpush3.bf16.msra.mxu1 %v7738_v58 }
 0xd15   :  { %6065 = vmatprep.subr.bf16.mxu0 %v6560_v12  ;;  %6077 = vmatprep.subr.bf16.mxu1 %v6560_v12 }
 0xd18   :  { %6066 = vmatpush3.bf16.msra.mxu0 %v7743_v59  ;;  %6078 = vmatpush3.bf16.msra.mxu1 %v7746_v60 }
 0xd19   :  { %6067 = vmatprep.subr.bf16.mxu0 %v6560_v12  ;;  %6079 = vmatprep.subr.bf16.mxu1 %v6560_v12 }
 0xd1c   :  { %6068 = vmatpush3.bf16.msra.mxu0 %v7751_v61  ;;  %6080 = vmatpush3.bf16.msra.mxu1 %v7754_v62 }
 0xd1d   :  { %6085 = vmatprep.subr.bf16.mxu0 %v6560_v12  ;;  %6097 = vmatprep.subr.bf16.mxu1 %v6560_v12 }
 0xd1f   :  { %6070 = vmatmul.mubr.msk.bf16.vlgmr.msra.gmra.mxu0 %vm213_vm3, %v3963_v10  ;;  %6082 = vmatmul.mubr.msk.bf16.vlgmr.msra.gmra.mxu1 %vm213_vm3, %v3963_v10 }
 0xd20   :  { %6086 = vmatpush3.bf16.msra.mxu0 %v7761_v1  ;;  %6098 = vmatpush3.bf16.msra.mxu1 %v7764_v27 }
 0xd21   :  { %6087 = vmatprep.subr.bf16.mxu0 %v6560_v12  ;;  %6099 = vmatprep.subr.bf16.mxu1 %v6560_v12 }
 0xd22   :  { %6093 = vmatprep.mubr.msk.bf16.mxu0 %vm6561_vm2, %v6560_v12  ;;  %6105 = vmatprep.mubr.msk.bf16.mxu1 %vm6561_vm2, %v6560_v12 }
 0xd24   :  { %6088 = vmatpush3.bf16.msra.mxu0 %v7773_v0  ;;  %6100 = vmatpush3.bf16.msra.mxu1 %v7776_v28 }
 0xd25   :  { %6089 = vmatprep.subr.bf16.mxu0 %v6560_v12  ;;  %6101 = vmatprep.subr.bf16.mxu1 %v6560_v12 }
 0xd28   :  { %6090 = vmatpush3.bf16.msra.mxu0 %v7781_v3  ;;  %6102 = vmatpush3.bf16.msra.mxu1 %v7784_v56 }
 0xd29   :  { %6091 = vmatprep.subr.bf16.mxu0 %v6560_v12  ;;  %6103 = vmatprep.subr.bf16.mxu1 %v6560_v12 }
 0xd2c   :  { %6092 = vmatpush3.bf16.msra.mxu0 %v7789_v57  ;;  %6104 = vmatpush3.bf16.msra.mxu1 %v7792_v13 }
 0xd2d   :  { %6109 = vmatprep.subr.bf16.mxu0 %v6560_v12  ;;  %6121 = vmatprep.subr.bf16.mxu1 %v6560_v12 }
 0xdcf   :  { %v4002_v32 = vpop.f32.mrf.mxu0  ;;  %v4044_v33 = vpop.f32.mrf.mxu1 }
 0xdd0   :  { %v4008_v45 = vadd.f32 %v4002_v32, %v3964_v31  ;;  %v4050_v48 = vadd.f32 %v4044_v33, %v4009_v29  ;;  %v4247_v29 = vld [vmem:[#allocation8 + $0x30] sm:$0xff] }
 0xdd1   :  { %v6047_v49 = vpop.f32.mrf.mxu0  ;;  %v6059_v20 = vpop.f32.mrf.mxu1 }
 0xdd2   :  { %v4807_v23 = vmul.f32 -1.442695, %v4008_v45  ;;  %v4806_v6 = vmul.f32 -1.442695, %v4050_v48  ;;  %v4289_v45 = vld [vmem:[#allocation9 + $0x30] sm:$0xff] }
 0xdd3   :  { %v4005_v25 = vpop.f32.mrf.mxu0  ;;  %v4047_v2 = vpop.f32.mrf.mxu1 }
 0xdd4   :  { %6430 = vpow2.f32 %v4807_v23 }
 0xdd5   :  { %6432 = vpow2.f32 %v4806_v6  ;;  %v6048_v26 = vpop.f32.mrf.mxu0  ;;  %v6060_v50 = vpop.f32.mrf.mxu1 }
 0xddf   :  { %v4086_v52 = vpop.f32.mrf.mxu0  ;;  %v4128_v22 = vpop.f32.mrf.mxu1 }
 0xde0   :  { %v4092_v53 = vadd.f32 %v4086_v52, %v4051_v51  ;;  %v4134_v4 = vadd.f32 %v4128_v22, %v4093_v63 }
 0xde1   :  { %v6431_v30 = vpop.eup %6430  ;;  %v6071_v34 = vpop.f32.mrf.mxu0 }
 0xde2   :  { %v6083_v35 = vpop.f32.mrf.mxu1  ;;  %v6433_v21 = vpop.eup %6432  ;;  %v4145_v36 = vadd.f32 1.0, %v6431_v30  ;;  %v4808_v37 = vmul.f32 -1.442695, %v4134_v4  ;;  %6434 = vtanh.f32 %v4092_v53 }
 0xde3   :  { %v4138_v38 = vadd.f32 1.0, %v6433_v21  ;;  %v4089_v40 = vpop.f32.mrf.mxu0 }
 0xde4   :  { %v4131_v39 = vpop.f32.mrf.mxu1  ;;  %6436 = vrcp.f32 %v4145_v36 }
 0xde5   :  { %6438 = vrcp.f32 %v4138_v38  ;;  %v6072_v41 = vpop.f32.mrf.mxu0 }
 0xde6   :  { %v6084_v43 = vpop.f32.mrf.mxu1  ;;  %6440 = vpow2.f32 %v4808_v37 }
 0xdef   :  { %v6435_v44 = vpop.eup %6434 }
 0xdf1   :  { %v6437_v14 = vpop.eup %6436 }
 0xdf2   :  { %v6439_v15 = vpop.eup %6438  ;;  %v4149_v16 = vmul.f32 %v6437_v14, %v6435_v44 }
 0xdf3   :  { %v6441_v17 = vpop.eup %6440  ;;  %v4141_v42 = vmul.f32 %v6439_v15, %v7718_v5  ;;  %v4160_v5 = vld [vmem:[#allocation6 + $0x30] sm:$0xff] }
 0xdf4   :  { %v4154_v18 = vadd.f32 1.0, %v6441_v17 }
 0xdf5   :  { %v7798_v46 = vadd.f32 %v4149_v16, %v4141_v42  ;;  %v4443_v42 = vld [vmem:[#allocation8 + $0x38] sm:$0xff] }
 0xdf6   :  { %6442 = vrcp.f32 %v4154_v18 }
 0xdf7   :  { %6444 = vtanh.f32 %v7798_v46 }
 0xe03   :  { %v6443_v19 = vpop.eup %6442 }
 0xe04   :  { %v6445_v47 = vpop.eup %6444 }
 0xe05   :  { %v4158_v24 = vmul.f32 %v6445_v47, %v6443_v19 }
 0xe07   :  { %v4159_v7 = vpack.c.bf16 %v4158_v24, %v4158_v24 }
 0xe09   :  { %6094 = vmatmul.mubr.msk.bf16.vlgmr.msra.gmra.mxu0 %vm213_vm3, %v4159_v7  ;;  %6106 = vmatmul.mubr.msk.bf16.vlgmr.msra.gmra.mxu1 %vm213_vm3, %v4159_v7 }
 0xe0a   :  { %6110 = vmatpush3.bf16.msra.mxu0 %v7723_v55  ;;  %6122 = vmatpush3.bf16.msra.mxu1 %v7726_v11 }
 0xe0b   :  { %6111 = vmatprep.subr.bf16.mxu0 %v6560_v12  ;;  %6123 = vmatprep.subr.bf16.mxu1 %v6560_v12 }
 0xe0c   :  { %6117 = vmatprep.mubr.msk.bf16.mxu0 %vm6561_vm2, %v6560_v12  ;;  %6129 = vmatprep.mubr.msk.bf16.mxu1 %vm6561_vm2, %v6560_v12 }
 0xe0e   :  { %6112 = vmatpush3.bf16.msra.mxu0 %v7735_v54  ;;  %6124 = vmatpush3.bf16.msra.mxu1 %v7738_v58 }
 0xe0f   :  { %6113 = vmatprep.subr.bf16.mxu0 %v6560_v12  ;;  %6125 = vmatprep.subr.bf16.mxu1 %v6560_v12 }
 0xe12   :  { %6114 = vmatpush3.bf16.msra.mxu0 %v7743_v59  ;;  %6126 = vmatpush3.bf16.msra.mxu1 %v7746_v60 }
 0xe13   :  { %6115 = vmatprep.subr.bf16.mxu0 %v6560_v12  ;;  %6127 = vmatprep.subr.bf16.mxu1 %v6560_v12 }
 0xe16   :  { %6116 = vmatpush3.bf16.msra.mxu0 %v7751_v61  ;;  %6128 = vmatpush3.bf16.msra.mxu1 %v7754_v62 }
 0xe17   :  { %6133 = vmatprep.subr.bf16.mxu0 %v6560_v12  ;;  %6145 = vmatprep.subr.bf16.mxu1 %v6560_v12 }
 0xe19   :  { %6118 = vmatmul.mubr.msk.bf16.vlgmr.msra.gmra.mxu0 %vm213_vm3, %v4159_v7  ;;  %6130 = vmatmul.mubr.msk.bf16.vlgmr.msra.gmra.mxu1 %vm213_vm3, %v4159_v7 }
 0xe1a   :  { %6134 = vmatpush3.bf16.msra.mxu0 %v7761_v1  ;;  %6146 = vmatpush3.bf16.msra.mxu1 %v7764_v27 }
 0xe1b   :  { %6135 = vmatprep.subr.bf16.mxu0 %v6560_v12  ;;  %6147 = vmatprep.subr.bf16.mxu1 %v6560_v12 }
 0xe1c   :  { %6141 = vmatprep.mubr.msk.bf16.mxu0 %vm6561_vm2, %v6560_v12  ;;  %6153 = vmatprep.mubr.msk.bf16.mxu1 %vm6561_vm2, %v6560_v12 }
 0xe1e   :  { %6136 = vmatpush3.bf16.msra.mxu0 %v7773_v0  ;;  %6148 = vmatpush3.bf16.msra.mxu1 %v7776_v28 }
 0xe1f   :  { %6137 = vmatprep.subr.bf16.mxu0 %v6560_v12  ;;  %6149 = vmatprep.subr.bf16.mxu1 %v6560_v12 }
 0xe22   :  { %6138 = vmatpush3.bf16.msra.mxu0 %v7781_v3  ;;  %6150 = vmatpush3.bf16.msra.mxu1 %v7784_v56 }
 0xe23   :  { %6139 = vmatprep.subr.bf16.mxu0 %v6560_v12  ;;  %6151 = vmatprep.subr.bf16.mxu1 %v6560_v12 }
 0xe26   :  { %6140 = vmatpush3.bf16.msra.mxu0 %v7789_v57  ;;  %6152 = vmatpush3.bf16.msra.mxu1 %v7792_v13 }
 0xe27   :  { %6157 = vmatprep.subr.bf16.mxu0 %v6560_v12  ;;  %6169 = vmatprep.subr.bf16.mxu1 %v6560_v12 }
 0xec9   :  { %v4198_v8 = vpop.f32.mrf.mxu0  ;;  %v4240_v10 = vpop.f32.mrf.mxu1 }
 0xeca   :  { %v4204_v1 = vadd.f32 %v4198_v8, %v4160_v5  ;;  %v4246_v27 = vadd.f32 %v4240_v10, %v4205_v9 }
 0xecb   :  { %v6095_v0 = vpop.f32.mrf.mxu0  ;;  %v6107_v28 = vpop.f32.mrf.mxu1 }
 0xecc   :  { %v4814_v3 = vmul.f32 -1.442695, %v4204_v1  ;;  %v4813_v56 = vmul.f32 -1.442695, %v4246_v27 }
 0xecd   :  { %v4201_v31 = vpop.f32.mrf.mxu0  ;;  %v4243_v32 = vpop.f32.mrf.mxu1 }
 0xece   :  { %6446 = vpow2.f32 %v4814_v3 }
 0xecf   :  { %6448 = vpow2.f32 %v4813_v56  ;;  %v6096_v57 = vpop.f32.mrf.mxu0  ;;  %v6108_v13 = vpop.f32.mrf.mxu1 }
 0xed9   :  { %v4282_v33 = vpop.f32.mrf.mxu0  ;;  %v4324_v48 = vpop.f32.mrf.mxu1 }
 0xeda   :  { %v4288_v49 = vadd.f32 %v4282_v33, %v4247_v29  ;;  %v4330_v20 = vadd.f32 %v4324_v48, %v4289_v45 }
 0xedb   :  { %v6447_v23 = vpop.eup %6446  ;;  %v6119_v6 = vpop.f32.mrf.mxu0 }
 0xedc   :  { %v6131_v25 = vpop.f32.mrf.mxu1  ;;  %v6449_v2 = vpop.eup %6448  ;;  %v4341_v26 = vadd.f32 1.0, %v6447_v23  ;;  %v4815_v50 = vmul.f32 -1.442695, %v4330_v20  ;;  %6450 = vtanh.f32 %v4288_v49  ;;  %v4823_v23 = vld [vmem:[%s7886_s7] ss:$0 sm:$0xff] }
 0xedd   :  { %v4334_v51 = vadd.f32 1.0, %v6449_v2  ;;  %v4285_v52 = vpop.f32.mrf.mxu0 }
 0xede   :  { %v4327_v63 = vpop.f32.mrf.mxu1  ;;  %6452 = vrcp.f32 %v4341_v26  ;;  %v4824_v26 = vld [vmem:[#allocation11] ss:$0 sm:$0xff] }
 0xedf   :  { %6454 = vrcp.f32 %v4334_v51  ;;  %v6120_v22 = vpop.f32.mrf.mxu0 }
 0xee0   :  { %v6132_v53 = vpop.f32.mrf.mxu1  ;;  %6456 = vpow2.f32 %v4815_v50 }
 0xee9   :  { %v6451_v4 = vpop.eup %6450 }
 0xeeb   :  { %v6453_v30 = vpop.eup %6452 }
 0xeec   :  { %v6455_v34 = vpop.eup %6454  ;;  %v4345_v35 = vmul.f32 %v6453_v30, %v6451_v4 }
 0xeed   :  { %v6457_v21 = vpop.eup %6456  ;;  %v4337_v36 = vmul.f32 %v6455_v34, %v7798_v46  ;;  %v4485_v46 = vld [vmem:[#allocation9 + $0x38] sm:$0xff] }
 0xeee   :  { %v4350_v37 = vadd.f32 1.0, %v6457_v21 }
 0xeef   :  { %v7846_v38 = vadd.f32 %v4345_v35, %v4337_v36 }
 0xef0   :  { %6458 = vrcp.f32 %v4350_v37 }
 0xef1   :  { %6460 = vtanh.f32 %v7846_v38 }
 0xefd   :  { %v6459_v40 = vpop.eup %6458 }
 0xefe   :  { %v6461_v39 = vpop.eup %6460 }
 0xeff   :  { %v4354_v41 = vmul.f32 %v6461_v39, %v6459_v40 }
 0xf01   :  { %v4355_v43 = vpack.c.bf16 %v4354_v41, %v4354_v41 }
 0xf03   :  { %6142 = vmatmul.mubr.msk.bf16.vlgmr.msra.gmra.mxu0 %vm213_vm3, %v4355_v43  ;;  %6154 = vmatmul.mubr.msk.bf16.vlgmr.msra.gmra.mxu1 %vm213_vm3, %v4355_v43 }
 0xf04   :  { %6158 = vmatpush3.bf16.msra.mxu0 %v7723_v55  ;;  %6170 = vmatpush3.bf16.msra.mxu1 %v7726_v11  ;;  %v4356_v55 = vld [vmem:[#allocation6 + $0x38] sm:$0xff] }
 0xf05   :  { %6159 = vmatprep.subr.bf16.mxu0 %v6560_v12  ;;  %6171 = vmatprep.subr.bf16.mxu1 %v6560_v12 }
 0xf06   :  { %6165 = vmatprep.mubr.msk.bf16.mxu0 %vm6561_vm2, %v6560_v12  ;;  %6177 = vmatprep.mubr.msk.bf16.mxu1 %vm6561_vm2, %v6560_v12 }
 0xf08   :  { %6160 = vmatpush3.bf16.msra.mxu0 %v7735_v54  ;;  %6172 = vmatpush3.bf16.msra.mxu1 %v7738_v58  ;;  %v4401_v54 = vld [vmem:[#allocation7 + $0x38] sm:$0xff] }
 0xf09   :  { %6161 = vmatprep.subr.bf16.mxu0 %v6560_v12  ;;  %6173 = vmatprep.subr.bf16.mxu1 %v6560_v12 }
 0xf0c   :  { %6162 = vmatpush3.bf16.msra.mxu0 %v7743_v59  ;;  %6174 = vmatpush3.bf16.msra.mxu1 %v7746_v60 }
 0xf0d   :  { %6163 = vmatprep.subr.bf16.mxu0 %v6560_v12  ;;  %6175 = vmatprep.subr.bf16.mxu1 %v6560_v12 }
 0xf10   :  { %6164 = vmatpush3.bf16.msra.mxu0 %v7751_v61  ;;  %6176 = vmatpush3.bf16.msra.mxu1 %v7754_v62 }
 0xf13   :  { %6166 = vmatmul.mubr.msk.bf16.vlgmr.msra.gmra.mxu0 %vm213_vm3, %v4355_v43  ;;  %6178 = vmatmul.mubr.msk.bf16.vlgmr.msra.gmra.mxu1 %vm213_vm3, %v4355_v43 }
 0xfc3   :  { %v4394_v11 = vpop.f32.mrf.mxu0  ;;  %v4436_v58 = vpop.f32.mrf.mxu1 }
 0xfc4   :  { %v4400_v44 = vadd.f32 %v4394_v11, %v4356_v55  ;;  %v4442_v59 = vadd.f32 %v4436_v58, %v4401_v54 }
 0xfc5   :  { %v6143_v14 = vpop.f32.mrf.mxu0  ;;  %v6155_v60 = vpop.f32.mrf.mxu1 }
 0xfc6   :  { %v4821_v15 = vmul.f32 -1.442695, %v4400_v44  ;;  %v4820_v16 = vmul.f32 -1.442695, %v4442_v59 }
 0xfc7   :  { %v4397_v17 = vpop.f32.mrf.mxu0  ;;  %v4439_v12 = vpop.f32.mrf.mxu1 }
 0xfc8   :  { %6462 = vpow2.f32 %v4821_v15 }
 0xfc9   :  { %6464 = vpow2.f32 %v4820_v16  ;;  %v6144_v61 = vpop.f32.mrf.mxu0  ;;  %v6156_v62 = vpop.f32.mrf.mxu1 }
 0xfd3   :  { %v4478_v18 = vpop.f32.mrf.mxu0  ;;  %v4520_v19 = vpop.f32.mrf.mxu1 }
 0xfd4   :  { %v4484_v47 = vadd.f32 %v4478_v18, %v4443_v42  ;;  %v4526_v24 = vadd.f32 %v4520_v19, %v4485_v46 }
 0xfd5   :  { %v6463_v7 = vpop.eup %6462  ;;  %v6167_v5 = vpop.f32.mrf.mxu0 }
 0xfd6   :  { %v6179_v8 = vpop.f32.mrf.mxu1  ;;  %v6465_v9 = vpop.eup %6464  ;;  %v4537_v10 = vadd.f32 1.0, %v6463_v7  ;;  %v4822_v1 = vmul.f32 -1.442695, %v4526_v24  ;;  %6466 = vtanh.f32 %v4484_v47 }
 0xfd7   :  { %v4530_v27 = vadd.f32 1.0, %v6465_v9  ;;  %v4481_v0 = vpop.f32.mrf.mxu0 }
 0xfd8   :  { %v4523_v28 = vpop.f32.mrf.mxu1  ;;  %6468 = vrcp.f32 %v4537_v10 }
 0xfd9   :  { %6470 = vrcp.f32 %v4530_v27  ;;  %v6168_v3 = vpop.f32.mrf.mxu0 }
 0xfda   :  { %v6180_v56 = vpop.f32.mrf.mxu1  ;;  %6472 = vpow2.f32 %v4822_v1 }
 0xfe3   :  { %v6467_v31 = vpop.eup %6466 }
 0xfe5   :  { %v6469_v32 = vpop.eup %6468 }
 0xfe6   :  { %v6471_v57 = vpop.eup %6470  ;;  %v4541_v13 = vmul.f32 %v6469_v32, %v6467_v31 }
 0xfe7   :  { %v6473_v29 = vpop.eup %6472  ;;  %v4533_v33 = vmul.f32 %v6471_v57, %v7846_v38 }
 0xfe8   :  { %v4546_v45 = vadd.f32 1.0, %v6473_v29 }
 0xfe9   :  { %v4542_v48 = vadd.f32 %v4541_v13, %v4533_v33 }
 0xfea   :  { %6474 = vrcp.f32 %v4546_v45 }
 0xfeb   :  { %6476 = vtanh.f32 %v4542_v48 }
 0xff7   :  { %v6475_v49 = vpop.eup %6474 }
 0xff8   :  { %v6477_v20 = vpop.eup %6476 }
 0xff9   :  { %v4550_v6 = vmul.f32 %v6477_v20, %v6475_v49 }
 0xffb   :  { %v4558_v25 = vmul.f32 %v4823_v23, %v4550_v6 }
 0xffd   :  { %v4559_v2 = vsel %vm213_vm3, %v4558_v25, 0.0 }
 0xffe   :  { %4560 = vadd.xlane.f32.xlu0 %v4559_v2 }
0x1087   :  { %v4561_v50 = vpop.xlane.xlu0 %4560 }
0x1088   :  { %v4569_v51 = vadd.f32 %v4824_v26, %v4561_v50 }
0x108a   :  { %4571 = vst.msk [vmem:[%s7888_s9] sm:$0xff] %vm4570_vm4, %v4569_v51 }
0x108b   :  { %4576 = vsyncpa [#allocation13], 1 }
0x108c   :  { %4577 = vsyncpa [#allocation15], 1 }

</bundles_post_ra>
